<compile_context>
chip_gen: v6e
topology: v6e:2x2x1
jax: 0.10.0
libtpu: 0.0.40
codegen_flags: <defaults>
</compile_context>

<pallas_src>
import functools

import jax
import jax.numpy as jnp
from jax.experimental import pallas as pl
from jax.experimental.pallas import tpu as pltpu  # noqa: F401  (TPU backend)


HEAD_PAD = 128  # merged action/value head padded to a lane-dense 128 columns


# ----------------------------------------------------------------------------
# In-kernel helpers
# ----------------------------------------------------------------------------
def _conv_rows(a_f32, t_ref, b_ref, row_step):
    """One "row-Toeplitz" layer on the stacked activation slab.

    a_f32   : (R, K) f32 activation slab (rows = image rows; batches stacked
              with a fixed 42-row per-image offset).
    t_ref   : (kh, K, N) bf16 per-kernel-row weights; stride-2 along W is
              folded into each (K, N) matrix (for the conv layers) or the rows
              are the per-conv3-row fc1 blocks (for the fc1 layer).
    b_ref   : (1, N) f32 bias tiled over output columns.
    row_step: slab-row distance between consecutive kernel-row taps.

    Returns relu(sum_i a[i*row_step : ...] @ t[i] + bias) as an
    (R - row_step*(kh-1), N) f32 slab.  Row r of the result is the layer
    output anchored at input slab row r; rows that are not a multiple of the
    layer's cumulative stride are don't-care and are never read downstream.
    """
    kh = t_ref.shape[0]
    rz = a_f32.shape[0] - row_step * (kh - 1)
    a_bf16 = a_f32.astype(jnp.bfloat16)        # cast ONCE; tap windows overlap
    z = None
    for i in range(kh):
        lhs = a_bf16[i * row_step:i * row_step + rz, :]
        y = jnp.dot(lhs, t_ref[i], preferred_element_type=jnp.float32)
        z = y if z is None else z + y
    return jnp.maximum(z + b_ref[...], 0.0)


def _fused_forward_kernel(x_ref, t1_ref, t2_ref, t3_ref, b1_ref, b2_ref,
                          b3_ref, t_fc1_ref, b_fc1_ref, w_head_ref,
                          b_head_ref, out_ref, *, batch, rows_per_image):
    a0 = x_ref[...]                                       # (B*42, 168)  f32
    a1 = _conv_rows(a0, t1_ref, b1_ref, row_step=1)       # (B*42-2,  640)
    a2 = _conv_rows(a1, t2_ref, b2_ref, row_step=2)       # (B*42-6,  288)
    a3 = _conv_rows(a2, t3_ref, b3_ref, row_step=4)       # (B*42-14, 128)
    # fc1 as a 4-tap row layer (row_step=8) over the whole slab; only rows
    # r = 42*b are meaningful, the rest are free-riding don't-care rows.
    hid = _conv_rows(a3, t_fc1_ref, b_fc1_ref, row_step=8)  # (B*42-38, 128)
    # merged, zero-padded action/value head: one slab-wide lane-dense GEMM.
    heads = jnp.dot(hid.astype(jnp.bfloat16), w_head_ref[...],
                    preferred_element_type=jnp.float32) + b_head_ref[...]
    # gather the B valid rows (slab rows 42*b) and store once, lane-dense.
    rows = [heads[b * rows_per_image:b * rows_per_image + 1, :]
            for b in range(batch)]
    out_ref[...] = jnp.concatenate(rows, axis=0)          # (B, 128)


# ----------------------------------------------------------------------------
# One-time parameter repacking (outside jit; pure functions of torch-layout
# parameters, so plugging in real PyTorch weights would give matching results)
# ----------------------------------------------------------------------------
def _conv_row_toeplitz(w_conv, w_in, stride=2):
    """(Cout,Cin,3,3) torch conv weight -> (3, W_in*Cin, W_out*Cout).

    T[i][w*Cin + ci, ow*Cout + co] = w_conv[co, ci, i, w - stride*ow]
    (zero outside 0 <= w - stride*ow < kw), so a full flattened input row
    (w, ci) @ T[i] yields the kernel-row-i contribution to a full flattened
    output row (ow, co).
    """
    cout, cin, kh, kw = w_conv.shape
    w_out = (w_in - kw) // stride + 1
    j = jnp.arange(w_in)[:, None] - stride * jnp.arange(w_out)[None, :]
    valid = (j >= 0) & (j < kw)
    jc = jnp.clip(j, 0, kw - 1)                         # (w_in, w_out)
    mats = []
    for i in range(kh):
        g = w_conv[:, :, i, :][:, :, jc]                # (Cout, Cin, w_in, w_out)
        g = jnp.where(valid[None, None, :, :], g, 0.0)
        mats.append(jnp.transpose(g, (2, 1, 3, 0)).reshape(w_in * cin,
                                                           w_out * cout))
    return jnp.stack(mats, axis=0)                      # (kh, W_in*Cin, W_out*Cout)


def prepare_params(params, action_size):
    prep = {
        "t1": _conv_row_toeplitz(params["conv1_w"], 42).astype(jnp.bfloat16),
        "t2": _conv_row_toeplitz(params["conv2_w"], 20).astype(jnp.bfloat16),
        "t3": _conv_row_toeplitz(params["conv3_w"], 9).astype(jnp.bfloat16),
        "b1": jnp.tile(params["conv1_b"], 20)[None, :],      # (1, 640)
        "b2": jnp.tile(params["conv2_b"], 9)[None, :],       # (1, 288)
        "b3": jnp.tile(params["conv3_b"], 4)[None, :],       # (1, 128)
        "b_fc1": params["fc1_b"][None, :],                   # (1, 128)
    }
    # fc1 input features: torch Flatten order is (c, h, w); the kernel's slab
    # order is (h, (w, c)).  Permute fc1 rows so the kernel matches torch, and
    # reshape to (4, 128, 128): tap h = the fc1 block for conv3 output row h.
    perm = jnp.transpose(jnp.arange(512).reshape(32, 4, 4), (1, 2, 0)).reshape(-1)
    prep["t_fc1"] = params["fc1_w"][perm, :].reshape(4, 128, 128).astype(
        jnp.bfloat16)
    # merged action/value head, zero-padded to 128 lane-dense columns.
    w_head = jnp.concatenate([params["fc2a_w"], params["fc2s_w"]], axis=1)
    b_head = jnp.concatenate([params["fc2a_b"], params["fc2s_b"]])[None, :]
    prep["w_head"] = jnp.pad(
        w_head, ((0, 0), (0, HEAD_PAD - w_head.shape[1]))).astype(jnp.bfloat16)
    prep["b_head"] = jnp.pad(b_head, ((0, 0), (0, HEAD_PAD - b_head.shape[1])))
    return prep


# ----------------------------------------------------------------------------
# Forward pass == Network.forward  (single pallas_call)
# ----------------------------------------------------------------------------
def _vmem_spec(x):
    return pl.BlockSpec(x.shape, lambda *_: (0,) * x.ndim)


def network_forward(prep, state, *, action_size):
    """state: (B, 4, 42, 42) f32 -> (action_values (B, A), state_value (1,))."""
    B, C, H, W = state.shape
    assert (C, H, W) == (4, 42, 42), "Network expects (B, 4, 42, 42) input"
    # Static proof that every row actually consumed downstream stays inside its
    # own image's 42-row slab band (conv1 + conv2 + conv3 + fc1 row reach):
    assert 2 * 1 + 2 * 2 + 2 * 4 + 3 * 8 <= H - 1, "row reach crosses images"

    # single cheap layout op: NCHW -> stacked row slab (B*H, W*C)
    slab = jnp.transpose(state, (0, 2, 3, 1)).reshape(B * H, W * C)

    operands = (slab, prep["t1"], prep["t2"], prep["t3"], prep["b1"],
                prep["b2"], prep["b3"], prep["t_fc1"], prep["b_fc1"],
                prep["w_head"], prep["b_head"])

    # advisory cost estimate for XLA's scheduler
    m1 = B * H - 2
    m2 = m1 - 4
    m3 = m2 - 8
    m4 = m3 - 24
    flops = 2 * (3 * m1 * 168 * 640 + 3 * m2 * 640 * 288 + 3 * m3 * 288 * 128
                 + 4 * m4 * 128 * 128 + m4 * 128 * HEAD_PAD)
    bytes_accessed = int(sum(x.size * x.dtype.itemsize for x in operands)
                         + B * HEAD_PAD * 4)

    kernel = functools.partial(_fused_forward_kernel, batch=B,
                               rows_per_image=H)
    out = pl.pallas_call(
        kernel,
        out_shape=jax.ShapeDtypeStruct((B, HEAD_PAD), jnp.float32),
        in_specs=[_vmem_spec(x) for x in operands],
        out_specs=pl.BlockSpec((B, HEAD_PAD), lambda *_: (0, 0)),
        cost_estimate=pl.CostEstimate(flops=int(flops), transcendentals=0,
                                      bytes_accessed=bytes_accessed),
    )(*operands)

    action_values = out[:, :action_size]
    # Matches the torch module verbatim: state_value = self.fc2s(x)[0], i.e.
    # only batch element 0's value head, shape (1,).  Intentional.
    state_value = out[0, action_size:action_size + 1]
    return action_values, state_value


# ----------------------------------------------------------------------------
# Parameter init (PyTorch-default-style uniform(+-1/sqrt(fan_in)))
# ----------------------------------------------------------------------------
def init_params(key, action_size):
    def uni(k, shape, fan_in):
        bound = 1.0 / float(fan_in) ** 0.5
        return jax.random.uniform(k, shape, jnp.float32, -bound, bound)

    ks = jax.random.split(key, 12)
    p = {}
    p["conv1_w"] = uni(ks[0], (32, 4, 3, 3), 4 * 3 * 3)
    p["conv1_b"] = uni(ks[1], (32,), 4 * 3 * 3)
    p["conv2_w"] = uni(ks[2], (32, 32, 3, 3), 32 * 3 * 3)
    p["conv2_b"] = uni(ks[3], (32,), 32 * 3 * 3)
    p["conv3_w"] = uni(ks[4], (32, 32, 3, 3), 32 * 3 * 3)
    p["conv3_b"] = uni(ks[5], (32,), 32 * 3 * 3)
    # fc weights stored as (in, out); the "in" index uses torch (c, h, w) order
    p["fc1_w"] = uni(ks[6], (512, 128), 512)
    p["fc1_b"] = uni(ks[7], (128,), 512)
    p["fc2a_w"] = uni(ks[8], (128, action_size), 128)
    p["fc2a_b"] = uni(ks[9], (action_size,), 128)
    p["fc2s_w"] = uni(ks[10], (128, 1), 128)
    p["fc2s_b"] = uni(ks[11], (1,), 128)
    return p


# ----------------------------------------------------------------------------
# Pure-JAX f32 reference (mirrors the PyTorch module verbatim)
# ----------------------------------------------------------------------------
def reference_forward(params, state):
    def conv(x, w, b):
        y = jax.lax.conv_general_dilated(
            x, w, window_strides=(2, 2), padding="VALID",
            dimension_numbers=("NCHW", "OIHW", "NCHW"))
        return jax.nn.relu(y + b[None, :, None, None])

    x = conv(state, params["conv1_w"], params["conv1_b"])
    x = conv(x, params["conv2_w"], params["conv2_b"])
    x = conv(x, params["conv3_w"], params["conv3_b"])
    x = x.reshape(x.shape[0], -1)                 # torch Flatten: (c, h, w)
    x = jax.nn.relu(x @ params["fc1_w"] + params["fc1_b"])
    action_values = x @ params["fc2a_w"] + params["fc2a_b"]
    state_value = (x @ params["fc2s_w"] + params["fc2s_b"])[0]
    return action_values, state_value


if __name__ == "__main__":
    action_size = 6
    key = jax.random.PRNGKey(0)
    pkey, xkey = jax.random.split(key)
    params = init_params(pkey, action_size)
    prep = prepare_params(params, action_size)    # one-time repack, outside jit

    # 42x42 input is what the module requires: (42-3)//2+1 = 20 -> 9 -> 4,
    # and 32*4*4 = 512 matches nn.Linear(512, 128).
    state = jax.random.normal(xkey, (2, 4, 42, 42), dtype=jnp.float32)

    fwd = jax.jit(functools.partial(network_forward, action_size=action_size))
    action_values, state_value = fwd(prep, state)
    jax.block_until_ready((action_values, state_value))

    assert action_values.shape == (2, action_size), action_values.shape
    assert state_value.shape == (1,), state_value.shape
    assert action_values.dtype == jnp.float32 and state_value.dtype == jnp.float32

    # numerical check against the pure-JAX reference (kernel matmuls are bf16)
    ref_av, ref_sv = reference_forward(params, state)
    err = max(float(jnp.max(jnp.abs(action_values - ref_av))),
              float(jnp.max(jnp.abs(state_value - ref_sv))))
    assert err < 2e-2, f"kernel/reference mismatch, max abs err = {err}"

    print("KERNEL_OK")
</pallas_src>

<mosaic_0001>
module attributes {stable_mosaic.version = 11 : i64} {
  func.func @_fused_forward_kernel(%arg0: memref<84x168xf32, #tpu.memory_space<vmem>>, %arg1: memref<3x168x640xbf16, #tpu.memory_space<vmem>>, %arg2: memref<3x640x288xbf16, #tpu.memory_space<vmem>>, %arg3: memref<3x288x128xbf16, #tpu.memory_space<vmem>>, %arg4: memref<1x640xf32, #tpu.memory_space<vmem>>, %arg5: memref<1x288xf32, #tpu.memory_space<vmem>>, %arg6: memref<1x128xf32, #tpu.memory_space<vmem>>, %arg7: memref<4x128x128xbf16, #tpu.memory_space<vmem>>, %arg8: memref<1x128xf32, #tpu.memory_space<vmem>>, %arg9: memref<128x128xbf16, #tpu.memory_space<vmem>>, %arg10: memref<1x128xf32, #tpu.memory_space<vmem>>, %arg11: memref<2x128xf32, #tpu.memory_space<vmem>>) attributes {dimension_semantics = [], scalar_prefetch = 0 : i64, scratch_operands = 0 : i64, tpu.core_type = #tpu.core_type<tc>} {
    %c0 = arith.constant 0 : index
    %c0_0 = arith.constant 0 : index
    %0 = vector.load %arg0[%c0, %c0_0] : memref<84x168xf32, #tpu.memory_space<vmem>>, vector<84x168xf32>
    %1 = arith.truncf %0 : vector<84x168xf32> to vector<84x168xbf16>
    %2 = vector.extract_strided_slice %1 {offsets = [0, 0], sizes = [82, 168], strides = [1, 1]} : vector<84x168xbf16> to vector<82x168xbf16>
    %c0_1 = arith.constant 0 : index
    %c0_2 = arith.constant 0 : index
    %c0_3 = arith.constant 0 : index
    %3 = vector.load %arg1[%c0_1, %c0_2, %c0_3] : memref<3x168x640xbf16, #tpu.memory_space<vmem>>, vector<1x168x640xbf16>
    %4 = vector.shape_cast %3 : vector<1x168x640xbf16> to vector<168x640xbf16>
    %cst = arith.constant dense<0.000000e+00> : vector<82x640xf32>
    %5 = tpu.matmul %2, %4, %cst {dimension_numbers = #tpu.dot_dimension_numbers<[1], [0], [0], [1], [0, 0, 1, 1], [], []>} : vector<82x168xbf16>, vector<168x640xbf16>, vector<82x640xf32> -> vector<82x640xf32>
    %6 = vector.extract_strided_slice %1 {offsets = [1, 0], sizes = [82, 168], strides = [1, 1]} : vector<84x168xbf16> to vector<82x168xbf16>
    %c1 = arith.constant 1 : index
    %c0_4 = arith.constant 0 : index
    %c0_5 = arith.constant 0 : index
    %7 = vector.load %arg1[%c1, %c0_4, %c0_5] : memref<3x168x640xbf16, #tpu.memory_space<vmem>>, vector<1x168x640xbf16>
    %8 = vector.shape_cast %7 : vector<1x168x640xbf16> to vector<168x640xbf16>
    %cst_6 = arith.constant dense<0.000000e+00> : vector<82x640xf32>
    %9 = tpu.matmul %6, %8, %cst_6 {dimension_numbers = #tpu.dot_dimension_numbers<[1], [0], [0], [1], [0, 0, 1, 1], [], []>} : vector<82x168xbf16>, vector<168x640xbf16>, vector<82x640xf32> -> vector<82x640xf32>
    %10 = arith.addf %5, %9 : vector<82x640xf32>
    %11 = vector.extract_strided_slice %1 {offsets = [2, 0], sizes = [82, 168], strides = [1, 1]} : vector<84x168xbf16> to vector<82x168xbf16>
    %c2 = arith.constant 2 : index
    %c0_7 = arith.constant 0 : index
    %c0_8 = arith.constant 0 : index
    %12 = vector.load %arg1[%c2, %c0_7, %c0_8] : memref<3x168x640xbf16, #tpu.memory_space<vmem>>, vector<1x168x640xbf16>
    %13 = vector.shape_cast %12 : vector<1x168x640xbf16> to vector<168x640xbf16>
    %cst_9 = arith.constant dense<0.000000e+00> : vector<82x640xf32>
    %14 = tpu.matmul %11, %13, %cst_9 {dimension_numbers = #tpu.dot_dimension_numbers<[1], [0], [0], [1], [0, 0, 1, 1], [], []>} : vector<82x168xbf16>, vector<168x640xbf16>, vector<82x640xf32> -> vector<82x640xf32>
    %15 = arith.addf %10, %14 : vector<82x640xf32>
    %c0_10 = arith.constant 0 : index
    %c0_11 = arith.constant 0 : index
    %16 = vector.load %arg4[%c0_10, %c0_11] : memref<1x640xf32, #tpu.memory_space<vmem>>, vector<1x640xf32>
    %17 = vector.broadcast %16 : vector<1x640xf32> to vector<82x640xf32>
    %18 = arith.addf %15, %17 : vector<82x640xf32>
    %cst_12 = arith.constant 0.000000e+00 : f32
    %19 = vector.broadcast %cst_12 : f32 to vector<82x640xf32>
    %20 = arith.maximumf %18, %19 : vector<82x640xf32>
    %21 = arith.truncf %20 : vector<82x640xf32> to vector<82x640xbf16>
    %22 = vector.extract_strided_slice %21 {offsets = [0, 0], sizes = [78, 640], strides = [1, 1]} : vector<82x640xbf16> to vector<78x640xbf16>
    %c0_13 = arith.constant 0 : index
    %c0_14 = arith.constant 0 : index
    %c0_15 = arith.constant 0 : index
    %23 = vector.load %arg2[%c0_13, %c0_14, %c0_15] : memref<3x640x288xbf16, #tpu.memory_space<vmem>>, vector<1x640x288xbf16>
    %24 = vector.shape_cast %23 : vector<1x640x288xbf16> to vector<640x288xbf16>
    %cst_16 = arith.constant dense<0.000000e+00> : vector<78x288xf32>
    %25 = tpu.matmul %22, %24, %cst_16 {dimension_numbers = #tpu.dot_dimension_numbers<[1], [0], [0], [1], [0, 0, 1, 1], [], []>} : vector<78x640xbf16>, vector<640x288xbf16>, vector<78x288xf32> -> vector<78x288xf32>
    %26 = vector.extract_strided_slice %21 {offsets = [2, 0], sizes = [78, 640], strides = [1, 1]} : vector<82x640xbf16> to vector<78x640xbf16>
    %c1_17 = arith.constant 1 : index
    %c0_18 = arith.constant 0 : index
    %c0_19 = arith.constant 0 : index
    %27 = vector.load %arg2[%c1_17, %c0_18, %c0_19] : memref<3x640x288xbf16, #tpu.memory_space<vmem>>, vector<1x640x288xbf16>
    %28 = vector.shape_cast %27 : vector<1x640x288xbf16> to vector<640x288xbf16>
    %cst_20 = arith.constant dense<0.000000e+00> : vector<78x288xf32>
    %29 = tpu.matmul %26, %28, %cst_20 {dimension_numbers = #tpu.dot_dimension_numbers<[1], [0], [0], [1], [0, 0, 1, 1], [], []>} : vector<78x640xbf16>, vector<640x288xbf16>, vector<78x288xf32> -> vector<78x288xf32>
    %30 = arith.addf %25, %29 : vector<78x288xf32>
    %31 = vector.extract_strided_slice %21 {offsets = [4, 0], sizes = [78, 640], strides = [1, 1]} : vector<82x640xbf16> to vector<78x640xbf16>
    %c2_21 = arith.constant 2 : index
    %c0_22 = arith.constant 0 : index
    %c0_23 = arith.constant 0 : index
    %32 = vector.load %arg2[%c2_21, %c0_22, %c0_23] : memref<3x640x288xbf16, #tpu.memory_space<vmem>>, vector<1x640x288xbf16>
    %33 = vector.shape_cast %32 : vector<1x640x288xbf16> to vector<640x288xbf16>
    %cst_24 = arith.constant dense<0.000000e+00> : vector<78x288xf32>
    %34 = tpu.matmul %31, %33, %cst_24 {dimension_numbers = #tpu.dot_dimension_numbers<[1], [0], [0], [1], [0, 0, 1, 1], [], []>} : vector<78x640xbf16>, vector<640x288xbf16>, vector<78x288xf32> -> vector<78x288xf32>
    %35 = arith.addf %30, %34 : vector<78x288xf32>
    %c0_25 = arith.constant 0 : index
    %c0_26 = arith.constant 0 : index
    %36 = vector.load %arg5[%c0_25, %c0_26] : memref<1x288xf32, #tpu.memory_space<vmem>>, vector<1x288xf32>
    %37 = vector.broadcast %36 : vector<1x288xf32> to vector<78x288xf32>
    %38 = arith.addf %35, %37 : vector<78x288xf32>
    %cst_27 = arith.constant 0.000000e+00 : f32
    %39 = vector.broadcast %cst_27 : f32 to vector<78x288xf32>
    %40 = arith.maximumf %38, %39 : vector<78x288xf32>
    %41 = arith.truncf %40 : vector<78x288xf32> to vector<78x288xbf16>
    %42 = vector.extract_strided_slice %41 {offsets = [0, 0], sizes = [70, 288], strides = [1, 1]} : vector<78x288xbf16> to vector<70x288xbf16>
    %c0_28 = arith.constant 0 : index
    %c0_29 = arith.constant 0 : index
    %c0_30 = arith.constant 0 : index
    %43 = vector.load %arg3[%c0_28, %c0_29, %c0_30] : memref<3x288x128xbf16, #tpu.memory_space<vmem>>, vector<1x288x128xbf16>
    %44 = vector.shape_cast %43 : vector<1x288x128xbf16> to vector<288x128xbf16>
    %cst_31 = arith.constant dense<0.000000e+00> : vector<70x128xf32>
    %45 = tpu.matmul %42, %44, %cst_31 {dimension_numbers = #tpu.dot_dimension_numbers<[1], [0], [0], [1], [0, 0, 1, 1], [], []>} : vector<70x288xbf16>, vector<288x128xbf16>, vector<70x128xf32> -> vector<70x128xf32>
    %46 = vector.extract_strided_slice %41 {offsets = [4, 0], sizes = [70, 288], strides = [1, 1]} : vector<78x288xbf16> to vector<70x288xbf16>
    %c1_32 = arith.constant 1 : index
    %c0_33 = arith.constant 0 : index
    %c0_34 = arith.constant 0 : index
    %47 = vector.load %arg3[%c1_32, %c0_33, %c0_34] : memref<3x288x128xbf16, #tpu.memory_space<vmem>>, vector<1x288x128xbf16>
    %48 = vector.shape_cast %47 : vector<1x288x128xbf16> to vector<288x128xbf16>
    %cst_35 = arith.constant dense<0.000000e+00> : vector<70x128xf32>
    %49 = tpu.matmul %46, %48, %cst_35 {dimension_numbers = #tpu.dot_dimension_numbers<[1], [0], [0], [1], [0, 0, 1, 1], [], []>} : vector<70x288xbf16>, vector<288x128xbf16>, vector<70x128xf32> -> vector<70x128xf32>
    %50 = arith.addf %45, %49 : vector<70x128xf32>
    %51 = vector.extract_strided_slice %41 {offsets = [8, 0], sizes = [70, 288], strides = [1, 1]} : vector<78x288xbf16> to vector<70x288xbf16>
    %c2_36 = arith.constant 2 : index
    %c0_37 = arith.constant 0 : index
    %c0_38 = arith.constant 0 : index
    %52 = vector.load %arg3[%c2_36, %c0_37, %c0_38] : memref<3x288x128xbf16, #tpu.memory_space<vmem>>, vector<1x288x128xbf16>
    %53 = vector.shape_cast %52 : vector<1x288x128xbf16> to vector<288x128xbf16>
    %cst_39 = arith.constant dense<0.000000e+00> : vector<70x128xf32>
    %54 = tpu.matmul %51, %53, %cst_39 {dimension_numbers = #tpu.dot_dimension_numbers<[1], [0], [0], [1], [0, 0, 1, 1], [], []>} : vector<70x288xbf16>, vector<288x128xbf16>, vector<70x128xf32> -> vector<70x128xf32>
    %55 = arith.addf %50, %54 : vector<70x128xf32>
    %c0_40 = arith.constant 0 : index
    %c0_41 = arith.constant 0 : index
    %56 = vector.load %arg6[%c0_40, %c0_41] : memref<1x128xf32, #tpu.memory_space<vmem>>, vector<1x128xf32>
    %57 = vector.broadcast %56 : vector<1x128xf32> to vector<70x128xf32>
    %58 = arith.addf %55, %57 : vector<70x128xf32>
    %cst_42 = arith.constant 0.000000e+00 : f32
    %59 = vector.broadcast %cst_42 : f32 to vector<70x128xf32>
    %60 = arith.maximumf %58, %59 : vector<70x128xf32>
    %61 = arith.truncf %60 : vector<70x128xf32> to vector<70x128xbf16>
    %62 = vector.extract_strided_slice %61 {offsets = [0, 0], sizes = [46, 128], strides = [1, 1]} : vector<70x128xbf16> to vector<46x128xbf16>
    %c0_43 = arith.constant 0 : index
    %c0_44 = arith.constant 0 : index
    %c0_45 = arith.constant 0 : index
    %63 = vector.load %arg7[%c0_43, %c0_44, %c0_45] : memref<4x128x128xbf16, #tpu.memory_space<vmem>>, vector<1x128x128xbf16>
    %64 = vector.shape_cast %63 : vector<1x128x128xbf16> to vector<128x128xbf16>
    %cst_46 = arith.constant dense<0.000000e+00> : vector<46x128xf32>
    %65 = tpu.matmul %62, %64, %cst_46 {dimension_numbers = #tpu.dot_dimension_numbers<[1], [0], [0], [1], [0, 0, 1, 1], [], []>} : vector<46x128xbf16>, vector<128x128xbf16>, vector<46x128xf32> -> vector<46x128xf32>
    %66 = vector.extract_strided_slice %61 {offsets = [8, 0], sizes = [46, 128], strides = [1, 1]} : vector<70x128xbf16> to vector<46x128xbf16>
    %c1_47 = arith.constant 1 : index
    %c0_48 = arith.constant 0 : index
    %c0_49 = arith.constant 0 : index
    %67 = vector.load %arg7[%c1_47, %c0_48, %c0_49] : memref<4x128x128xbf16, #tpu.memory_space<vmem>>, vector<1x128x128xbf16>
    %68 = vector.shape_cast %67 : vector<1x128x128xbf16> to vector<128x128xbf16>
    %cst_50 = arith.constant dense<0.000000e+00> : vector<46x128xf32>
    %69 = tpu.matmul %66, %68, %cst_50 {dimension_numbers = #tpu.dot_dimension_numbers<[1], [0], [0], [1], [0, 0, 1, 1], [], []>} : vector<46x128xbf16>, vector<128x128xbf16>, vector<46x128xf32> -> vector<46x128xf32>
    %70 = arith.addf %65, %69 : vector<46x128xf32>
    %71 = vector.extract_strided_slice %61 {offsets = [16, 0], sizes = [46, 128], strides = [1, 1]} : vector<70x128xbf16> to vector<46x128xbf16>
    %c2_51 = arith.constant 2 : index
    %c0_52 = arith.constant 0 : index
    %c0_53 = arith.constant 0 : index
    %72 = vector.load %arg7[%c2_51, %c0_52, %c0_53] : memref<4x128x128xbf16, #tpu.memory_space<vmem>>, vector<1x128x128xbf16>
    %73 = vector.shape_cast %72 : vector<1x128x128xbf16> to vector<128x128xbf16>
    %cst_54 = arith.constant dense<0.000000e+00> : vector<46x128xf32>
    %74 = tpu.matmul %71, %73, %cst_54 {dimension_numbers = #tpu.dot_dimension_numbers<[1], [0], [0], [1], [0, 0, 1, 1], [], []>} : vector<46x128xbf16>, vector<128x128xbf16>, vector<46x128xf32> -> vector<46x128xf32>
    %75 = arith.addf %70, %74 : vector<46x128xf32>
    %76 = vector.extract_strided_slice %61 {offsets = [24, 0], sizes = [46, 128], strides = [1, 1]} : vector<70x128xbf16> to vector<46x128xbf16>
    %c3 = arith.constant 3 : index
    %c0_55 = arith.constant 0 : index
    %c0_56 = arith.constant 0 : index
    %77 = vector.load %arg7[%c3, %c0_55, %c0_56] : memref<4x128x128xbf16, #tpu.memory_space<vmem>>, vector<1x128x128xbf16>
    %78 = vector.shape_cast %77 : vector<1x128x128xbf16> to vector<128x128xbf16>
    %cst_57 = arith.constant dense<0.000000e+00> : vector<46x128xf32>
    %79 = tpu.matmul %76, %78, %cst_57 {dimension_numbers = #tpu.dot_dimension_numbers<[1], [0], [0], [1], [0, 0, 1, 1], [], []>} : vector<46x128xbf16>, vector<128x128xbf16>, vector<46x128xf32> -> vector<46x128xf32>
    %80 = arith.addf %75, %79 : vector<46x128xf32>
    %c0_58 = arith.constant 0 : index
    %c0_59 = arith.constant 0 : index
    %81 = vector.load %arg8[%c0_58, %c0_59] : memref<1x128xf32, #tpu.memory_space<vmem>>, vector<1x128xf32>
    %82 = vector.broadcast %81 : vector<1x128xf32> to vector<46x128xf32>
    %83 = arith.addf %80, %82 : vector<46x128xf32>
    %cst_60 = arith.constant 0.000000e+00 : f32
    %84 = vector.broadcast %cst_60 : f32 to vector<46x128xf32>
    %85 = arith.maximumf %83, %84 : vector<46x128xf32>
    %86 = arith.truncf %85 : vector<46x128xf32> to vector<46x128xbf16>
    %c0_61 = arith.constant 0 : index
    %c0_62 = arith.constant 0 : index
    %87 = vector.load %arg9[%c0_61, %c0_62] : memref<128x128xbf16, #tpu.memory_space<vmem>>, vector<128x128xbf16>
    %cst_63 = arith.constant dense<0.000000e+00> : vector<46x128xf32>
    %88 = tpu.matmul %86, %87, %cst_63 {dimension_numbers = #tpu.dot_dimension_numbers<[1], [0], [0], [1], [0, 0, 1, 1], [], []>} : vector<46x128xbf16>, vector<128x128xbf16>, vector<46x128xf32> -> vector<46x128xf32>
    %c0_64 = arith.constant 0 : index
    %c0_65 = arith.constant 0 : index
    %89 = vector.load %arg10[%c0_64, %c0_65] : memref<1x128xf32, #tpu.memory_space<vmem>>, vector<1x128xf32>
    %90 = vector.broadcast %89 : vector<1x128xf32> to vector<46x128xf32>
    %91 = arith.addf %88, %90 : vector<46x128xf32>
    %92 = vector.extract_strided_slice %91 {offsets = [0, 0], sizes = [1, 128], strides = [1, 1]} : vector<46x128xf32> to vector<1x128xf32>
    %93 = vector.extract_strided_slice %91 {offsets = [42, 0], sizes = [1, 128], strides = [1, 1]} : vector<46x128xf32> to vector<1x128xf32>
    %94 = tpu.concatenate %92, %93 in 0 : vector<1x128xf32>, vector<1x128xf32> -> vector<2x128xf32>
    %c0_66 = arith.constant 0 : index
    %c0_67 = arith.constant 0 : index
    %95 = vector.load %arg11[%c0_66, %c0_67] : memref<2x128xf32, #tpu.memory_space<vmem>>, vector<2x128xf32>
    tpu.vector_store %arg11[%c0_66, %c0_67], %94 {strides = array<i32>} : memref<2x128xf32, #tpu.memory_space<vmem>>, vector<2x128xf32>,
    return
  }
}

</mosaic_0001>

<bundles_post_ra>
// kernel: network_forward.1
= control target key start
LH: loop header
LB: loop body
LE: loop exit
PB: predicated region body
PF: predicated region fallthrough
CT: control target
= control target key end

     0   :  { %vm200_vm0 = vsmask.f32 7424  ;;  %vm593_vm1 = vcmask 1043456   ;;  %vm574_vm2 = vcmask 326656   ;;  %vm1509_vm3 = vcmask 1046528   ;;  %s15486_s1 = inlined_call_operand.vmem [shape: bf16[3,168,640], index: 1, kind: input, shape index: {}]   ;;  %s15487_s0 = inlined_call_operand.vmem [shape: f32[84,168], index: 0, kind: input, shape index: {}]   ;;  %s15488_s2 = inlined_call_operand.vmem [shape: bf16[3,640,288], index: 2, kind: input, shape index: {}]   ;;  %s15489_s4 = inlined_call_operand.vmem [shape: f32[1,640], index: 4, kind: input, shape index: {}]   ;;  %s15490_s3 = inlined_call_operand.vmem [shape: bf16[3,288,128], index: 3, kind: input, shape index: {}]   ;;  %s15491_s5 = inlined_call_operand.vmem [shape: f32[1,288], index: 5, kind: input, shape index: {}]   ;;  %s15492_s7 = inlined_call_operand.vmem [shape: bf16[4,128,128], index: 7, kind: input, shape index: {}]   ;;  %s15493_s6 = inlined_call_operand.vmem [shape: f32[1,128], index: 6, kind: input, shape index: {}]   ;;  %s15494_s9 = inlined_call_operand.vmem [shape: bf16[128,128], index: 9, kind: input, shape index: {}]   ;;  %s15495_s8 = inlined_call_operand.vmem [shape: f32[1,128], index: 8, kind: input, shape index: {}]   ;;  %s15496_s10 = inlined_call_operand.vmem [shape: f32[1,128], index: 10, kind: input, shape index: {}]   ;;  %s15497_s11 = inlined_call_operand.vmem [shape: f32[2,128], index: 11, kind: output, shape index: {}]  }
   0x1   :  { %v10266_v0 = vld [vmem:[%s15486_s1 + $0x2c0] ss:$20 sps:$4 sm:$0xff]   ;;  %v10268_v1 = vld [vmem:[%s15486_s1 + $0x2c8] ss:$20 sps:$4 sm:$0xff]   ;;  %v10271_v3 = vld [vmem:[%s15486_s1 + $0x2c4] ss:$20 sps:$4 sm:$0xff]  }
   0x2   :  { %609 = vmatprep.subr.bf16.mxu0 %v10266_v0  ;;  %v10270_v2 = vld [vmem:[%s15486_s1 + $0x2bc] ss:$20 sps:$4 sm:$0xff]   ;;  %700 = vmatprep.subr.bf16.mxu1 %v10268_v1  ;;  %v10272_v4 = vld [vmem:[%s15486_s1 + $0x298] ss:$20 sps:$4 sm:$0xff]   ;;  %v10274_v5 = vld [vmem:[%s15486_s1 + $0x2a0] ss:$20 sps:$4 sm:$0xff]  }
   0x3   :  { %610 = vmatpush1.bf16.msra.mxu0 %v10270_v2  ;;  %701 = vmatpush1.bf16.msra.mxu1 %v10271_v3  ;;  %v10276_v6 = vld [vmem:[%s15486_s1 + $0x294] ss:$20 sps:$4 sm:$0xff]   ;;  %v10277_v7 = vld [vmem:[%s15486_s1 + $0x29c] ss:$20 sps:$4 sm:$0xff]   ;;  %v10280_v9 = vld [vmem:[%s15486_s1 + $0x278] ss:$20 sps:$4 sm:$0xff]  }
   0x4   :  { %611 = vmatprep.subr.bf16.mxu0 %v10272_v4  ;;  %702 = vmatprep.subr.bf16.mxu1 %v10274_v5  ;;  %v10278_v8 = vld [vmem:[%s15486_s1 + $0x270] ss:$20 sps:$4 sm:$0xff]   ;;  %v10282_v10 = vld [vmem:[%s15486_s1 + $0x26c] ss:$20 sps:$4 sm:$0xff]   ;;  %v10283_v11 = vld [vmem:[%s15486_s1 + $0x274] ss:$20 sps:$4 sm:$0xff]  }
   0x5   :  { %v10284_v12 = vld [vmem:[%s15486_s1 + $0x248] ss:$20 sps:$4 sm:$0xff]   ;;  %v10286_v13 = vld [vmem:[%s15486_s1 + $0x250] ss:$20 sps:$4 sm:$0xff]   ;;  %v10289_v15 = vld [vmem:[%s15486_s1 + $0x24c] ss:$20 sps:$4 sm:$0xff]  }
   0x6   :  { %v10288_v14 = vld [vmem:[%s15486_s1 + $0x244] ss:$20 sps:$4 sm:$0xff]   ;;  %v10290_v16 = vld [vmem:[%s15486_s1 + $0x220] ss:$20 sps:$4 sm:$0xff]   ;;  %v10292_v17 = vld [vmem:[%s15486_s1 + $0x228] ss:$20 sps:$4 sm:$0xff]  }
   0x7   :  { %612 = vmatpush1.bf16.msra.mxu0 %v10276_v6  ;;  %703 = vmatpush1.bf16.msra.mxu1 %v10277_v7  ;;  %v10294_v18 = vld [vmem:[%s15486_s1 + $0x21c] ss:$20 sps:$4 sm:$0xff]   ;;  %v10295_v19 = vld [vmem:[%s15486_s1 + $0x224] ss:$20 sps:$4 sm:$0xff]   ;;  %v10298_v21 = vld [vmem:[%s15486_s1 + $0x200] ss:$20 sps:$4 sm:$0xff]  }
   0x8   :  { %613 = vmatprep.subr.bf16.mxu0 %v10278_v8  ;;  %704 = vmatprep.subr.bf16.mxu1 %v10280_v9  ;;  %v10296_v20 = vld [vmem:[%s15486_s1 + $0x1f8] ss:$20 sps:$4 sm:$0xff]   ;;  %v10300_v22 = vld [vmem:[%s15486_s1 + $0x1f4] ss:$20 sps:$4 sm:$0xff]   ;;  %v10301_v23 = vld [vmem:[%s15486_s1 + $0x1fc] ss:$20 sps:$4 sm:$0xff]  }
   0x9   :  { %v10302_v24 = vld [vmem:[%s15486_s1 + $0x1d0] ss:$20 sps:$4 sm:$0xff]   ;;  %v10304_v25 = vld [vmem:[%s15486_s1 + $0x1d8] ss:$20 sps:$4 sm:$0xff]   ;;  %v10307_v27 = vld [vmem:[%s15486_s1 + $0x1d4] ss:$20 sps:$4 sm:$0xff]  }
   0xa   :  { %v10306_v26 = vld [vmem:[%s15486_s1 + $0x1cc] ss:$20 sps:$4 sm:$0xff]   ;;  %v10308_v28 = vld [vmem:[%s15486_s1 + $0x1a8] ss:$20 sps:$4 sm:$0xff]   ;;  %v10310_v29 = vld [vmem:[%s15486_s1 + $0x1b0] ss:$20 sps:$4 sm:$0xff]  }
   0xb   :  { %614 = vmatpush1.bf16.msra.mxu0 %v10282_v10  ;;  %705 = vmatpush1.bf16.msra.mxu1 %v10283_v11  ;;  %v8211_v30 = vld [vmem:[%s15486_s1 + $0x334] sm:$0xff]  ;;  %v8212_v31 = vld [vmem:[%s15486_s1 + $0x33c] sm:$0xff]  ;;  %v40_v34 = vld [vmem:[%s15487_s0 + $0x8] sm:$0xff]  ;;  %vm11067_vm4 = vmmov 0   ;;  %vm5126_vm5 = vcmask 1045504   ;;  %vm6670_vm6 = vcmask 261120  }
   0xc   :  { %615 = vmatprep.subr.bf16.mxu0 %v10284_v12  ;;  %706 = vmatprep.subr.bf16.mxu1 %v10286_v13  ;;  %v10312_v32 = vld [vmem:[%s15486_s1 + $0x1a4] ss:$20 sps:$4 sm:$0xff]   ;;  %v10313_v33 = vld [vmem:[%s15486_s1 + $0x1ac] ss:$20 sps:$4 sm:$0xff]   ;;  %v8265_v35 = vcombine.high %v8211_v30, %v8211_v30  ;;  %v8267_v36 = vcombine.high %v8212_v31, %v8212_v31  ;;  %v8264_v37 = vcombine.low %v8211_v30, %v8211_v30  ;;  %v41_v45 = vld [vmem:[%s15487_s0 + $0x10] sm:$0xff]  ;;  %vm8144_vm7 = vcmask 1040384  }
   0xd   :  { %v42_v38 = vld [vmem:[%s15487_s0 + $0x18] sm:$0xff]  ;;  %v44_v39 = vld [vmem:[%s15487_s0 + $0x28] sm:$0xff]  ;;  %v8266_v41 = vcombine.low %v8212_v31, %v8212_v31  ;;  %v39_v44 = vld [vmem:[%s15487_s0] sm:$0xff] }
   0xe   :  { %v46_v40 = vld [vmem:[%s15487_s0 + $0x38] sm:$0xff]  ;;  %v11242_v42 = vpack.c.bf16 %v42_v38, %v40_v34  ;;  %v43_v46 = vld [vmem:[%s15487_s0 + $0x20] sm:$0xff]  ;;  %v45_v47 = vld [vmem:[%s15487_s0 + $0x30] sm:$0xff]  ;;  %v11258_v48 = vpack.c.bf16 %v41_v45, %v39_v44  ;;  %v595_v57 = vsel %vm593_vm1, %v8264_v37, 0 }
   0xf   :  { %616 = vmatpush1.bf16.msra.mxu0 %v10288_v14  ;;  %707 = vmatpush1.bf16.msra.mxu1 %v10289_v15  ;;  %v11244_v43 = vpack.c.bf16 %v46_v40, %v44_v39  ;;  %v10318_v49 = vld [vmem:[%s15486_s1 + $0x310] ss:$20 sps:$4 sm:$0xff]   ;;  %v10320_v53 = vld [vmem:[%s15486_s1 + $0x318] ss:$20 sps:$4 sm:$0xff]   ;;  %v11269_v54 = vpack.c.bf16 %v45_v47, %v43_v46  ;;  %v601_v58 = vsel %vm593_vm1, %v8266_v41, 0 }
  0x10   :  { %617 = vmatprep.subr.bf16.mxu0 %v10290_v16  ;;  %708 = vmatprep.subr.bf16.mxu1 %v10292_v17  ;;  %v214_v50 = vshrl.u32 %v11242_v42, 16  ;;  %v216_v51 = vshll.u32 %v11242_v42, 16  ;;  %v204_v55 = vshll.u32 %v11258_v48, 16  ;;  %v48_v56 = vld [vmem:[%s15487_s0 + $0x48] sm:$0xff]  ;;  %v50_v61 = vld [vmem:[%s15487_s0 + $0x58] sm:$0xff]  ;;  %v202_v4 = vshrl.u32 %v11258_v48, 16 }
  0x11   :  { %v221_v52 = vshll.u32 %v11244_v43, 16  ;;  %v10322_v62 = vld [vmem:[%s15486_s1 + $0x30c] ss:$20 sps:$4 sm:$0xff]   ;;  %v11285_v63 = vpack.c.bf16 %v50_v61, %v48_v56  ;;  %v10323_v0 = vld [vmem:[%s15486_s1 + $0x314] ss:$20 sps:$4 sm:$0xff]   ;;  %v209_v6 = vshll.u32 %v11269_v54, 16 }
  0x12   :  { %v218_v59 = vrot.slane %v216_v51, 1  ;;  %v10324_v1 = vld [vmem:[%s15486_s1 + $0x2e8] ss:$20 sps:$4 sm:$0xff]   ;;  %v10326_v2 = vld [vmem:[%s15486_s1 + $0x2f0] ss:$20 sps:$4 sm:$0xff]   ;;  %v206_v5 = vrot.slane %v204_v55, 1 }
  0x13   :  { %618 = vmatpush1.bf16.msra.mxu0 %v10294_v18  ;;  %709 = vmatpush1.bf16.msra.mxu1 %v10295_v19  ;;  %v223_v60 = vrot.slane %v221_v52, 1  ;;  %v47_v7 = vld [vmem:[%s15487_s0 + $0x40] sm:$0xff]  ;;  %v49_v9 = vld [vmem:[%s15487_s0 + $0x50] sm:$0xff]  ;;  %v233_v10 = vshrl.u32 %v11244_v43, 16  ;;  %v237_v11 = vshll.u32 %v11285_v63, 16  ;;  %v52_v14 = vld [vmem:[%s15487_s0 + $0x68] sm:$0xff] }
  0x14   :  { %619 = vmatprep.subr.bf16.mxu0 %v10296_v20  ;;  %710 = vmatprep.subr.bf16.mxu1 %v10298_v21  ;;  %v219_v3 = vor.u32 %v218_v59, %v214_v50  ;;  %v10328_v12 = vld [vmem:[%s15486_s1 + $0x2e4] ss:$20 sps:$4 sm:$0xff]   ;;  %v10329_v13 = vld [vmem:[%s15486_s1 + $0x2ec] ss:$20 sps:$4 sm:$0xff]   ;;  %v207_v15 = vor.u32 %v206_v5, %v202_v4  ;;  %v211_v16 = vrot.slane %v209_v6, 1  ;;  %v11322_v17 = vpack.c.bf16 %v49_v9, %v47_v7  ;;  %v53_v30 = vld [vmem:[%s15487_s0 + $0x70] sm:$0xff] }
  0x15   :  { %v54_v18 = vld [vmem:[%s15487_s0 + $0x78] sm:$0xff]  ;;  %v10330_v20 = vld [vmem:[%s15486_s1 + $0x2cc] ss:$20 sps:$4 sm:$0xff]   ;;  %v235_v21 = vor.u32 %v233_v10, %v223_v60  ;;  %v249_v34 = vshrl.u32 %v11285_v63, 16  ;;  %v10335_v40 = vld [vmem:[%s15486_s1 + $0xf0] ss:$20 sps:$4 sm:$0xff]  }
  0x16   :  { %v11302_v8 = vsel %vm200_vm0, %v219_v3, %v223_v60  ;;  %v10333_v19 = vld [vmem:[%s15486_s1 + $0x11c] ss:$20 sps:$4 sm:$0xff]   ;;  %v10334_v31 = vld [vmem:[%s15486_s1 + $0x2a4] ss:$20 sps:$4 sm:$0xff]   ;;  %v10341_v44 = vld [vmem:[%s15486_s1 + $0xcc] ss:$20 sps:$4 sm:$0xff]  }
  0x17   :  { %620 = vmatpush1.bf16.msra.mxu0 %v10300_v22  ;;  %711 = vmatpush1.bf16.msra.mxu1 %v10301_v23  ;;  %v239_v22 = vrot.slane %v237_v11, 1  ;;  %v11333_v23 = vpack.c.bf16 %v54_v18, %v52_v14  ;;  %v58_v37 = vld [vmem:[%s15487_s0 + $0x98] sm:$0xff]  ;;  %v241_v52 = vshrl.u32 %v11322_v17, 16  ;;  %v55_v55 = vld [vmem:[%s15487_s0 + $0x80] sm:$0xff]  ;;  %v57_v56 = vld [vmem:[%s15487_s0 + $0x90] sm:$0xff] }
  0x18   :  { %621 = vmatprep.subr.bf16.mxu0 %v10302_v24  ;;  %712 = vmatprep.subr.bf16.mxu1 %v10304_v25  ;;  %v10331_v24 = vld [vmem:[%s15486_s1 + $0x118] ss:$20 sps:$4 sm:$0xff]   ;;  %v11339_v25 = vsel %vm200_vm0, %v207_v15, %v211_v16  ;;  %v10339_v51 = vld [vmem:[%s15486_s1 + $0xc8] ss:$20 sps:$4 sm:$0xff]   ;;  %v11421_v3 = vpack.c.bf16 %v57_v56, %v55_v55  ;;  %v59_v14 = vld [vmem:[%s15487_s0 + $0xa0] sm:$0xf] }
  0x19   :  { %8270 = vmatprep.mubr.msk.bf16.mxu0 %vm574_vm2, %v11302_v8  ;;  %8277 = vmatprep.mubr.msk.bf16.mxu1 %vm574_vm2, %v11302_v8  ;;  %v251_v45 = vor.u32 %v249_v34, %v239_v22  ;;  %v265_v59 = vshrl.u32 %v11333_v23, 16  ;;  %v10342_v61 = vld [vmem:[%s15486_s1 + $0x254] ss:$20 sps:$4 sm:$0xff]   ;;  %v10349_v4 = vld [vmem:[%s15486_s1 + $0x7c] ss:$20 sps:$4 sm:$0xff]  }
  0x1a   :  { %v10346_v9 = vld [vmem:[%s15486_s1 + $0x22c] ss:$20 sps:$4 sm:$0xff]   ;;  %v10353_v18 = vld [vmem:[%s15486_s1 + $0x54] ss:$20 sps:$4 sm:$0xff]  }
  0x1b   :  { %622 = vmatpush1.bf16.msra.mxu0 %v10306_v26  ;;  %713 = vmatpush1.bf16.msra.mxu1 %v10307_v27  ;;  %v225_v26 = vshrl.u32 %v11269_v54, 16  ;;  %v229_v27 = vshll.u32 %v11322_v17, 16  ;;  %v10347_v11 = vld [vmem:[%s15486_s1 + $0x78] ss:$20 sps:$4 sm:$0xff]  }
  0x1c   :  { %623 = vmatprep.subr.bf16.mxu0 %v10308_v28  ;;  %714 = vmatprep.subr.bf16.mxu1 %v10310_v29  ;;  %v15498_v28 = vmov 0   ;;  %v51_v29 = vld [vmem:[%s15487_s0 + $0x60] sm:$0xff] }
  0x1d   :  { %v227_v38 = vor.u32 %v225_v26, %v211_v16  ;;  %v231_v39 = vrot.slane %v229_v27, 1  ;;  %v11372_v41 = vpack.c.bf16 %v53_v30, %v51_v29  ;;  %v10350_v16 = vld [vmem:[%s15486_s1 + $0x204] ss:$20 sps:$4 sm:$0xff]   ;;  %v11464_v26 = vpack.c.bf16 %v59_v14, %v59_v14  ;;  %v10357_v27 = vld [vmem:[%s15486_s1 + $0x2c] ss:$20 sps:$4 sm:$0xff]  }
  0x1e   :  { %v10354_v29 = vld [vmem:[%s15486_s1 + $0x1dc] ss:$20 sps:$4 sm:$0xff]  }
  0x1f   :  { %624 = vmatpush1.bf16.msra.mxu0 %v10312_v32  ;;  %715 = vmatpush1.bf16.msra.mxu1 %v10313_v33  ;;  %v11354_v32 = vsel %vm200_vm0, %v235_v21, %v239_v22  ;;  %v10337_v33 = vld [vmem:[%s15486_s1 + $0xf4] ss:$20 sps:$4 sm:$0xff]   ;;  %v11388_v50 = vsel %vm200_vm0, %v227_v38, %v231_v39  ;;  %v10351_v21 = vld [vmem:[%s15486_s1 + $0x50] ss:$20 sps:$4 sm:$0xff]  }
  0x20   :  { %8269 = vmatprep.subr.msk.bf16.mxu0 %vm593_vm1, %v8265_v35  ;;  %8276 = vmatprep.subr.msk.bf16.mxu1 %vm593_vm1, %v8267_v36  ;;  %v253_v35 = vshll.u32 %v11333_v23, 16  ;;  %v56_v36 = vld [vmem:[%s15487_s0 + $0x88] sm:$0xff]  ;;  %v10380_v14 = vld [vmem:[%s15486_s1 + $0xd0] ss:$20 sps:$4 sm:$0xff]  }
  0x21   :  { %v11382_v47 = vpack.c.bf16 %v58_v37, %v56_v36  ;;  %v277_v36 = vshll.u32 %v11464_v26, 16  ;;  %v10361_v37 = vld [vmem:[%s15486_s1 + $0x4] ss:$20 sps:$4 sm:$0xff]  }
  0x22   :  { %v255_v46 = vrot.slane %v253_v35, 1  ;;  %v273_v35 = vshrl.u32 %v11421_v3, 16 }
  0x23   :  { %636 = vmatpush2.bf16.msra.mxu0 %v595_v57  ;;  %727 = vmatpush2.bf16.msra.mxu1 %v601_v58  ;;  %v10345_v58 = vld [vmem:[%s15486_s1 + $0xa4] ss:$20 sps:$4 sm:$0xff]   ;;  %v269_v60 = vshll.u32 %v11382_v47, 16 }
  0x24   :  { %637 = vmatprep.subr.bf16.mxu0 %v10318_v49  ;;  %728 = vmatprep.subr.bf16.mxu1 %v10320_v53  ;;  %v10338_v49 = vld [vmem:[%s15486_s1 + $0x27c] ss:$20 sps:$4 sm:$0xff]   ;;  %v245_v53 = vshll.u32 %v11372_v41, 16  ;;  %v11403_v57 = vsel %vm200_vm0, %v251_v45, %v255_v46  ;;  %v267_v5 = vor.u32 %v265_v59, %v255_v46  ;;  %v279_v46 = vrot.slane %v277_v36, 1  ;;  %v10407_v36 = vld [vmem:[%s15486_s1 + $0x1a0] ss:$0 sps:$4 sm:$0xff]  }
  0x25   :  { %v271_v6 = vrot.slane %v269_v60, 1  ;;  %v10367_v60 = vld [vmem:[%s15486_s1 + $0x16c] ss:$20 sps:$4 sm:$0xff]  }
  0x27   :  { %638 = vmatpush2.bf16.msra.mxu0 %v10322_v62  ;;  %729 = vmatpush2.bf16.msra.mxu1 %v10323_v0  ;;  %v60_v62 = vld [vmem:[%s15487_s0 + $0xa8] sm:$0xf]  ;;  %v243_v0 = vor.u32 %v241_v52, %v231_v39  ;;  %v11449_v15 = vsel %vm200_vm0, %v267_v5, %v271_v6 }
  0x28   :  { %639 = vmatprep.subr.bf16.mxu0 %v10324_v1  ;;  %730 = vmatprep.subr.bf16.mxu1 %v10326_v2  ;;  %v247_v1 = vrot.slane %v245_v53, 1  ;;  %v10343_v2 = vld [vmem:[%s15486_s1 + $0xa0] ss:$20 sps:$4 sm:$0xff]   ;;  %v11431_v7 = vpack.c.bf16 %v60_v62, %v60_v62  ;;  %v10365_v62 = vld [vmem:[%s15486_s1 + $0x168] ss:$20 sps:$4 sm:$0xff]  }
  0x29   :  { %v10358_v39 = vld [vmem:[%s15486_s1 + $0x1b4] ss:$20 sps:$4 sm:$0xff]  }
  0x2a   :  { %v11437_v10 = vsel %vm200_vm0, %v243_v0, %v247_v1  ;;  %v292_v53 = vshrl.u32 %v11431_v7, 16  ;;  %v10368_v0 = vld [vmem:[%s15486_s1 + $0x31c] ss:$20 sps:$4 sm:$0xff]   ;;  %v10372_v5 = vld [vmem:[%s15486_s1 + $0x2f4] ss:$20 sps:$4 sm:$0xff]  }
  0x2b   :  { %640 = vmatpush2.bf16.msra.mxu0 %v10328_v12  ;;  %731 = vmatpush2.bf16.msra.mxu1 %v10329_v13  ;;  %v257_v12 = vshrl.u32 %v11372_v41, 16  ;;  %v261_v13 = vshll.u32 %v11421_v3, 16 }
  0x2c   :  { %791 = vmatprep.subr.bf16.mxu0 %v15498_v28  ;;  %1171 = vmatprep.subr.bf16.mxu1 %v10333_v19  ;;  %v281_v19 = vshrl.u32 %v11382_v47, 16 }
  0x2d   :  { %v259_v22 = vor.u32 %v257_v12, %v247_v1  ;;  %v10371_v1 = vld [vmem:[%s15486_s1 + $0x144] ss:$20 sps:$4 sm:$0xff]   ;;  %v10378_v12 = vld [vmem:[%s15486_s1 + $0xfc] ss:$20 sps:$4 sm:$0xff]  }
  0x2e   :  { %642 = vmatmul.mubr.bf16.vlgmr.msra.gmra.mxu0 %v11339_v25  ;;  %733 = vmatmul.mubr.bf16.vlgmr.msra.gmra.mxu1 %v11339_v25  ;;  %v283_v30 = vor.u32 %v281_v19, %v271_v6  ;;  %v10375_v6 = vld [vmem:[%s15486_s1 + $0x124] ss:$20 sps:$4 sm:$0xff]  }
  0x2f   :  { %792 = vmatpush1.bf16.msra.mxu0 %v10330_v20  ;;  %1172 = vmatpush1.bf16.msra.mxu1 %v10331_v24  ;;  %v285_v20 = vshll.u32 %v11431_v7, 16  ;;  %v263_v24 = vrot.slane %v261_v13, 1  ;;  %v10383_v13 = vld [vmem:[%s15486_s1 + $0x100] ss:$20 sps:$4 sm:$0xff]   ;;  %v10388_v19 = vld [vmem:[%s15486_s1 + $0xb0] ss:$20 sps:$4 sm:$0xff]  }
  0x30   :  { %793 = vmatprep.subr.bf16.mxu0 %v15498_v28  ;;  %8271 = vmatprep.mubr.msk.bf16.mxu0 %vm574_vm2, %v11354_v32 }
  0x31   :  { %8278 = vmatprep.mubr.msk.bf16.mxu1 %vm574_vm2, %v11354_v32  ;;  %1173 = vmatprep.subr.bf16.mxu1 %v10337_v33  ;;  %v10355_v33 = vld [vmem:[%s15486_s1 + $0x28] ss:$20 sps:$4 sm:$0xff]   ;;  %v11481_v34 = vsel %vm200_vm0, %v259_v22, %v263_v24  ;;  %v275_v45 = vor.u32 %v273_v35, %v263_v24  ;;  %v10393_v22 = vld [vmem:[%s15486_s1 + $0x58] ss:$20 sps:$4 sm:$0xff]   ;;  %v10396_v24 = vld [vmem:[%s15486_s1 + $0x60] ss:$20 sps:$4 sm:$0xff]  }
  0x33   :  { %794 = vmatpush1.bf16.msra.mxu0 %v10334_v31  ;;  %1174 = vmatpush1.bf16.msra.mxu1 %v10335_v40  ;;  %v287_v31 = vrot.slane %v285_v20, 1  ;;  %v133_v40 = vld [vmem:[%s15486_s1 + $0x190] sm:$0xff]  ;;  %v11513_v55 = vsel %vm200_vm0, %v275_v45, %v279_v46  ;;  %v10414_v45 = vld [vmem:[%s15486_s1 + $0x14c] ss:$20 sps:$4 sm:$0xff]  }
  0x34   :  { %795 = vmatprep.subr.bf16.mxu0 %v15498_v28  ;;  %1175 = vmatprep.subr.bf16.mxu1 %v10341_v44  ;;  %v10359_v44 = vld [vmem:[%s15486_s1] ss:$20 sps:$4 sm:$0xff]   ;;  %v8339_v52 = vcombine.low %v133_v40, %v133_v40 }
  0x35   :  { %v11490_v38 = vsel %vm200_vm0, %v283_v30, %v287_v31  ;;  %v11519_v59 = vor.u32 %v292_v53, %v287_v31  ;;  %v10389_v20 = vld [vmem:[%s15486_s1 + $0x80] ss:$20 sps:$4 sm:$0xff]   ;;  %v134_v30 = vld [vmem:[%s15486_s1 + $0x198] sm:$0xff] }
  0x36   :  { %652 = vmatmul.mubr.bf16.gmra.mxu0 %v11388_v50  ;;  %743 = vmatmul.mubr.bf16.gmra.mxu1 %v11388_v50  ;;  %v10401_v31 = vld [vmem:[%s15486_s1 + $0x8] ss:$20 sps:$4 sm:$0xff]   ;;  %v8342_v35 = vcombine.high %v134_v30, %v134_v30  ;;  %v10416_v53 = vld [vmem:[%s15486_s1 + $0x460] ss:$20 sps:$4 sm:$0xff]  }
  0x37   :  { %796 = vmatpush1.bf16.msra.mxu0 %v10338_v49  ;;  %1176 = vmatpush1.bf16.msra.mxu1 %v10339_v51  ;;  %v10362_v49 = vld [vmem:[%s15486_s1 + $0x344] ss:$0 sps:$4 sm:$0xff]   ;;  %v8340_v51 = vcombine.high %v133_v40, %v133_v40 }
  0x38   :  { %797 = vmatprep.subr.bf16.mxu0 %v15498_v28  ;;  %8272 = vmatprep.mubr.msk.bf16.mxu0 %vm574_vm2, %v11403_v57  ;;  %v607_v56 = vsel %vm593_vm1, %v10362_v49, 0  ;;  %v10408_v40 = vld [vmem:[%s15486_s1 + $0x170] ss:$20 sps:$4 sm:$0xff]  }
  0x39   :  { %8279 = vmatprep.mubr.msk.bf16.mxu1 %vm574_vm2, %v11403_v57  ;;  %1177 = vmatprep.subr.bf16.mxu1 %v10345_v58  ;;  %v1157_v58 = vsel %vm593_vm1, %v8339_v52, 0  ;;  %v10415_v49 = vld [vmem:[%s15486_s1 + $0x150] ss:$20 sps:$4 sm:$0xff]   ;;  %v10421_v52 = vld [vmem:[%s15486_s1 + $0x46c] ss:$20 sps:$4 sm:$0xff]  }
  0x3b   :  { %798 = vmatpush1.bf16.msra.mxu0 %v10342_v61  ;;  %1178 = vmatpush1.bf16.msra.mxu1 %v10343_v2  ;;  %v289_v61 = vshrl.u32 %v11464_v26, 16 }
  0x3c   :  { %799 = vmatprep.subr.bf16.mxu0 %v15498_v28  ;;  %1179 = vmatprep.subr.bf16.mxu1 %v10349_v4  ;;  %v10369_v4 = vld [vmem:[%s15486_s1 + $0x140] ss:$20 sps:$4 sm:$0xff]  }
  0x3d   :  { %v11541_v2 = vor.u32 %v289_v61, %v279_v46  ;;  %v10412_v46 = vld [vmem:[%s15486_s1 + $0x148] ss:$20 sps:$4 sm:$0xff]  }
  0x3e   :  { %662 = vmatmul.mubr.bf16.gmra.mxu0 %v11437_v10  ;;  %753 = vmatmul.mubr.bf16.gmra.mxu1 %v11437_v10  ;;  %v10430_v61 = vld [vmem:[%s15486_s1 + $0x414] ss:$20 sps:$4 sm:$0xff]  }
  0x3f   :  { %800 = vmatpush1.bf16.msra.mxu0 %v10346_v9  ;;  %1180 = vmatpush1.bf16.msra.mxu1 %v10347_v11  ;;  %v10373_v9 = vld [vmem:[%s15486_s1 + $0x120] ss:$20 sps:$4 sm:$0xff]   ;;  %v10379_v11 = vld [vmem:[%s15486_s1 + $0x128] ss:$20 sps:$4 sm:$0xff]  }
  0x40   :  { %801 = vmatprep.subr.bf16.mxu0 %v15498_v28  ;;  %8273 = vmatprep.mubr.msk.bf16.mxu0 %vm574_vm2, %v11449_v15 }
  0x41   :  { %8280 = vmatprep.mubr.msk.bf16.mxu1 %vm574_vm2, %v11449_v15  ;;  %1181 = vmatprep.subr.bf16.mxu1 %v10353_v18  ;;  %v10385_v18 = vld [vmem:[%s15486_s1 + $0xa8] ss:$20 sps:$4 sm:$0xff]  }
  0x43   :  { %802 = vmatpush1.bf16.msra.mxu0 %v10350_v16  ;;  %1182 = vmatpush1.bf16.msra.mxu1 %v10351_v21  ;;  %v10384_v16 = vld [vmem:[%s15486_s1 + $0xd8] ss:$20 sps:$4 sm:$0xff]   ;;  %v10392_v21 = vld [vmem:[%s15486_s1 + $0x88] ss:$20 sps:$4 sm:$0xff]  }
  0x44   :  { %803 = vmatprep.subr.bf16.mxu0 %v15498_v28  ;;  %1183 = vmatprep.subr.bf16.mxu1 %v10357_v27  ;;  %v10397_v27 = vld [vmem:[%s15486_s1 + $0x30] ss:$20 sps:$4 sm:$0xff]  }
  0x46   :  { %672 = vmatmul.mubr.bf16.gmra.mxu0 %v11481_v34  ;;  %763 = vmatmul.mubr.bf16.gmra.mxu1 %v11481_v34 }
  0x47   :  { %804 = vmatpush1.bf16.msra.mxu0 %v10354_v29  ;;  %1184 = vmatpush1.bf16.msra.mxu1 %v10355_v33  ;;  %v10400_v29 = vld [vmem:[%s15486_s1 + $0x38] ss:$20 sps:$4 sm:$0xff]   ;;  %v10404_v33 = vld [vmem:[%s15486_s1 + $0x10] ss:$20 sps:$4 sm:$0xff]  }
  0x48   :  { %8274 = vmatprep.mubr.msk.bf16.mxu0 %vm574_vm2, %v11490_v38  ;;  %8281 = vmatprep.mubr.msk.bf16.mxu1 %vm574_vm2, %v11490_v38 }
  0x49   :  { %805 = vmatprep.subr.bf16.mxu0 %v15498_v28  ;;  %1185 = vmatprep.subr.bf16.mxu1 %v10361_v37 }
  0x4b   :  { %806 = vmatpush1.bf16.msra.mxu0 %v10358_v39  ;;  %1186 = vmatpush1.bf16.msra.mxu1 %v10359_v44  ;;  %v10410_v39 = vld [vmem:[%s15486_s1 + $0x174] ss:$20 sps:$4 sm:$0xff]   ;;  %v10411_v44 = vld [vmem:[%s15486_s1 + $0x178] ss:$20 sps:$4 sm:$0xff]  }
  0x4c   :  { %817 = vmatprep.subr.bf16.mxu0 %v15498_v28  ;;  %8344 = vmatprep.subr.msk.bf16.mxu1 %vm593_vm1, %v8340_v51  ;;  %v10418_v51 = vld [vmem:[%s15486_s1 + $0x464] ss:$20 sps:$4 sm:$0xff]  }
  0x4e   :  { %682 = vmatmul.mubr.bf16.gmra.mxu0 %v11513_v55  ;;  %773 = vmatmul.mubr.bf16.gmra.mxu1 %v11513_v55 }
  0x4f   :  { %818 = vmatpush2.bf16.msra.mxu0 %v607_v56  ;;  %1198 = vmatpush2.bf16.msra.mxu1 %v1157_v58  ;;  %v10424_v56 = vld [vmem:[%s15486_s1 + $0x43c] ss:$20 sps:$4 sm:$0xff]   ;;  %v10427_v58 = vld [vmem:[%s15486_s1 + $0x444] ss:$20 sps:$4 sm:$0xff]  }
  0x50   :  { %8275 = vmatprep.mubr.msk.bf16.mxu0 %vm574_vm2, %v11519_v59  ;;  %8282 = vmatprep.mubr.msk.bf16.mxu1 %vm574_vm2, %v11519_v59 }
  0x51   :  { %819 = vmatprep.subr.bf16.mxu0 %v15498_v28  ;;  %1199 = vmatprep.subr.bf16.mxu1 %v10367_v60  ;;  %v10425_v60 = vld [vmem:[%s15486_s1 + $0x440] ss:$20 sps:$4 sm:$0xff]  }
  0x53   :  { %820 = vmatpush2.bf16.msra.mxu0 %v10368_v0  ;;  %1200 = vmatpush2.bf16.msra.mxu1 %v10365_v62  ;;  %v10433_v62 = vld [vmem:[%s15486_s1 + $0x41c] ss:$20 sps:$4 sm:$0xff]  }
  0x54   :  { %821 = vmatprep.subr.bf16.mxu0 %v15498_v28  ;;  %1201 = vmatprep.subr.bf16.mxu1 %v10371_v1  ;;  %v10428_v0 = vld [vmem:[%s15486_s1 + $0x410] ss:$20 sps:$4 sm:$0xff]   ;;  %v10431_v1 = vld [vmem:[%s15486_s1 + $0x418] ss:$20 sps:$4 sm:$0xff]  }
  0x56   :  { %692 = vmatmul.mubr.bf16.gmra.mxu0 %v11541_v2  ;;  %783 = vmatmul.mubr.bf16.gmra.mxu1 %v11541_v2 }
  0x57   :  { %822 = vmatpush2.bf16.msra.mxu0 %v10372_v5  ;;  %1202 = vmatpush2.bf16.msra.mxu1 %v10369_v4  ;;  %v10439_v4 = vld [vmem:[%s15486_s1 + $0x3f4] ss:$20 sps:$4 sm:$0xff]  }
  0x58   :  { %8283 = vmatprep.mubr.msk.bf16.mxu0 %vm574_vm2, %v11302_v8  ;;  %8345 = vmatprep.mubr.msk.bf16.mxu1 %vm574_vm2, %v11242_v42  ;;  %v10376_v8 = vld [vmem:[%s15486_s1 + $0xf8] ss:$20 sps:$4 sm:$0xff]   ;;  %v10434_v5 = vld [vmem:[%s15486_s1 + $0x3e8] ss:$20 sps:$4 sm:$0xff]  }
  0x59   :  { %1262 = vmatprep.subr.bf16.mxu0 %v10375_v6  ;;  %1353 = vmatprep.subr.bf16.mxu1 %v15498_v28  ;;  %v10437_v6 = vld [vmem:[%s15486_s1 + $0x3f0] ss:$20 sps:$4 sm:$0xff]  }
  0x5e   :  { %824 = vmatmul.mubr.bf16.vlgmr.msra.gmra.mxu0 %v11339_v25  ;;  %1204 = vmatmul.mubr.bf16.vlgmr.msra.gmra.mxu1 %v11258_v48  ;;  %v10382_v25 = vld [vmem:[%s15486_s1 + $0xd4] ss:$20 sps:$4 sm:$0xff]  }
  0x5f   :  { %1263 = vmatpush1.bf16.msra.mxu0 %v10373_v9  ;;  %1354 = vmatpush1.bf16.msra.mxu1 %v10379_v11  ;;  %v10442_v9 = vld [vmem:[%s15486_s1 + $0x3c4] ss:$20 sps:$4 sm:$0xff]   ;;  %v10445_v11 = vld [vmem:[%s15486_s1 + $0x3cc] ss:$20 sps:$4 sm:$0xff]  }
  0x60   :  { %1264 = vmatprep.subr.bf16.mxu0 %v10378_v12  ;;  %8284 = vmatprep.mubr.msk.bf16.mxu0 %vm574_vm2, %v11354_v32  ;;  %v10387_v32 = vld [vmem:[%s15486_s1 + $0xac] ss:$20 sps:$4 sm:$0xff]  }
  0x61   :  { %8346 = vmatprep.mubr.msk.bf16.mxu1 %vm574_vm2, %v11244_v43  ;;  %1355 = vmatprep.subr.bf16.mxu1 %v15498_v28  ;;  %v10440_v12 = vld [vmem:[%s15486_s1 + $0x3c0] ss:$20 sps:$4 sm:$0xff]  }
  0x63   :  { %1265 = vmatpush1.bf16.msra.mxu0 %v10376_v8  ;;  %1356 = vmatpush1.bf16.msra.mxu1 %v10383_v13  ;;  %v10443_v8 = vld [vmem:[%s15486_s1 + $0x3c8] ss:$20 sps:$4 sm:$0xff]  }
  0x64   :  { %1266 = vmatprep.subr.bf16.mxu0 %v10382_v25  ;;  %1357 = vmatprep.subr.bf16.mxu1 %v15498_v28  ;;  %v10448_v13 = vld [vmem:[%s15486_s1 + $0x39c] ss:$20 sps:$4 sm:$0xff]   ;;  %v10451_v25 = vld [vmem:[%s15486_s1 + $0x3a4] ss:$20 sps:$4 sm:$0xff]  }
  0x66   :  { %832 = vmatmul.mubr.bf16.gmra.mxu0 %v11388_v50  ;;  %1214 = vmatmul.mubr.bf16.gmra.mxu1 %v11269_v54  ;;  %v10391_v50 = vld [vmem:[%s15486_s1 + $0x84] ss:$20 sps:$4 sm:$0xff]  }
  0x67   :  { %1267 = vmatpush1.bf16.msra.mxu0 %v10380_v14  ;;  %1358 = vmatpush1.bf16.msra.mxu1 %v10384_v16  ;;  %v10446_v14 = vld [vmem:[%s15486_s1 + $0x398] ss:$20 sps:$4 sm:$0xff]   ;;  %v10449_v16 = vld [vmem:[%s15486_s1 + $0x3a0] ss:$20 sps:$4 sm:$0xff]  }
  0x68   :  { %1268 = vmatprep.subr.bf16.mxu0 %v10387_v32  ;;  %8285 = vmatprep.mubr.msk.bf16.mxu0 %vm574_vm2, %v11403_v57  ;;  %v10395_v57 = vld [vmem:[%s15486_s1 + $0x5c] ss:$20 sps:$4 sm:$0xff]   ;;  %v10454_v32 = vld [vmem:[%s15486_s1 + $0x374] ss:$20 sps:$4 sm:$0xff]  }
  0x69   :  { %8347 = vmatprep.mubr.msk.bf16.mxu1 %vm574_vm2, %v11285_v63  ;;  %1359 = vmatprep.subr.bf16.mxu1 %v15498_v28 }
  0x6b   :  { %1269 = vmatpush1.bf16.msra.mxu0 %v10385_v18  ;;  %1360 = vmatpush1.bf16.msra.mxu1 %v10388_v19  ;;  %v10457_v18 = vld [vmem:[%s15486_s1 + $0x37c] ss:$20 sps:$4 sm:$0xff]  }
  0x6c   :  { %1270 = vmatprep.subr.bf16.mxu0 %v10391_v50  ;;  %1361 = vmatprep.subr.bf16.mxu1 %v15498_v28  ;;  %v10452_v19 = vld [vmem:[%s15486_s1 + $0x370] ss:$20 sps:$4 sm:$0xff]   ;;  %v10455_v50 = vld [vmem:[%s15486_s1 + $0x378] ss:$20 sps:$4 sm:$0xff]  }
  0x6e   :  { %840 = vmatmul.mubr.bf16.gmra.mxu0 %v11437_v10  ;;  %1224 = vmatmul.mubr.bf16.gmra.mxu1 %v11322_v17  ;;  %v10399_v10 = vld [vmem:[%s15486_s1 + $0x34] ss:$20 sps:$4 sm:$0xff]  }
  0x6f   :  { %1271 = vmatpush1.bf16.msra.mxu0 %v10389_v20  ;;  %1362 = vmatpush1.bf16.msra.mxu1 %v10392_v21  ;;  %v8424_v20 = vld [vmem:[%s15486_s1 + $0x4d8] sm:$0xff]  ;;  %v10460_v21 = vld [vmem:[%s15486_s1 + $0x34c] ss:$20 sps:$4 sm:$0xff]  }
  0x70   :  { %1272 = vmatprep.subr.bf16.mxu0 %v10395_v57  ;;  %8286 = vmatprep.mubr.msk.bf16.mxu0 %vm574_vm2, %v11449_v15  ;;  %v10403_v15 = vld [vmem:[%s15486_s1 + $0xc] ss:$20 sps:$4 sm:$0xff]   ;;  %v10463_v57 = vld [vmem:[%s15486_s1 + $0x354] ss:$20 sps:$4 sm:$0xff]  }
  0x71   :  { %8348 = vmatprep.mubr.msk.bf16.mxu1 %vm574_vm2, %v11333_v23  ;;  %1363 = vmatprep.subr.bf16.mxu1 %v15498_v28 }
  0x73   :  { %1273 = vmatpush1.bf16.msra.mxu0 %v10393_v22  ;;  %1364 = vmatpush1.bf16.msra.mxu1 %v10396_v24  ;;  %v8425_v22 = vld [vmem:[%s15486_s1 + $0x4e0] sm:$0xff]  ;;  %v10458_v24 = vld [vmem:[%s15486_s1 + $0x348] ss:$20 sps:$4 sm:$0xff]  }
  0x74   :  { %1274 = vmatprep.subr.bf16.mxu0 %v10399_v10  ;;  %1365 = vmatprep.subr.bf16.mxu1 %v15498_v28  ;;  %v10461_v10 = vld [vmem:[%s15486_s1 + $0x350] ss:$20 sps:$4 sm:$0xff]  }
  0x76   :  { %848 = vmatmul.mubr.bf16.gmra.mxu0 %v11481_v34  ;;  %1234 = vmatmul.mubr.bf16.gmra.mxu1 %v11372_v41  ;;  %v8341_v34 = vcombine.low %v134_v30, %v134_v30  ;;  %v8479_v30 = vcombine.low %v8425_v22, %v8425_v22 }
  0x77   :  { %1275 = vmatpush1.bf16.msra.mxu0 %v10397_v27  ;;  %1366 = vmatpush1.bf16.msra.mxu1 %v10400_v29  ;;  %v8478_v27 = vcombine.high %v8424_v20, %v8424_v20  ;;  %v8477_v29 = vcombine.low %v8424_v20, %v8424_v20  ;;  %v10517_v20 = vld [vmem:[%s15488_s2 + $0x40c] ss:$12 sps:$4 sm:$0xff]  }
  0x78   :  { %8287 = vmatprep.mubr.msk.bf16.mxu0 %vm574_vm2, %v11490_v38  ;;  %8349 = vmatprep.mubr.msk.bf16.mxu1 %vm574_vm2, %v11382_v47  ;;  %v1163_v37 = vsel %vm593_vm1, %v8341_v34, 0  ;;  %v1169_v38 = vsel %vm593_vm1, %v10407_v36, 0  ;;  %v10473_v34 = vld [vmem:[%s15486_s1 + $0x4bc] ss:$20 sps:$4 sm:$0xff]  }
  0x79   :  { %1276 = vmatprep.subr.bf16.mxu0 %v10403_v15  ;;  %1367 = vmatprep.subr.bf16.mxu1 %v15498_v28  ;;  %v8480_v15 = vcombine.high %v8425_v22, %v8425_v22  ;;  %v10468_v36 = vld [vmem:[%s15486_s1 + $0x4b0] ss:$20 sps:$4 sm:$0xff]   ;;  %v10523_v22 = vld [vmem:[%s15488_s2 + $0x3f4] ss:$12 sps:$4 sm:$0xff]  }
  0x7b   :  { %1277 = vmatpush1.bf16.msra.mxu0 %v10401_v31  ;;  %1368 = vmatpush1.bf16.msra.mxu1 %v10404_v33  ;;  %v1830_v31 = vsel %vm593_vm1, %v8477_v29, 0  ;;  %v1836_v33 = vsel %vm593_vm1, %v8479_v30, 0  ;;  %v10529_v30 = vld [vmem:[%s15488_s2 + $0x3dc] ss:$12 sps:$4 sm:$0xff]  }
  0x7c   :  { %8351 = vmatprep.subr.msk.bf16.mxu0 %vm593_vm1, %v8342_v35  ;;  %1379 = vmatprep.subr.bf16.mxu1 %v15498_v28  ;;  %v10470_v35 = vld [vmem:[%s15486_s1 + $0x4b4] ss:$20 sps:$4 sm:$0xff]  }
  0x7e   :  { %856 = vmatmul.mubr.bf16.gmra.mxu0 %v11513_v55  ;;  %1244 = vmatmul.mubr.bf16.gmra.mxu1 %v11421_v3  ;;  %v10419_v55 = vld [vmem:[%s15486_s1 + $0x468] ss:$20 sps:$4 sm:$0xff]  }
  0x7f   :  { %1289 = vmatpush2.bf16.msra.mxu0 %v1163_v37  ;;  %1380 = vmatpush2.bf16.msra.mxu1 %v1169_v38  ;;  %v10471_v37 = vld [vmem:[%s15486_s1 + $0x4b8] ss:$20 sps:$4 sm:$0xff]  }
  0x80   :  { %8288 = vmatprep.mubr.msk.bf16.mxu0 %vm574_vm2, %v11519_v59  ;;  %8350 = vmatprep.mubr.msk.bf16.mxu1 %vm574_vm2, %v11431_v7  ;;  %v10422_v59 = vld [vmem:[%s15486_s1 + $0x438] ss:$20 sps:$4 sm:$0xff]  }
  0x81   :  { %1290 = vmatprep.subr.bf16.mxu0 %v10410_v39  ;;  %1381 = vmatprep.subr.bf16.mxu1 %v15498_v28  ;;  %v10476_v38 = vld [vmem:[%s15486_s1 + $0x48c] ss:$20 sps:$4 sm:$0xff]   ;;  %v10479_v39 = vld [vmem:[%s15486_s1 + $0x494] ss:$20 sps:$4 sm:$0xff]  }
  0x83   :  { %1291 = vmatpush2.bf16.msra.mxu0 %v10408_v40  ;;  %1382 = vmatpush2.bf16.msra.mxu1 %v10411_v44  ;;  %v1513_v40 = vrot.slane %v11242_v42, 1  ;;  %v1514_v44 = vrot.slane %v11244_v43, 1 }
  0x84   :  { %1292 = vmatprep.subr.bf16.mxu0 %v10414_v45  ;;  %1383 = vmatprep.subr.bf16.mxu1 %v15498_v28  ;;  %v10474_v45 = vld [vmem:[%s15486_s1 + $0x488] ss:$20 sps:$4 sm:$0xff]  }
  0x86   :  { %864 = vmatmul.mubr.bf16.gmra.mxu0 %v11541_v2  ;;  %1254 = vmatmul.mubr.bf16.gmra.mxu1 %v11464_v26  ;;  %v10436_v2 = vld [vmem:[%s15486_s1 + $0x3ec] ss:$20 sps:$4 sm:$0xff]  }
  0x87   :  { %1293 = vmatpush2.bf16.msra.mxu0 %v10412_v46  ;;  %1384 = vmatpush2.bf16.msra.mxu1 %v10415_v49  ;;  %v10477_v46 = vld [vmem:[%s15486_s1 + $0x490] ss:$20 sps:$4 sm:$0xff]   ;;  %v11865_v49 = vsel %vm1509_vm3, %v1513_v40, %v1514_v44 }
  0x88   :  { %8352 = vmatprep.mubr.msk.bf16.mxu0 %vm574_vm2, %v11242_v42  ;;  %8358 = vmatprep.mubr.msk.bf16.mxu1 %vm574_vm2, %v11242_v42  ;;  %v1510_v42 = vrot.slane %v11258_v48, 1 }
  0x89   :  { %1844 = vmatprep.subr.bf16.mxu0 %v10418_v51  ;;  %1935 = vmatprep.subr.bf16.mxu1 %v10421_v52  ;;  %v1518_v51 = vrot.slane %v11285_v63, 1 }
  0x8e   :  { %1295 = vmatmul.mubr.bf16.vlgmr.msra.gmra.mxu0 %v11258_v48  ;;  %1386 = vmatmul.mubr.bf16.vlgmr.msra.gmra.mxu1 %v11258_v48  ;;  %v11884_v48 = vsel %vm1509_vm3, %v1514_v44, %v1518_v51 }
  0x8f   :  { %1845 = vmatpush1.bf16.msra.mxu0 %v10416_v53  ;;  %1936 = vmatpush1.bf16.msra.mxu1 %v10419_v55  ;;  %v10480_v53 = vld [vmem:[%s15486_s1 + $0x470] ss:$20 sps:$4 sm:$0xff]   ;;  %v1522_v55 = vrot.slane %v11333_v23, 1 }
  0x90   :  { %1846 = vmatprep.subr.bf16.mxu0 %v10424_v56  ;;  %8353 = vmatprep.mubr.msk.bf16.mxu0 %vm574_vm2, %v11244_v43 }
  0x91   :  { %8359 = vmatprep.mubr.msk.bf16.mxu1 %vm574_vm2, %v11244_v43  ;;  %1937 = vmatprep.subr.bf16.mxu1 %v10427_v58  ;;  %v1511_v43 = vrot.slane %v11269_v54, 1  ;;  %v10482_v58 = vld [vmem:[%s15486_s1 + $0x420] ss:$20 sps:$4 sm:$0xff]  }
  0x93   :  { %1847 = vmatpush1.bf16.msra.mxu0 %v10422_v59  ;;  %1938 = vmatpush1.bf16.msra.mxu1 %v10425_v60  ;;  %v11878_v52 = vsel %vm1509_vm3, %v1510_v42, %v1511_v43  ;;  %v11906_v59 = vsel %vm1509_vm3, %v1518_v51, %v1522_v55  ;;  %v1526_v60 = vrot.slane %v11382_v47, 1  ;;  %v10541_v51 = vld [vmem:[%s15488_s2 + $0x52c] ss:$12 sps:$4 sm:$0xff]  }
  0x94   :  { %1848 = vmatprep.subr.bf16.mxu0 %v10430_v61  ;;  %1939 = vmatprep.subr.bf16.mxu1 %v10433_v62  ;;  %v10484_v62 = vld [vmem:[%s15486_s1 + $0x3d0] ss:$20 sps:$4 sm:$0xff]  }
  0x96   :  { %1305 = vmatmul.mubr.bf16.gmra.mxu0 %v11269_v54  ;;  %1394 = vmatmul.mubr.bf16.gmra.mxu1 %v11269_v54  ;;  %v10481_v54 = vld [vmem:[%s15486_s1 + $0x448] ss:$20 sps:$4 sm:$0xff]  }
  0x97   :  { %1849 = vmatpush1.bf16.msra.mxu0 %v10428_v0  ;;  %1940 = vmatpush1.bf16.msra.mxu1 %v10431_v1  ;;  %v11928_v0 = vsel %vm1509_vm3, %v1522_v55, %v1526_v60  ;;  %v11942_v1 = vrot.slane %v11431_v7, 1 }
  0x98   :  { %1850 = vmatprep.subr.bf16.mxu0 %v10436_v2  ;;  %8354 = vmatprep.mubr.msk.bf16.mxu0 %vm574_vm2, %v11285_v63 }
  0x99   :  { %8360 = vmatprep.mubr.msk.bf16.mxu1 %vm574_vm2, %v11285_v63  ;;  %1941 = vmatprep.subr.bf16.mxu1 %v10439_v4  ;;  %v1516_v63 = vrot.slane %v11322_v17, 1  ;;  %v10486_v4 = vld [vmem:[%s15486_s1 + $0x380] ss:$20 sps:$4 sm:$0xff]  }
  0x9b   :  { %1851 = vmatpush1.bf16.msra.mxu0 %v10434_v5  ;;  %1942 = vmatpush1.bf16.msra.mxu1 %v10437_v6  ;;  %v11899_v56 = vsel %vm1509_vm3, %v1511_v43, %v1516_v63  ;;  %v10488_v5 = vld [vmem:[%s15486_s1 + $0x4e8] ss:$0 sps:$4 sm:$0xff]   ;;  %v11966_v6 = vrot.slane %v11464_v26, 1  ;;  %v10512_v43 = vld [vmem:[%s15488_s2 + $0x5a0] ss:$12 sps:$4 sm:$0xff]  }
  0x9c   :  { %1852 = vmatprep.subr.bf16.mxu0 %v10442_v9  ;;  %1943 = vmatprep.subr.bf16.mxu1 %v10445_v11  ;;  %v10493_v9 = vld [vmem:[%s15488_s2 + $0x46c] ss:$12 sps:$4 sm:$0xff]   ;;  %v10491_v11 = vld [vmem:[%s15488_s2 + $0x468] ss:$12 sps:$4 sm:$0xff]  }
  0x9e   :  { %1315 = vmatmul.mubr.bf16.gmra.mxu0 %v11322_v17  ;;  %1402 = vmatmul.mubr.bf16.gmra.mxu1 %v11322_v17  ;;  %v10483_v17 = vld [vmem:[%s15486_s1 + $0x3f8] ss:$20 sps:$4 sm:$0xff]  }
  0x9f   :  { %1853 = vmatpush1.bf16.msra.mxu0 %v10440_v12  ;;  %1944 = vmatpush1.bf16.msra.mxu1 %v10443_v8  ;;  %v1842_v8 = vsel %vm593_vm1, %v10488_v5, 0 }
  0xa0   :  { %1854 = vmatprep.subr.bf16.mxu0 %v10448_v13  ;;  %8355 = vmatprep.mubr.msk.bf16.mxu0 %vm574_vm2, %v11333_v23  ;;  %v10497_v13 = vld [vmem:[%s15488_s2 + $0x450] ss:$12 sps:$4 sm:$0xff]  }
  0xa1   :  { %8361 = vmatprep.mubr.msk.bf16.mxu1 %vm574_vm2, %v11333_v23  ;;  %1945 = vmatprep.subr.bf16.mxu1 %v10451_v25  ;;  %v1520_v23 = vrot.slane %v11372_v41, 1  ;;  %v10489_v25 = vld [vmem:[%s15486_s1 + $0x4c0] ss:$20 sps:$4 sm:$0xff]  }
  0xa3   :  { %1855 = vmatpush1.bf16.msra.mxu0 %v10446_v14  ;;  %1946 = vmatpush1.bf16.msra.mxu1 %v10449_v16  ;;  %v11921_v61 = vsel %vm1509_vm3, %v1516_v63, %v1520_v23  ;;  %v10505_v14 = vld [vmem:[%s15488_s2 + $0x43c] ss:$12 sps:$4 sm:$0xff]   ;;  %v10503_v16 = vld [vmem:[%s15488_s2 + $0x438] ss:$12 sps:$4 sm:$0xff]  }
  0xa4   :  { %1856 = vmatprep.subr.bf16.mxu0 %v10454_v32  ;;  %1947 = vmatprep.subr.bf16.mxu1 %v10457_v18  ;;  %v10490_v32 = vld [vmem:[%s15486_s1 + $0x498] ss:$20 sps:$4 sm:$0xff]  }
  0xa5   :  { %v10496_v18 = vld [vmem:[%s15488_s2 + $0x5ec] ss:$12 sps:$4 sm:$0xff]  }
  0xa6   :  { %1325 = vmatmul.mubr.bf16.gmra.mxu0 %v11372_v41  ;;  %1410 = vmatmul.mubr.bf16.gmra.mxu1 %v11372_v41  ;;  %v10485_v41 = vld [vmem:[%s15486_s1 + $0x3a8] ss:$20 sps:$4 sm:$0xff]  }
  0xa7   :  { %1857 = vmatpush1.bf16.msra.mxu0 %v10452_v19  ;;  %1948 = vmatpush1.bf16.msra.mxu1 %v10455_v50  ;;  %v10509_v19 = vld [vmem:[%s15488_s2 + $0x420] ss:$12 sps:$4 sm:$0xff]   ;;  %v10511_v50 = vld [vmem:[%s15488_s2 + $0x424] ss:$12 sps:$4 sm:$0xff]  }
  0xa8   :  { %8356 = vmatprep.mubr.msk.bf16.mxu0 %vm574_vm2, %v11382_v47  ;;  %8362 = vmatprep.mubr.msk.bf16.mxu1 %vm574_vm2, %v11382_v47  ;;  %v1524_v47 = vrot.slane %v11421_v3, 1 }
  0xa9   :  { %1858 = vmatprep.subr.bf16.mxu0 %v10460_v21  ;;  %1949 = vmatprep.subr.bf16.mxu1 %v10463_v57  ;;  %v10515_v21 = vld [vmem:[%s15488_s2 + $0x408] ss:$12 sps:$4 sm:$0xff]  }
  0xaa   :  { %v11945_v2 = vsel %vm1509_vm3, %v1520_v23, %v1524_v47  ;;  %v11979_v12 = vsel %vm1509_vm3, %v1524_v47, %v11966_v6  ;;  %v10494_v57 = vld [vmem:[%s15488_s2 + $0x5e8] ss:$12 sps:$4 sm:$0xff]   ;;  %v10524_v47 = vld [vmem:[%s15488_s2 + $0x570] ss:$12 sps:$4 sm:$0xff]  }
  0xab   :  { %1859 = vmatpush1.bf16.msra.mxu0 %v10458_v24  ;;  %1950 = vmatpush1.bf16.msra.mxu1 %v10461_v10  ;;  %v10502_v24 = vld [vmem:[%s15488_s2 + $0x5d4] ss:$12 sps:$4 sm:$0xff]   ;;  %v10521_v10 = vld [vmem:[%s15488_s2 + $0x3f0] ss:$12 sps:$4 sm:$0xff]  }
  0xac   :  { %8482 = vmatprep.subr.msk.bf16.mxu0 %vm593_vm1, %v8478_v27  ;;  %8489 = vmatprep.subr.msk.bf16.mxu1 %vm593_vm1, %v8480_v15  ;;  %v10500_v15 = vld [vmem:[%s15488_s2 + $0x5d0] ss:$12 sps:$4 sm:$0xff]   ;;  %v10526_v23 = vld [vmem:[%s15488_s2 + $0x574] ss:$12 sps:$4 sm:$0xff]  }
  0xae   :  { %1335 = vmatmul.mubr.bf16.gmra.mxu0 %v11421_v3  ;;  %1418 = vmatmul.mubr.bf16.gmra.mxu1 %v11421_v3  ;;  %v11953_v3 = vsel %vm1509_vm3, %v1526_v60, %v11942_v1  ;;  %v10545_v60 = vld [vmem:[%s15488_s2 + $0x510] ss:$12 sps:$4 sm:$0xff]  }
  0xaf   :  { %1871 = vmatpush2.bf16.msra.mxu0 %v1830_v31  ;;  %1962 = vmatpush2.bf16.msra.mxu1 %v1836_v33 }
  0xb0   :  { %8357 = vmatprep.mubr.msk.bf16.mxu0 %vm574_vm2, %v11431_v7  ;;  %8363 = vmatprep.mubr.msk.bf16.mxu1 %vm574_vm2, %v11431_v7  ;;  %v10487_v7 = vld [vmem:[%s15486_s1 + $0x358] ss:$20 sps:$4 sm:$0xff]  }
  0xb1   :  { %1872 = vmatprep.subr.bf16.mxu0 %v10470_v35  ;;  %1963 = vmatprep.subr.bf16.mxu1 %v10473_v34  ;;  %v10508_v35 = vld [vmem:[%s15488_s2 + $0x5bc] ss:$12 sps:$4 sm:$0xff]   ;;  %v10527_v34 = vld [vmem:[%s15488_s2 + $0x3d8] ss:$12 sps:$4 sm:$0xff]  }
  0xb3   :  { %1873 = vmatpush2.bf16.msra.mxu0 %v10468_v36  ;;  %1964 = vmatpush2.bf16.msra.mxu1 %v10471_v37 }
  0xb4   :  { %1874 = vmatprep.subr.bf16.mxu0 %v10476_v38  ;;  %1965 = vmatprep.subr.bf16.mxu1 %v10479_v39  ;;  %v10506_v38 = vld [vmem:[%s15488_s2 + $0x5b8] ss:$12 sps:$4 sm:$0xff]  }
  0xb5   :  { %v10535_v39 = vld [vmem:[%s15488_s2 + $0x3c4] ss:$12 sps:$4 sm:$0xff]  }
  0xb6   :  { %1345 = vmatmul.mubr.bf16.gmra.mxu0 %v11464_v26  ;;  %1426 = vmatmul.mubr.bf16.gmra.mxu1 %v11464_v26  ;;  %v10499_v26 = vld [vmem:[%s15488_s2 + $0x454] ss:$12 sps:$4 sm:$0xff]  }
  0xb7   :  { %1875 = vmatpush2.bf16.msra.mxu0 %v10474_v45  ;;  %1966 = vmatpush2.bf16.msra.mxu1 %v10477_v46  ;;  %v10514_v45 = vld [vmem:[%s15488_s2 + $0x5a4] ss:$12 sps:$4 sm:$0xff]   ;;  %v10533_v46 = vld [vmem:[%s15488_s2 + $0x3c0] ss:$12 sps:$4 sm:$0xff]  }
  0xb8   :  { %8483 = vmatprep.mubr.msk.bf16.mxu0 %vm574_vm2, %v11865_v49  ;;  %8490 = vmatprep.mubr.msk.bf16.mxu1 %vm574_vm2, %v11865_v49 }
  0xb9   :  { %2026 = vmatprep.subr.bf16.mxu0 %v15498_v28  ;;  %3384 = vmatprep.subr.bf16.mxu1 %v10493_v9  ;;  %v10530_v9 = vld [vmem:[%s15488_s2 + $0x558] ss:$12 sps:$4 sm:$0xff]  }
  0xbe   :  { %1877 = vmatmul.mubr.bf16.vlgmr.msra.gmra.mxu0 %v11878_v52  ;;  %1968 = vmatmul.mubr.bf16.vlgmr.msra.gmra.mxu1 %v11878_v52 }
  0xbf   :  { %2027 = vmatpush1.bf16.msra.mxu0 %v10480_v53  ;;  %8484 = vmatprep.mubr.msk.bf16.mxu0 %vm574_vm2, %v11884_v48 }
  0xc0   :  { %2028 = vmatprep.subr.bf16.mxu0 %v15498_v28  ;;  %8491 = vmatprep.mubr.msk.bf16.mxu1 %vm574_vm2, %v11884_v48 }
  0xc1   :  { %3385 = vmatpush1.bf16.msra.mxu1 %v10491_v11 }
  0xc2   :  { %3386 = vmatprep.subr.bf16.mxu1 %v10499_v26 }
  0xc3   :  { %2029 = vmatpush1.bf16.msra.mxu0 %v10481_v54  ;;  %v10539_v54 = vld [vmem:[%s15488_s2 + $0x528] ss:$12 sps:$4 sm:$0xff]  }
  0xc4   :  { %2030 = vmatprep.subr.bf16.mxu0 %v15498_v28 }
  0xc5   :  { %3387 = vmatpush1.bf16.msra.mxu1 %v10497_v13 }
  0xc6   :  { %1887 = vmatmul.mubr.bf16.gmra.mxu0 %v11899_v56  ;;  %1978 = vmatmul.mubr.bf16.gmra.mxu1 %v11899_v56 }
  0xc7   :  { %2031 = vmatpush1.bf16.msra.mxu0 %v10482_v58  ;;  %8485 = vmatprep.mubr.msk.bf16.mxu0 %vm574_vm2, %v11906_v59  ;;  %v10547_v58 = vld [vmem:[%s15488_s2 + $0x514] ss:$12 sps:$4 sm:$0xff]  }
  0xc8   :  { %2032 = vmatprep.subr.bf16.mxu0 %v15498_v28  ;;  %8492 = vmatprep.mubr.msk.bf16.mxu1 %vm574_vm2, %v11906_v59 }
  0xc9   :  { %3388 = vmatprep.subr.bf16.mxu1 %v10505_v14  ;;  %v10559_v14 = vld [vmem:[%s15488_s2 + $0x4e4] ss:$12 sps:$4 sm:$0xff]  }
  0xca   :  { %3389 = vmatpush1.bf16.msra.mxu1 %v10503_v16  ;;  %v10536_v16 = vld [vmem:[%s15488_s2 + $0x540] ss:$12 sps:$4 sm:$0xff]  }
  0xcb   :  { %2033 = vmatpush1.bf16.msra.mxu0 %v10483_v17  ;;  %3390 = vmatprep.subr.bf16.mxu1 %v10511_v50 }
  0xcc   :  { %2034 = vmatprep.subr.bf16.mxu0 %v15498_v28 }
  0xce   :  { %1897 = vmatmul.mubr.bf16.gmra.mxu0 %v11921_v61  ;;  %1988 = vmatmul.mubr.bf16.gmra.mxu1 %v11921_v61 }
  0xcf   :  { %2035 = vmatpush1.bf16.msra.mxu0 %v10484_v62  ;;  %8486 = vmatprep.mubr.msk.bf16.mxu0 %vm574_vm2, %v11928_v0 }
  0xd0   :  { %2036 = vmatprep.subr.bf16.mxu0 %v15498_v28  ;;  %8493 = vmatprep.mubr.msk.bf16.mxu1 %vm574_vm2, %v11928_v0 }
  0xd1   :  { %3391 = vmatpush1.bf16.msra.mxu1 %v10509_v19 }
  0xd2   :  { %3392 = vmatprep.subr.bf16.mxu1 %v10517_v20 }
  0xd3   :  { %2037 = vmatpush1.bf16.msra.mxu0 %v10485_v41 }
  0xd4   :  { %2038 = vmatprep.subr.bf16.mxu0 %v15498_v28 }
  0xd5   :  { %3393 = vmatpush1.bf16.msra.mxu1 %v10515_v21  ;;  %v10544_v21 = vld [vmem:[%s15488_s2 + $0x6ac] ss:$12 sps:$4 sm:$0xff]  }
  0xd6   :  { %1907 = vmatmul.mubr.bf16.gmra.mxu0 %v11945_v2  ;;  %1998 = vmatmul.mubr.bf16.gmra.mxu1 %v11945_v2 }
  0xd7   :  { %2039 = vmatpush1.bf16.msra.mxu0 %v10486_v4  ;;  %8487 = vmatprep.mubr.msk.bf16.mxu0 %vm574_vm2, %v11953_v3  ;;  %v10553_v4 = vld [vmem:[%s15488_s2 + $0x4fc] ss:$12 sps:$4 sm:$0xff]  }
  0xd8   :  { %8494 = vmatprep.mubr.msk.bf16.mxu1 %vm574_vm2, %v11953_v3  ;;  %2040 = vmatprep.subr.bf16.mxu0 %v15498_v28 }
  0xd9   :  { %3394 = vmatprep.subr.bf16.mxu1 %v10523_v22 }
  0xda   :  { %3395 = vmatpush1.bf16.msra.mxu1 %v10521_v10 }
  0xdb   :  { %2041 = vmatpush1.bf16.msra.mxu0 %v10487_v7  ;;  %3396 = vmatprep.subr.bf16.mxu1 %v10529_v30  ;;  %v10550_v30 = vld [vmem:[%s15488_s2 + $0x694] ss:$12 sps:$4 sm:$0xff]  }
  0xdc   :  { %2052 = vmatprep.subr.bf16.mxu0 %v15498_v28 }
  0xde   :  { %1917 = vmatmul.mubr.bf16.gmra.mxu0 %v11979_v12  ;;  %2008 = vmatmul.mubr.bf16.gmra.mxu1 %v11979_v12 }
  0xdf   :  { %2053 = vmatpush2.bf16.msra.mxu0 %v1842_v8  ;;  %8488 = vmatprep.mubr.msk.bf16.mxu0 %vm574_vm2, %v11942_v1 }
  0xe0   :  { %8495 = vmatprep.mubr.msk.bf16.mxu1 %vm574_vm2, %v11942_v1  ;;  %2054 = vmatprep.subr.bf16.mxu0 %v15498_v28 }
  0xe1   :  { %3397 = vmatpush1.bf16.msra.mxu1 %v10527_v34  ;;  %v10548_v34 = vld [vmem:[%s15488_s2 + $0x690] ss:$12 sps:$4 sm:$0xff]  }
  0xe2   :  { %3398 = vmatprep.subr.bf16.mxu1 %v10535_v39 }
  0xe3   :  { %2055 = vmatpush2.bf16.msra.mxu0 %v10489_v25  ;;  %v10538_v25 = vld [vmem:[%s15488_s2 + $0x544] ss:$12 sps:$4 sm:$0xff]  }
  0xe4   :  { %2056 = vmatprep.subr.bf16.mxu0 %v15498_v28 }
  0xe5   :  { %3399 = vmatpush1.bf16.msra.mxu1 %v10533_v46 }
  0xe6   :  { %1927 = vmatmul.mubr.bf16.gmra.mxu0 %v11966_v6  ;;  %2018 = vmatmul.mubr.bf16.gmra.mxu1 %v11966_v6 }
  0xe7   :  { %2057 = vmatpush2.bf16.msra.mxu0 %v10490_v32  ;;  %8496 = vmatprep.mubr.msk.bf16.mxu0 %vm574_vm2, %v11865_v49  ;;  %v10557_v32 = vld [vmem:[%s15488_s2 + $0x4e0] ss:$12 sps:$4 sm:$0xff]  }
  0xe8   :  { %3467 = vmatprep.subr.bf16.mxu0 %v10496_v18  ;;  %3400 = vmatprep.subr.bf16.mxu1 %v10541_v51  ;;  %v10556_v51 = vld [vmem:[%s15488_s2 + $0x67c] ss:$12 sps:$4 sm:$0xff]  }
  0xe9   :  { %3401 = vmatpush2.bf16.msra.mxu1 %v10539_v54 }
  0xea   :  { %3402 = vmatprep.subr.bf16.mxu1 %v10547_v58 }
  0xed   :  { %3403 = vmatpush2.bf16.msra.mxu1 %v10545_v60  ;;  %v10562_v60 = vld [vmem:[%s15488_s2 + $0x664] ss:$12 sps:$4 sm:$0xff]  }
  0xee   :  { %v12040_v27 = vpop.f32.mrf.mxu0  ;;  %v12042_v29 = vpop.f32.mrf.mxu1  ;;  %2059 = vmatmul.mubr.bf16.vlgmr.msra.gmra.mxu0 %v11878_v52  ;;  %3404 = vmatprep.subr.bf16.mxu1 %v10553_v4  ;;  %v10560_v4 = vld [vmem:[%s15488_s2 + $0x660] ss:$12 sps:$4 sm:$0xff]  }
  0xef   :  { %8497 = vmatprep.mubr.msk.bf16.mxu0 %vm574_vm2, %v11884_v48  ;;  %3468 = vmatpush1.bf16.msra.mxu0 %v10494_v57  ;;  %v10520_v48 = vld [vmem:[%s15488_s2 + $0x58c] ss:$12 sps:$4 sm:$0xff]  }
  0xf0   :  { %v12053_v31 = vpop.f32.mrf.mxu0  ;;  %v12055_v33 = vpop.f32.mrf.mxu1  ;;  %3469 = vmatprep.subr.bf16.mxu0 %v10502_v24  ;;  %v10565_v57 = vld [vmem:[%s15488_s2 + $0x4cc] ss:$12 sps:$4 sm:$0xff]  }
  0xf2   :  { %v12063_v36 = vpop.f32.mrf.mxu0  ;;  %v12065_v37 = vpop.f32.mrf.mxu1 }
  0xf3   :  { %3470 = vmatpush1.bf16.msra.mxu0 %v10500_v15 }
  0xf4   :  { %v12073_v40 = vpop.f32.mrf.mxu0  ;;  %v12075_v44 = vpop.f32.mrf.mxu1  ;;  %3471 = vmatprep.subr.bf16.mxu0 %v10508_v35  ;;  %v10571_v35 = vld [vmem:[%s15488_s2 + $0x4b4] ss:$12 sps:$4 sm:$0xff]  }
  0xf6   :  { %v12083_v49 = vpop.f32.mrf.mxu0  ;;  %v12085_v42 = vpop.f32.mrf.mxu1  ;;  %2067 = vmatmul.mubr.bf16.gmra.mxu0 %v11899_v56  ;;  %v10518_v56 = vld [vmem:[%s15488_s2 + $0x588] ss:$12 sps:$4 sm:$0xff]  }
  0xf7   :  { %8498 = vmatprep.mubr.msk.bf16.mxu0 %vm574_vm2, %v11906_v59  ;;  %3472 = vmatpush1.bf16.msra.mxu0 %v10506_v38  ;;  %v10569_v38 = vld [vmem:[%s15488_s2 + $0x4b0] ss:$12 sps:$4 sm:$0xff]  }
  0xf8   :  { %v12096_v52 = vpop.f32.mrf.mxu0  ;;  %v12098_v53 = vpop.f32.mrf.mxu1  ;;  %3473 = vmatprep.subr.bf16.mxu0 %v10514_v45 }
  0xfa   :  { %v12106_v63 = vpop.f32.mrf.mxu0  ;;  %v12108_v55 = vpop.f32.mrf.mxu1 }
  0xfb   :  { %3474 = vmatpush1.bf16.msra.mxu0 %v10512_v43 }
  0xfc   :  { %v12116_v59 = vpop.f32.mrf.mxu0  ;;  %v12118_v17 = vpop.f32.mrf.mxu1  ;;  %3475 = vmatprep.subr.bf16.mxu0 %v10520_v48  ;;  %v10577_v48 = vld [vmem:[%s15488_s2 + $0x49c] ss:$12 sps:$4 sm:$0xff]  }
  0xfe   :  { %v12126_v62 = vpop.f32.mrf.mxu0  ;;  %v12128_v41 = vpop.f32.mrf.mxu1  ;;  %2075 = vmatmul.mubr.bf16.gmra.mxu0 %v11921_v61  ;;  %v10532_v61 = vld [vmem:[%s15488_s2 + $0x55c] ss:$12 sps:$4 sm:$0xff]  }
  0xff   :  { %8499 = vmatprep.mubr.msk.bf16.mxu0 %vm574_vm2, %v11928_v0  ;;  %3476 = vmatpush1.bf16.msra.mxu0 %v10518_v56  ;;  %v10551_v0 = vld [vmem:[%s15488_s2 + $0x4f8] ss:$12 sps:$4 sm:$0xff]  }
 0x100   :  { %v12139_v7 = vpop.f32.mrf.mxu0  ;;  %v12141_v5 = vpop.f32.mrf.mxu1  ;;  %3477 = vmatprep.subr.bf16.mxu0 %v10526_v23  ;;  %3405 = vmatpush2.bf16.msra.mxu1 %v10551_v0 }
 0x101   :  { %3406 = vmatprep.subr.bf16.mxu1 %v10559_v14 }
 0x102   :  { %v12152_v11 = vpop.f32.mrf.mxu0  ;;  %v12154_v26 = vpop.f32.mrf.mxu1 }
 0x103   :  { %3478 = vmatpush1.bf16.msra.mxu0 %v10524_v47  ;;  %v10583_v47 = vld [vmem:[%s15488_s2 + $0x484] ss:$12 sps:$4 sm:$0xff]  }
 0x104   :  { %v12156_v8 = vpop.f32.mrf.mxu0  ;;  %v12158_v13 = vpop.f32.mrf.mxu1  ;;  %3479 = vmatprep.subr.bf16.mxu0 %v10532_v61  ;;  %3407 = vmatpush2.bf16.msra.mxu1 %v10557_v32  ;;  %v10581_v61 = vld [vmem:[%s15488_s2 + $0x480] ss:$12 sps:$4 sm:$0xff]   ;;  %v10566_v32 = vld [vmem:[%s15488_s2 + $0x648] ss:$12 sps:$4 sm:$0xff]  }
 0x105   :  { %3408 = vmatprep.subr.bf16.mxu1 %v10565_v57 }
 0x106   :  { %v12172_v18 = vpop.f32.mrf.mxu0  ;;  %v12174_v19 = vpop.f32.mrf.mxu1  ;;  %2083 = vmatmul.mubr.bf16.gmra.mxu0 %v11945_v2  ;;  %v10542_v2 = vld [vmem:[%s15488_s2 + $0x6a8] ss:$12 sps:$4 sm:$0xff]  }
 0x107   :  { %8500 = vmatprep.mubr.msk.bf16.mxu0 %vm574_vm2, %v11953_v3  ;;  %3480 = vmatpush1.bf16.msra.mxu0 %v10530_v9  ;;  %v10563_v3 = vld [vmem:[%s15488_s2 + $0x4c8] ss:$12 sps:$4 sm:$0xff]  }
 0x108   :  { %v12179_v50 = vpop.f32.mrf.mxu0  ;;  %v12181_v20 = vpop.f32.mrf.mxu1  ;;  %3481 = vmatprep.subr.bf16.mxu0 %v10538_v25  ;;  %3409 = vmatpush2.bf16.msra.mxu1 %v10563_v3  ;;  %v10568_v25 = vld [vmem:[%s15488_s2 + $0x64c] ss:$12 sps:$4 sm:$0xff]  }
 0x109   :  { %3410 = vmatprep.subr.bf16.mxu1 %v10571_v35 }
 0x10a   :  { %v12195_v22 = vpop.f32.mrf.mxu0  ;;  %v12197_v24 = vpop.f32.mrf.mxu1 }
 0x10b   :  { %3482 = vmatpush1.bf16.msra.mxu0 %v10536_v16 }
 0x10c   :  { %v12199_v10 = vpop.f32.mrf.mxu0  ;;  %v12201_v15 = vpop.f32.mrf.mxu1  ;;  %3483 = vmatprep.subr.bf16.mxu0 %v10544_v21  ;;  %3411 = vmatpush2.bf16.msra.mxu1 %v10569_v38  ;;  %v10580_v38 = vld [vmem:[%s15488_s2 + $0x61c] ss:$12 sps:$4 sm:$0xff]  }
 0x10d   :  { %3412 = vmatprep.subr.bf16.mxu1 %v10577_v48 }
 0x10e   :  { %v12215_v39 = vpop.f32.mrf.mxu0  ;;  %v12217_v45 = vpop.f32.mrf.mxu1  ;;  %2091 = vmatmul.mubr.bf16.gmra.mxu0 %v11979_v12  ;;  %v10554_v12 = vld [vmem:[%s15488_s2 + $0x678] ss:$12 sps:$4 sm:$0xff]  }
 0x10f   :  { %8501 = vmatprep.mubr.msk.bf16.mxu0 %vm574_vm2, %v11942_v1  ;;  %3484 = vmatpush2.bf16.msra.mxu0 %v10542_v2  ;;  %v10575_v1 = vld [vmem:[%s15488_s2 + $0x498] ss:$12 sps:$4 sm:$0xff]  }
 0x110   :  { %v12222_v46 = vpop.f32.mrf.mxu0  ;;  %v12224_v43 = vpop.f32.mrf.mxu1  ;;  %3485 = vmatprep.subr.bf16.mxu0 %v10550_v30  ;;  %3413 = vmatpush2.bf16.msra.mxu1 %v10575_v1  ;;  %v10572_v30 = vld [vmem:[%s15488_s2 + $0x630] ss:$12 sps:$4 sm:$0xff]  }
 0x111   :  { %3414 = vmatprep.subr.bf16.mxu1 %v10583_v47 }
 0x112   :  { %v12238_v54 = vpop.f32.mrf.mxu0  ;;  %v12240_v56 = vpop.f32.mrf.mxu1 }
 0x113   :  { %15524 = vst [vmem:[#allocation2_spill] sm:$0xff] %v12240_v56  ;;  %3486 = vmatpush2.bf16.msra.mxu0 %v10548_v34 }
 0x114   :  { %v12242_v58 = vpop.f32.mrf.mxu0  ;;  %v12244_v23 = vpop.f32.mrf.mxu1  ;;  %3487 = vmatprep.subr.bf16.mxu0 %v10556_v51  ;;  %3415 = vmatpush2.bf16.msra.mxu1 %v10581_v61 }
 0x115   :  { %15525 = vst [vmem:[#allocation3_spill] sm:$0xff] %v12244_v23 }
 0x116   :  { %v12258_v0 = vpop.f32.mrf.mxu0  ;;  %v12260_v9 = vpop.f32.mrf.mxu1  ;;  %2099 = vmatmul.mubr.bf16.gmra.mxu0 %v11966_v6  ;;  %v10574_v6 = vld [vmem:[%s15488_s2 + $0x634] ss:$12 sps:$4 sm:$0xff]  }
 0x117   :  { %15526 = vst [vmem:[#allocation4_spill] sm:$0xff] %v12260_v9  ;;  %3488 = vmatpush2.bf16.msra.mxu0 %v10554_v12 }
 0x118   :  { %v12266_v14 = vpop.f32.mrf.mxu0  ;;  %v12268_v16 = vpop.f32.mrf.mxu1  ;;  %3489 = vmatprep.subr.bf16.mxu0 %v10562_v60  ;;  %v10578_v60 = vld [vmem:[%s15488_s2 + $0x618] ss:$12 sps:$4 sm:$0xff]  }
 0x119   :  { %15527 = vst [vmem:[#allocation5_spill] sm:$0xff] %v12268_v16 }
 0x11a   :  { %v697_v21 = vpop.f32.mrf.mxu0  ;;  %v788_v57 = vpop.f32.mrf.mxu1 }
 0x11b   :  { %3490 = vmatpush2.bf16.msra.mxu0 %v10560_v4  ;;  %v10584_v21 = vld [vmem:[%s15488_s2 + $0x600] ss:$12 sps:$4 sm:$0xff]  }
 0x11c   :  { %v698_v2 = vpop.f32.mrf.mxu0  ;;  %v789_v3 = vpop.f32.mrf.mxu1  ;;  %3491 = vmatprep.subr.bf16.mxu0 %v10568_v25 }
 0x11e   :  { %v12279_v35 = vpop.f32.mrf.mxu0  ;;  %v1205_v34 = vpop.f32.mrf.mxu1 }
 0x11f   :  { %v12285_v51 = vadd.f32 %v1205_v34, %v12040_v27  ;;  %3492 = vmatpush2.bf16.msra.mxu0 %v10566_v32  ;;  %v10589_v32 = vld [vmem:[%s15488_s2 + $0x76c] ss:$12 sps:$4 sm:$0xff]  }
 0x120   :  { %v827_v48 = vpop.f32.mrf.mxu0  ;;  %v1207_v12 = vpop.f32.mrf.mxu1  ;;  %3493 = vmatprep.subr.bf16.mxu0 %v10574_v6  ;;  %3550 = vmatprep.subr.bf16.mxu1 %v10589_v32  ;;  %v10590_v6 = vld [vmem:[%s15488_s2 + $0x6b0] ss:$12 sps:$4 sm:$0xff]  }
 0x121   :  { %v12288_v1 = vadd.f32 %v1207_v12, %v12053_v31  ;;  %v10586_v31 = vld [vmem:[%s15488_s2 + $0x604] ss:$12 sps:$4 sm:$0xff]  }
 0x122   :  { %v12293_v47 = vpop.f32.mrf.mxu0  ;;  %v1209_v4 = vpop.f32.mrf.mxu1 }
 0x123   :  { %v12296_v61 = vadd.f32 %v1209_v4, %v12063_v36  ;;  %3494 = vmatpush2.bf16.msra.mxu0 %v10572_v30 }
 0x124   :  { %v830_v27 = vpop.f32.mrf.mxu0  ;;  %v12298_v25 = vpop.f32.mrf.mxu1  ;;  %3495 = vmatprep.subr.bf16.mxu0 %v10580_v38 }
 0x126   :  { %v12309_v57 = vpop.f32.mrf.mxu0  ;;  %v1215_v36 = vpop.f32.mrf.mxu1 }
 0x127   :  { %v12315_v2 = vadd.f32 %v1215_v36, %v12083_v49  ;;  %3496 = vmatpush2.bf16.msra.mxu0 %v10578_v60 }
 0x128   :  { %v835_v3 = vpop.f32.mrf.mxu0  ;;  %v1217_v30 = vpop.f32.mrf.mxu1  ;;  %3497 = vmatprep.subr.bf16.mxu0 %v10586_v31 }
 0x129   :  { %15528 = vst [vmem:[#allocation6_spill] sm:$0xff] %v12315_v2  ;;  %v12318_v34 = vadd.f32 %v1217_v30, %v12096_v52 }
 0x12a   :  { %v12320_v38 = vpop.f32.mrf.mxu0  ;;  %v1219_v48 = vpop.f32.mrf.mxu1 }
 0x12b   :  { %15529 = vst [vmem:[#allocation7_spill] sm:$0xff] %v12318_v34  ;;  %v12323_v12 = vadd.f32 %v1219_v48, %v12106_v63  ;;  %3498 = vmatpush2.bf16.msra.mxu0 %v10584_v21 }
 0x12c   :  { %v838_v4 = vpop.f32.mrf.mxu0  ;;  %v12325_v27 = vpop.f32.mrf.mxu1  ;;  %9460 = vmatprep.subr.bf16.mxu0 %v10590_v6 }
 0x12d   :  { %15530 = vst [vmem:[#allocation8_spill] sm:$0xff] %v12323_v12 }
 0x12e   :  { %v12327_v49 = vpop.f32.mrf.mxu0  ;;  %v1225_v60 = vpop.f32.mrf.mxu1 }
 0x12f   :  { %v12330_v32 = vadd.f32 %v1225_v60, %v12126_v62 }
 0x130   :  { %v843_v31 = vpop.f32.mrf.mxu0  ;;  %v1227_v52 = vpop.f32.mrf.mxu1 }
 0x131   :  { %15531 = vst [vmem:[#allocation9_spill] sm:$0xff] %v12330_v32  ;;  %v12333_v36 = vadd.f32 %v1227_v52, %v12139_v7 }
 0x132   :  { %v12335_v3 = vpop.f32.mrf.mxu0  ;;  %v1229_v63 = vpop.f32.mrf.mxu1 }
 0x133   :  { %15532 = vst [vmem:[#allocation10_spill] sm:$0xff] %v12333_v36  ;;  %v12338_v21 = vadd.f32 %v1229_v63, %v12152_v11 }
 0x134   :  { %v846_v30 = vpop.f32.mrf.mxu0  ;;  %v12340_v48 = vpop.f32.mrf.mxu1 }
 0x135   :  { %15533 = vst [vmem:[#allocation11_spill] sm:$0xff] %v12338_v21 }
 0x136   :  { %v12342_v6 = vpop.f32.mrf.mxu0  ;;  %v1235_v4 = vpop.f32.mrf.mxu1 }
 0x137   :  { %v12345_v62 = vadd.f32 %v1235_v4, %v12172_v18 }
 0x138   :  { %v851_v60 = vpop.f32.mrf.mxu0  ;;  %v1237_v31 = vpop.f32.mrf.mxu1 }
 0x139   :  { %15534 = vst [vmem:[#allocation12_spill] sm:$0xff] %v12345_v62  ;;  %v12348_v7 = vadd.f32 %v1237_v31, %v12179_v50 }
 0x13a   :  { %v12350_v52 = vpop.f32.mrf.mxu0  ;;  %v1239_v28 = vpop.f32.mrf.mxu1 }
 0x13b   :  { %15535 = vst [vmem:[#allocation13_spill] sm:$0xff] %v12348_v7  ;;  %v12353_v11 = vadd.f32 %v1239_v28, %v12195_v22 }
 0x13c   :  { %v854_v63 = vpop.f32.mrf.mxu0  ;;  %v12355_v30 = vpop.f32.mrf.mxu1 }
 0x13d   :  { %15536 = vst [vmem:[#allocation14_spill] sm:$0xff] %v12353_v11 }
 0x13e   :  { %v12357_v16 = vpop.f32.mrf.mxu0  ;;  %v1245_v21 = vpop.f32.mrf.mxu1 }
 0x13f   :  { %v12360_v18 = vadd.f32 %v1245_v21, %v12215_v39 }
 0x140   :  { %v859_v4 = vpop.f32.mrf.mxu0  ;;  %v1247_v60 = vpop.f32.mrf.mxu1 }
 0x141   :  { %15537 = vst [vmem:[#allocation15_spill] sm:$0xff] %v12360_v18  ;;  %v12363_v50 = vadd.f32 %v1247_v60, %v12222_v46 }
 0x142   :  { %v12365_v31 = vpop.f32.mrf.mxu0  ;;  %v1249_v7 = vpop.f32.mrf.mxu1 }
 0x143   :  { %15538 = vst [vmem:[#allocation16_spill] sm:$0xff] %v12363_v50  ;;  %v12368_v28 = vadd.f32 %v1249_v7, %v12238_v54 }
 0x144   :  { %v862_v22 = vpop.f32.mrf.mxu0  ;;  %v12370_v63 = vpop.f32.mrf.mxu1 }
 0x145   :  { %15539 = vst [vmem:[#allocation17_spill] sm:$0xff] %v12368_v28 }
 0x146   :  { %v12372_v11 = vpop.f32.mrf.mxu0  ;;  %v1255_v62 = vpop.f32.mrf.mxu1 }
 0x147   :  { %v12375_v39 = vadd.f32 %v1255_v62, %v12258_v0 }
 0x148   :  { %v867_v21 = vpop.f32.mrf.mxu0  ;;  %v1257_v4 = vpop.f32.mrf.mxu1 }
 0x149   :  { %15540 = vst [vmem:[#allocation18_spill] sm:$0xff] %v12375_v39  ;;  %v12378_v46 = vadd.f32 %v1257_v4, %v12266_v14 }
 0x14a   :  { %v868_v60 = vpop.f32.mrf.mxu0  ;;  %v1259_v50 = vpop.f32.mrf.mxu1 }
 0x14b   :  { %15541 = vst [vmem:[#allocation19_spill] sm:$0xff] %v12378_v46 }
 0x14c   :  { %v869_v18 = vpop.f32.mrf.mxu0  ;;  %v1260_v36 = vpop.f32.mrf.mxu1 }
 0x14e   :  { %v12380_v54 = vpop.f32.mrf.mxu0  ;;  %v1387_v7 = vpop.f32.mrf.mxu1 }
 0x14f   :  { %v12383_v22 = vadd.f32 %v1387_v7, %v12279_v35 }
 0x150   :  { %v12385_v28 = vpop.f32.mrf.mxu0  ;;  %v1389_v32 = vpop.f32.mrf.mxu1 }
 0x151   :  { %15542 = vst [vmem:[#allocation20_spill] sm:$0xff] %v12383_v22 }
 0x152   :  { %v12387_v0 = vpop.f32.mrf.mxu0  ;;  %v1390_v62 = vpop.f32.mrf.mxu1 }
 0x153   :  { %v12390_v21 = vadd.f32 %v1390_v62, %v12293_v47 }
 0x154   :  { %v12392_v14 = vpop.f32.mrf.mxu0  ;;  %v1392_v50 = vpop.f32.mrf.mxu1 }
 0x155   :  { %15543 = vst [vmem:[#allocation21_spill] sm:$0xff] %v12390_v21 }
 0x156   :  { %v12394_v18 = vpop.f32.mrf.mxu0  ;;  %v1395_v36 = vpop.f32.mrf.mxu1 }
 0x157   :  { %v12397_v4 = vadd.f32 %v1395_v36, %v12309_v57 }
 0x158   :  { %v12399_v35 = vpop.f32.mrf.mxu0  ;;  %v1397_v60 = vpop.f32.mrf.mxu1 }
 0x159   :  { %15544 = vst [vmem:[#allocation22_spill] sm:$0xff] %v12397_v4 }
 0x15a   :  { %v12401_v7 = vpop.f32.mrf.mxu0  ;;  %v1398_v32 = vpop.f32.mrf.mxu1 }
 0x15b   :  { %v12404_v22 = vadd.f32 %v1398_v32, %v12320_v38 }
 0x15c   :  { %v12406_v47 = vpop.f32.mrf.mxu0  ;;  %v1400_v62 = vpop.f32.mrf.mxu1 }
 0x15d   :  { %15545 = vst [vmem:[#allocation23_spill] sm:$0xff] %v12404_v22 }
 0x15e   :  { %v12408_v21 = vpop.f32.mrf.mxu0  ;;  %v1403_v50 = vpop.f32.mrf.mxu1 }
 0x15f   :  { %v12411_v46 = vadd.f32 %v1403_v50, %v12327_v49 }
 0x160   :  { %v12413_v57 = vpop.f32.mrf.mxu0  ;;  %v1405_v36 = vpop.f32.mrf.mxu1 }
 0x161   :  { %15546 = vst [vmem:[#allocation24_spill] sm:$0xff] %v12411_v46 }
 0x162   :  { %v12415_v4 = vpop.f32.mrf.mxu0  ;;  %v1406_v60 = vpop.f32.mrf.mxu1 }
 0x163   :  { %v12418_v39 = vadd.f32 %v1406_v60, %v12335_v3 }
 0x164   :  { %v12420_v38 = vpop.f32.mrf.mxu0  ;;  %v1408_v32 = vpop.f32.mrf.mxu1 }
 0x165   :  { %15547 = vst [vmem:[#allocation25_spill] sm:$0xff] %v12418_v39 }
 0x166   :  { %v12422_v22 = vpop.f32.mrf.mxu0  ;;  %v1411_v62 = vpop.f32.mrf.mxu1 }
 0x167   :  { %v12425_v12 = vadd.f32 %v1411_v62, %v12342_v6  ;;  %v2163_v6 = vlaneseq }
 0x168   :  { %v12427_v49 = vpop.f32.mrf.mxu0  ;;  %v1413_v50 = vpop.f32.mrf.mxu1 }
 0x169   :  { %15548 = vst [vmem:[#allocation26_spill] sm:$0xff] %v12425_v12 }
 0x16a   :  { %v12429_v46 = vpop.f32.mrf.mxu0  ;;  %v1414_v36 = vpop.f32.mrf.mxu1 }
 0x16b   :  { %v12432_v9 = vadd.f32 %v1414_v36, %v12350_v52  ;;  %v12448_v52 = vshrl.u32 %v2163_v6, 7 }
 0x16c   :  { %v12434_v3 = vpop.f32.mrf.mxu0  ;;  %v1416_v60 = vpop.f32.mrf.mxu1 }
 0x16d   :  { %15549 = vst [vmem:[#allocation27_spill] sm:$0xff] %v12432_v9  ;;  %15552 = vst [vmem:[#allocation30_spill] sm:$0xff] %v12448_v52 }
 0x16e   :  { %v12436_v39 = vpop.f32.mrf.mxu0  ;;  %v1419_v32 = vpop.f32.mrf.mxu1 }
 0x16f   :  { %v12439_v34 = vadd.f32 %v1419_v32, %v12357_v16  ;;  %v15502_v32 = vsub.s32 0, %v12448_v52 }
 0x170   :  { %v12441_v62 = vpop.f32.mrf.mxu0  ;;  %v1421_v12 = vpop.f32.mrf.mxu1 }
 0x171   :  { %15550 = vst [vmem:[#allocation28_spill] sm:$0xff] %v12439_v34  ;;  %v12460_v12 = vld [vmem:[%s15489_s4] sm:$0x1f] }
 0x172   :  { %v12443_v50 = vpop.f32.mrf.mxu0  ;;  %v1422_v23 = vpop.f32.mrf.mxu1 }
 0x173   :  { %v12446_v56 = vadd.f32 %v1422_v23, %v12365_v31  ;;  %v15500_v23 = vsub.s32 2, %v12448_v52 }
 0x174   :  { %v12450_v36 = vpop.f32.mrf.mxu0  ;;  %v1424_v60 = vpop.f32.mrf.mxu1 }
 0x175   :  { %15551 = vst [vmem:[#allocation29_spill] sm:$0xff] %v12446_v56  ;;  %15553 = vst [vmem:[#allocation31_spill] sm:$0xff] %v12450_v36  ;;  %v15501_v60 = vsub.s32 1, %v12448_v52  ;;  %v2177_v56 = vsub.s32 3, %v12448_v52  ;;  %v12476_v36 = vrot.slane %v12460_v12, %v15500_v23  ;;  %v1297_v23 = vadd.f32 %v12380_v54, %v12042_v29 }
 0x176   :  { %v12452_v9 = vpop.f32.mrf.mxu0  ;;  %v1427_v2 = vpop.f32.mrf.mxu1  ;;  %v1307_v29 = vadd.f32 %v12394_v18, %v12085_v42  ;;  %v12529_v42 = vadd.f32 %v12413_v57, %v12141_v5 }
 0x177   :  { %15554 = vst [vmem:[#allocation32_spill] sm:$0xff] %v12452_v9  ;;  %v12455_v16 = vadd.f32 %v1427_v2, %v12372_v11 }
 0x178   :  { %v12464_v31 = vpop.f32.mrf.mxu0  ;;  %v1429_v6 = vpop.f32.mrf.mxu1 }
 0x179   :  { %15555 = vst [vmem:[#allocation33_spill] sm:$0xff] %v12455_v16  ;;  %v12471_v16 = vrot.slane %v12460_v12, %v15502_v32  ;;  %v12481_v6 = vrot.slane %v12460_v12, %v15501_v60  ;;  %v12500_v60 = vadd.f32 %v12355_v30, %v12199_v10  ;;  %v12525_v30 = vadd.f32 %v12408_v21, %v12128_v41 }
 0x17a   :  { %v1350_v34 = vpop.f32.mrf.mxu0  ;;  %v1430_v9 = vpop.f32.mrf.mxu1  ;;  %v12543_v41 = vadd.f32 %v12422_v22, %v12174_v19  ;;  %v12561_v19 = vadd.f32 %v12436_v39, %v12217_v45 }
 0x17b   :  { %v12484_v34 = vrot.slane %v12460_v12, %v2177_v56  ;;  %v1212_v9 = vadd.f32 %v12298_v25, %v12073_v40  ;;  %v12504_v56 = vadd.f32 %v12370_v63, %v12242_v58  ;;  %v1299_v40 = vadd.f32 %v12385_v28, %v12055_v33 }
 0x17c   :  { %v1351_v2 = vpop.f32.mrf.mxu0  ;;  %v1431_v11 = vpop.f32.mrf.mxu1  ;;  %v1309_v58 = vadd.f32 %v12399_v35, %v12098_v53  ;;  %v1311_v33 = vadd.f32 %v12401_v7, %v12108_v55  ;;  %v12535_v55 = vadd.f32 %v12415_v4, %v12154_v26  ;;  %v12552_v26 = vadd.f32 %v12429_v46, %v12197_v24 }
 0x17d   :  { %v12490_v2 = vadd.f32 %v12325_v27, %v12116_v59  ;;  %v12494_v11 = vadd.f32 %v12340_v48, %v12156_v8  ;;  %v1301_v59 = vadd.f32 %v12387_v0, %v12065_v37  ;;  %v1303_v27 = vadd.f32 %v12392_v14, %v12075_v44 }
 0x17e   :  { %v1878_v25 = vpop.f32.mrf.mxu0  ;;  %v1969_v8 = vpop.f32.mrf.mxu1  ;;  %v12521_v37 = vadd.f32 %v12406_v47, %v12118_v17  ;;  %v12539_v17 = vadd.f32 %v12420_v38, %v12158_v13  ;;  %v12556_v13 = vadd.f32 %v12434_v3, %v12201_v15  ;;  %v12567_v24 = vadd.f32 %v12441_v62, %v12224_v43  ;;  %v15556_v3 = vld [vmem:[#allocation6_spill] sm:$0xff] }
 0x17f   :  { %v2106_v10 = vadd.f32 %v1878_v25, %v12285_v51  ;;  %v2108_v48 = vadd.f32 %v1969_v8, %v1297_v23  ;;  %v15557_v43 = vld [vmem:[#allocation2_spill] sm:$0xff] }
 0x180   :  { %v1880_v44 = vpop.f32.mrf.mxu0  ;;  %v1971_v28 = vpop.f32.mrf.mxu1  ;;  %v12576_v62 = vadd.f32 %v12443_v50, %v15557_v43 }
 0x181   :  { %v2188_v51 = vadd.f32 %v12471_v16, %v2106_v10  ;;  %v2107_v53 = vadd.f32 %v1880_v44, %v12288_v1  ;;  %v2109_v63 = vadd.f32 %v1971_v28, %v1299_v40  ;;  %v2190_v5 = vadd.f32 %v12476_v36, %v2108_v48 }
 0x182   :  { %v1882_v54 = vpop.f32.mrf.mxu0  ;;  %v1973_v0 = vpop.f32.mrf.mxu1  ;;  %v12548_v1 = vadd.f32 %v12427_v49, %v12181_v20 }
 0x183   :  { %v2189_v21 = vadd.f32 %v12481_v6, %v2107_v53  ;;  %v2191_v22 = vadd.f32 %v12484_v34, %v2109_v63  ;;  %v2111_v14 = vadd.f32 %v1882_v54, %v12296_v61  ;;  %v2113_v20 = vadd.f32 %v1973_v0, %v1301_v59  ;;  %v15559_v53 = vld [vmem:[#allocation31_spill] sm:$0xff] }
 0x184   :  { %v1884_v18 = vpop.f32.mrf.mxu0  ;;  %v1975_v4 = vpop.f32.mrf.mxu1  ;;  %v2243_v46 = vmax.f32 %v2188_v51, 0.0  ;;  %v2245_v7 = vmax.f32 %v2190_v5, 0.0  ;;  %v15558_v51 = vld [vmem:[#allocation3_spill] sm:$0xff] }
 0x185   :  { %v2112_v15 = vadd.f32 %v1884_v18, %v1212_v9  ;;  %v2114_v35 = vadd.f32 %v1975_v4, %v1303_v27  ;;  %v2244_v47 = vmax.f32 %v2189_v21, 0.0  ;;  %v2193_v57 = vadd.f32 %v12471_v16, %v2111_v14  ;;  %v15560_v5 = vld [vmem:[#allocation7_spill] sm:$0xff]  ;;  %v15562_v14 = vld [vmem:[#allocation32_spill] sm:$0xff] }
 0x186   :  { %v2195_v45 = vadd.f32 %v12476_v36, %v2113_v20  ;;  %v1888_v39 = vpop.f32.mrf.mxu0  ;;  %v1979_v38 = vpop.f32.mrf.mxu1  ;;  %v2246_v9 = vmax.f32 %v2191_v22, 0.0  ;;  %v12582_v63 = vadd.f32 %v15559_v53, %v15558_v51  ;;  %v15561_v22 = vld [vmem:[#allocation4_spill] sm:$0xff] }
 0x187   :  { %v2194_v61 = vadd.f32 %v12481_v6, %v2112_v15  ;;  %v2196_v49 = vadd.f32 %v12484_v34, %v2114_v35  ;;  %v2116_v23 = vadd.f32 %v1888_v39, %v15556_v3  ;;  %v2118_v40 = vadd.f32 %v1979_v38, %v1307_v29 }
 0x188   :  { %v2248_v59 = vmax.f32 %v2193_v57, 0.0  ;;  %v2250_v25 = vmax.f32 %v2195_v45, 0.0  ;;  %v1890_v8 = vpop.f32.mrf.mxu0  ;;  %v1981_v27 = vpop.f32.mrf.mxu1  ;;  %v12589_v20 = vadd.f32 %v15562_v14, %v15561_v22  ;;  %v15563_v57 = vld [vmem:[#allocation8_spill] sm:$0xff] }
 0x189   :  { %v2249_v10 = vmax.f32 %v2194_v61, 0.0  ;;  %v2251_v48 = vmax.f32 %v2196_v49, 0.0  ;;  %v2198_v44 = vadd.f32 %v12471_v16, %v2116_v23  ;;  %v2200_v28 = vadd.f32 %v12476_v36, %v2118_v40 }
 0x18a   :  { %v12584_v29 = vpack.c.bf16 %v2248_v59, %v2243_v46  ;;  %v2117_v50 = vadd.f32 %v1890_v8, %v15560_v5  ;;  %v2119_v54 = vadd.f32 %v1981_v27, %v1309_v58  ;;  %v1892_v0 = vpop.f32.mrf.mxu0  ;;  %v1983_v21 = vpop.f32.mrf.mxu1  ;;  %v12591_v18 = vpack.c.bf16 %v2250_v25, %v2245_v7  ;;  %v15564_v8 = vld [vmem:[#allocation9_spill] sm:$0xff] }
 0x18b   :  { %v12593_v4 = vpack.c.bf16 %v2249_v10, %v2244_v47  ;;  %v12595_v15 = vpack.c.bf16 %v2251_v48, %v2246_v9  ;;  %v2121_v45 = vadd.f32 %v1892_v0, %v15563_v57  ;;  %v2123_v39 = vadd.f32 %v1983_v21, %v1311_v33  ;;  %v15565_v21 = vld [vmem:[#allocation10_spill] sm:$0xff] }
 0x18c   :  { %v2199_v35 = vadd.f32 %v12481_v6, %v2117_v50  ;;  %v2201_v46 = vadd.f32 %v12484_v34, %v2119_v54  ;;  %v1894_v58 = vpop.f32.mrf.mxu0  ;;  %v1985_v38 = vpop.f32.mrf.mxu1  ;;  %v2253_v61 = vmax.f32 %v2198_v44, 0.0  ;;  %v2255_v49 = vmax.f32 %v2200_v28, 0.0 }
 0x18d   :  { %v2122_v3 = vadd.f32 %v1894_v58, %v12490_v2  ;;  %v2124_v7 = vadd.f32 %v1985_v38, %v12521_v37  ;;  %v2203_v47 = vadd.f32 %v12471_v16, %v2121_v45  ;;  %v2205_v23 = vadd.f32 %v12476_v36, %v2123_v39 }
 0x18e   :  { %v1898_v40 = vpop.f32.mrf.mxu0  ;;  %v1989_v43 = vpop.f32.mrf.mxu1  ;;  %v2677_v9 = vrot.slane %v12593_v4, 1  ;;  %v2683_v59 = vrot.slane %v12595_v15, 1  ;;  %v2254_v10 = vmax.f32 %v2199_v35, 0.0  ;;  %v2256_v37 = vmax.f32 %v2201_v46, 0.0 }
 0x18f   :  { %v2204_v33 = vadd.f32 %v12481_v6, %v2122_v3  ;;  %v2206_v25 = vadd.f32 %v12484_v34, %v2124_v7  ;;  %v2126_v27 = vadd.f32 %v1898_v40, %v15564_v8  ;;  %v2128_v2 = vadd.f32 %v1989_v43, %v12525_v30 }
 0x190   :  { %v2258_v48 = vmax.f32 %v2203_v47, 0.0  ;;  %v2260_v44 = vmax.f32 %v2205_v23, 0.0  ;;  %v1900_v28 = vpop.f32.mrf.mxu0  ;;  %v1991_v51 = vpop.f32.mrf.mxu1  ;;  %v2674_v35 = vrot.slane %v12584_v29, 1 }
 0x191   :  { %v2259_v53 = vmax.f32 %v2204_v33, 0.0  ;;  %v2261_v5 = vmax.f32 %v2206_v25, 0.0  ;;  %v2208_v50 = vadd.f32 %v12471_v16, %v2126_v27  ;;  %v2210_v54 = vadd.f32 %v12476_v36, %v2128_v2 }
 0x192   :  { %v12612_v0 = vpack.c.bf16 %v2258_v48, %v2253_v61  ;;  %v2127_v22 = vadd.f32 %v1900_v28, %v15565_v21  ;;  %v2129_v14 = vadd.f32 %v1991_v51, %v12529_v42  ;;  %v1902_v57 = vpop.f32.mrf.mxu0  ;;  %v1993_v30 = vpop.f32.mrf.mxu1  ;;  %v12617_v46 = vpack.c.bf16 %v2260_v44, %v2255_v49  ;;  %v15566_v61 = vld [vmem:[#allocation11_spill] sm:$0xff]  ;;  %v15568_v21 = vld [vmem:[#allocation5_spill] sm:$0xff] }
 0x193   :  { %v12619_v45 = vpack.c.bf16 %v2259_v53, %v2254_v10  ;;  %v12621_v39 = vpack.c.bf16 %v2261_v5, %v2256_v37  ;;  %v2263_v58 = vmax.f32 %v2208_v50, 0.0  ;;  %v2265_v38 = vmax.f32 %v2210_v54, 0.0 }
 0x194   :  { %v2209_v3 = vadd.f32 %v12481_v6, %v2127_v22  ;;  %v2131_v7 = vadd.f32 %v1902_v57, %v15566_v61  ;;  %v2133_v47 = vadd.f32 %v1993_v30, %v12535_v55  ;;  %v1904_v23 = vpop.f32.mrf.mxu0  ;;  %v1995_v42 = vpop.f32.mrf.mxu1  ;;  %v2211_v8 = vadd.f32 %v12484_v34, %v2129_v14 }
 0x195   :  { %v2132_v40 = vadd.f32 %v1904_v23, %v12494_v11  ;;  %v2134_v43 = vadd.f32 %v1995_v42, %v12539_v17  ;;  %v2678_v49 = vrot.slane %v12619_v45, 1  ;;  %v15505_v33 = vrot.slane %v12621_v39, 1  ;;  %v15567_v11 = vld [vmem:[#allocation12_spill] sm:$0xff] }
 0x196   :  { %v2264_v25 = vmax.f32 %v2209_v3, 0.0  ;;  %v2213_v27 = vadd.f32 %v12471_v16, %v2131_v7  ;;  %v2215_v2 = vadd.f32 %v12476_v36, %v2133_v47  ;;  %v1908_v10 = vpop.f32.mrf.mxu0  ;;  %v1999_v37 = vpop.f32.mrf.mxu1  ;;  %v12649_v22 = vadd.f32 %v12464_v31, %v15568_v21  ;;  %v15569_v3 = vld [vmem:[#allocation13_spill] sm:$0xff] }
 0x197   :  { %v2214_v55 = vadd.f32 %v12481_v6, %v2132_v40  ;;  %v2216_v48 = vadd.f32 %v12484_v34, %v2134_v43  ;;  %v2136_v44 = vadd.f32 %v1908_v10, %v15567_v11  ;;  %v2138_v17 = vadd.f32 %v1999_v37, %v12543_v41  ;;  %v10587_v43 = vld [vmem:[%s15488_s2 + $0x768] ss:$12 sps:$4 sm:$0xff]   ;;  %v15570_v37 = vld [vmem:[#allocation14_spill] sm:$0xff] }
 0x198   :  { %v2268_v28 = vmax.f32 %v2213_v27, 0.0  ;;  %v2270_v51 = vmax.f32 %v2215_v2, 0.0  ;;  %v1910_v53 = vpop.f32.mrf.mxu0  ;;  %v2001_v5 = vpop.f32.mrf.mxu1  ;;  %v12640_v50 = vsel %vm1509_vm3, %v2677_v9, %v2678_v49  ;;  %v12645_v54 = vsel %vm1509_vm3, %v2683_v59, %v15505_v33  ;;  %v10594_v10 = vld [vmem:[%s15488_s2 + $0x754] ss:$12 sps:$4 sm:$0xff]   ;;  %v10596_v21 = vld [vmem:[%s15488_s2 + $0x5d8] ss:$12 sps:$4 sm:$0xff]  }
 0x199   :  { %v2269_v14 = vmax.f32 %v2214_v55, 0.0  ;;  %v2271_v41 = vmax.f32 %v2216_v48, 0.0  ;;  %v12652_v57 = vadd.f32 %v12471_v16, %v2136_v44  ;;  %3416 = vmatprep.mubr.bf16.mxu1 %v12640_v50  ;;  %3499 = vmatprep.mubr.bf16.mxu0 %v12645_v54  ;;  %v2266_v9 = vmax.f32 %v2211_v8, 0.0 }
 0x19a   :  { %v12656_v30 = vpack.c.bf16 %v2268_v28, %v2263_v58  ;;  %v2137_v61 = vadd.f32 %v1910_v53, %v15569_v3  ;;  %v2139_v59 = vadd.f32 %v2001_v5, %v12548_v1  ;;  %v1912_v7 = vpop.f32.mrf.mxu0  ;;  %v2003_v47 = vpop.f32.mrf.mxu1  ;;  %v12660_v31 = vpack.c.bf16 %v2270_v51, %v2265_v38  ;;  %v10591_v58 = vld [vmem:[%s15488_s2 + $0x5f0] ss:$12 sps:$4 sm:$0xff]   ;;  %v10600_v3 = vld [vmem:[%s15488_s2 + $0x680] ss:$12 sps:$4 sm:$0xff]  }
 0x19b   :  { %v12662_v23 = vpack.c.bf16 %v2269_v14, %v2264_v25  ;;  %v2220_v42 = vadd.f32 %v12476_v36, %v2138_v17  ;;  %v2680_v40 = vrot.slane %v12591_v18, 1  ;;  %v12672_v8 = vpack.c.bf16 %v2271_v41, %v2266_v9  ;;  %v10595_v17 = vld [vmem:[%s15488_s2 + $0x698] ss:$12 sps:$4 sm:$0xff]   ;;  %v10592_v5 = vld [vmem:[%s15488_s2 + $0x750] ss:$12 sps:$4 sm:$0xff]  }
 0x19c   :  { %v2273_v1 = vmax.f32 %v12652_v57, 0.0  ;;  %v15504_v38 = vrot.slane %v12612_v0, 1  ;;  %v15503_v25 = vrot.slane %v12617_v46, 1  ;;  %v1914_v27 = vpop.f32.mrf.mxu0  ;;  %v2005_v2 = vpop.f32.mrf.mxu1  ;;  %v2141_v55 = vadd.f32 %v1912_v7, %v15570_v37  ;;  %v10599_v9 = vld [vmem:[%s15488_s2 + $0x73c] ss:$12 sps:$4 sm:$0xff]  }
 0x19d   :  { %v2143_v48 = vadd.f32 %v2003_v47, %v12552_v26  ;;  %v2142_v11 = vadd.f32 %v1914_v27, %v12500_v60  ;;  %v2144_v44 = vadd.f32 %v2005_v2, %v12556_v13  ;;  %v2219_v28 = vadd.f32 %v12481_v6, %v2137_v61 }
 0x19e   :  { %v2221_v51 = vadd.f32 %v12484_v34, %v2139_v59  ;;  %v12694_v53 = vsel %vm1509_vm3, %v2674_v35, %v15504_v38  ;;  %v12699_v60 = vsel %vm1509_vm3, %v2680_v40, %v15503_v25  ;;  %v1918_v26 = vpop.f32.mrf.mxu0  ;;  %v2009_v13 = vpop.f32.mrf.mxu1  ;;  %v2223_v35 = vadd.f32 %v12471_v16, %v2141_v55  ;;  %v15571_v59 = vld [vmem:[#allocation15_spill] sm:$0xff] }
 0x19f   :  { %3417 = vmatmul.mubr.bf16.vlgmr.msra.gmra.mxu1 %v12694_v53  ;;  %3500 = vmatmul.mubr.bf16.vlgmr.msra.gmra.mxu0 %v12699_v60  ;;  %v2225_v14 = vadd.f32 %v12476_v36, %v2143_v48  ;;  %v2224_v41 = vadd.f32 %v12481_v6, %v2142_v11  ;;  %v2691_v57 = vrot.slane %v12662_v23, 1  ;;  %v2226_v61 = vadd.f32 %v12484_v34, %v2144_v44  ;;  %v15572_v11 = vld [vmem:[#allocation16_spill] sm:$0xff] }
 0x1a0   :  { %v2146_v7 = vadd.f32 %v1918_v26, %v15571_v59  ;;  %v2148_v47 = vadd.f32 %v2009_v13, %v12561_v19  ;;  %3551 = vmatpush1.bf16.msra.mxu1 %v10587_v43  ;;  %v1920_v40 = vpop.f32.mrf.mxu0  ;;  %v2011_v27 = vpop.f32.mrf.mxu1  ;;  %v2695_v2 = vrot.slane %v12672_v8, 1  ;;  %9461 = vmatpush3.bf16.msra.mxu0 %v10591_v58  ;;  %v2278_v37 = vmax.f32 %v2223_v35, 0.0 }
 0x1a1   :  { %v2280_v55 = vmax.f32 %v2225_v14, 0.0  ;;  %v2279_v48 = vmax.f32 %v2224_v41, 0.0  ;;  %v2147_v32 = vadd.f32 %v1920_v40, %v15572_v11  ;;  %3552 = vmatprep.subr.bf16.mxu1 %v10594_v10  ;;  %9462 = vmatprep.subr.bf16.mxu0 %v10595_v17  ;;  %v2275_v25 = vmax.f32 %v2220_v42, 0.0  ;;  %v10602_v14 = vld [vmem:[%s15488_s2 + $0x668] ss:$12 sps:$4 sm:$0xff]   ;;  %v15576_v11 = vld [vmem:[#allocation18_spill] sm:$0xff] }
 0x1a2   :  { %v2274_v38 = vmax.f32 %v2219_v28, 0.0  ;;  %v2281_v44 = vmax.f32 %v2226_v61, 0.0  ;;  %v2149_v26 = vadd.f32 %v2011_v27, %v12567_v24  ;;  %v1922_v59 = vpop.f32.mrf.mxu0  ;;  %v2013_v19 = vpop.f32.mrf.mxu1  ;;  %v2276_v43 = vmax.f32 %v2221_v51, 0.0  ;;  %v10601_v28 = vld [vmem:[%s15488_s2 + $0x5c0] ss:$12 sps:$4 sm:$0xff]  }
 0x1a3   :  { %v12725_v13 = vpack.c.bf16 %v2278_v37, %v2273_v1  ;;  %v12728_v33 = vadd.f32 %v12471_v16, %v2146_v7  ;;  %v12731_v58 = vadd.f32 %v12476_v36, %v2148_v47  ;;  %v12733_v35 = vpack.c.bf16 %v2280_v55, %v2275_v25  ;;  %v10597_v1 = vld [vmem:[%s15488_s2 + $0x738] ss:$12 sps:$4 sm:$0xff]  }
 0x1a4   :  { %v12735_v10 = vpack.c.bf16 %v2279_v48, %v2274_v38  ;;  %v12738_v42 = vadd.f32 %v12481_v6, %v2147_v32  ;;  %v1924_v17 = vpop.f32.mrf.mxu0  ;;  %v2015_v24 = vpop.f32.mrf.mxu1  ;;  %3553 = vmatpush1.bf16.msra.mxu1 %v10592_v5  ;;  %9463 = vmatpush3.bf16.msra.mxu0 %v10596_v21  ;;  %v2181_v25 = vsub.s32 4, %v12448_v52  ;;  %v12747_v51 = vpack.c.bf16 %v2281_v44, %v2276_v43  ;;  %v15574_v7 = vld [vmem:[#allocation17_spill] sm:$0xff] }
 0x1a5   :  { %v12754_v32 = vsel %vm1509_vm3, %v2678_v49, %v2691_v57  ;;  %v15573_v38 = vrot.slane %v12621_v39, 1  ;;  %v2689_v21 = vrot.slane %v12656_v30, 1  ;;  %3554 = vmatprep.subr.bf16.mxu1 %v10599_v9  ;;  %9464 = vmatprep.subr.bf16.mxu0 %v10600_v3  ;;  %v10605_v49 = vld [vmem:[%s15488_s2 + $0x724] ss:$12 sps:$4 sm:$0xff]   ;;  %v2231_v41 = vadd.f32 %v12484_v34, %v2149_v26 }
 0x1a6   :  { %3426 = vmatprep.mubr.bf16.mxu1 %v12754_v32  ;;  %v2693_v61 = vrot.slane %v12660_v31, 1  ;;  %v2151_v47 = vadd.f32 %v1922_v59, %v15574_v7  ;;  %v2153_v9 = vadd.f32 %v2013_v19, %v12576_v62  ;;  %v1928_v3 = vpop.f32.mrf.mxu0  ;;  %v2019_v40 = vpop.f32.mrf.mxu1  ;;  %v15575_v27 = vrot.slane %v12612_v0, 1 }
 0x1a7   :  { %v12761_v5 = vsel %vm1509_vm3, %v15573_v38, %v2695_v2  ;;  %v2152_v55 = vadd.f32 %v1924_v17, %v12504_v56  ;;  %v2154_v48 = vadd.f32 %v2015_v24, %v12582_v63  ;;  %v2156_v44 = vadd.f32 %v1928_v3, %v15576_v11  ;;  %v10603_v63 = vld [vmem:[%s15488_s2 + $0x720] ss:$12 sps:$4 sm:$0xff]  }
 0x1a8   :  { %3509 = vmatprep.mubr.bf16.mxu0 %v12761_v5  ;;  %v12781_v37 = vsel %vm1509_vm3, %v15575_v27, %v2689_v21  ;;  %v15577_v62 = vrot.slane %v12617_v46, 1  ;;  %v2233_v59 = vadd.f32 %v12471_v16, %v2151_v47  ;;  %v2235_v19 = vadd.f32 %v12476_v36, %v2153_v9  ;;  %v1930_v56 = vpop.f32.mrf.mxu0  ;;  %v2021_v17 = vpop.f32.mrf.mxu1  ;;  %v15578_v47 = vld [vmem:[#allocation19_spill] sm:$0xff]  ;;  %3555 = vmatpush1.bf16.msra.mxu1 %v10597_v1 }
 0x1a9   :  { %3427 = vmatmul.mubr.bf16.gmra.mxu1 %v12781_v37  ;;  %v2158_v43 = vadd.f32 %v2019_v40, %v12589_v20  ;;  %v2234_v24 = vadd.f32 %v12481_v6, %v2152_v55  ;;  %v2236_v38 = vadd.f32 %v12484_v34, %v2154_v48  ;;  %v12804_v7 = vadd.f32 %v12471_v16, %v2156_v44  ;;  %v10606_v55 = vld [vmem:[%s15488_s2 + $0x5a8] ss:$12 sps:$4 sm:$0xff]   ;;  %v10607_v16 = vld [vmem:[%s15488_s2 + $0x650] ss:$12 sps:$4 sm:$0xff]  }
 0x1aa   :  { %v12792_v26 = vsel %vm1509_vm3, %v15577_v62, %v2693_v61  ;;  %v2157_v3 = vadd.f32 %v1930_v56, %v15578_v47  ;;  %v2283_v9 = vmax.f32 %v12728_v33, 0.0  ;;  %v2288_v20 = vmax.f32 %v2233_v59, 0.0  ;;  %9465 = vmatpush3.bf16.msra.mxu0 %v10601_v28  ;;  %v1932_v11 = vpop.f32.mrf.mxu0  ;;  %v2023_v48 = vpop.f32.mrf.mxu1  ;;  %3556 = vmatprep.subr.bf16.mxu1 %v10605_v49 }
 0x1ab   :  { %3510 = vmatmul.mubr.bf16.gmra.mxu0 %v12792_v26  ;;  %v12809_v40 = vadd.f32 %v12476_v36, %v2158_v43  ;;  %v2159_v27 = vadd.f32 %v2021_v17, %v12649_v22  ;;  %v2284_v33 = vmax.f32 %v12738_v42, 0.0  ;;  %v2289_v44 = vmax.f32 %v2234_v24, 0.0  ;;  %9466 = vmatprep.subr.bf16.mxu0 %v10602_v14  ;;  %v10611_v22 = vld [vmem:[%s15488_s2 + $0x70c] ss:$12 sps:$4 sm:$0xff]  }
 0x1ac   :  { %v2291_v62 = vmax.f32 %v2236_v38, 0.0  ;;  %v12820_v36 = vadd.f32 %v12481_v6, %v2157_v3  ;;  %v2286_v1 = vmax.f32 %v2231_v41, 0.0  ;;  %v12825_v28 = vpack.c.bf16 %v2288_v20, %v2283_v9  ;;  %v1933_v56 = vpop.f32.mrf.mxu0  ;;  %v2024_v42 = vpop.f32.mrf.mxu1  ;;  %3557 = vmatpush1.bf16.msra.mxu1 %v10603_v63  ;;  %v10612_v63 = vld [vmem:[%s15488_s2 + $0x638] ss:$12 sps:$4 sm:$0xff]  }
 0x1ad   :  { %15579 = vst [vmem:[#allocation6_spill] sm:$0xff] %v12809_v40  ;;  %v2290_v59 = vmax.f32 %v2235_v19, 0.0  ;;  %v12828_v43 = vadd.f32 %v12484_v34, %v2159_v27  ;;  %v2285_v17 = vmax.f32 %v12731_v58, 0.0  ;;  %v12831_v24 = vpack.c.bf16 %v2289_v44, %v2284_v33  ;;  %v10608_v34 = vld [vmem:[%s15488_s2 + $0x590] ss:$12 sps:$4 sm:$0xff]   ;;  %3558 = vmatprep.subr.bf16.mxu1 %v10611_v22 }
 0x1ae   :  { %v12833_v6 = vpack.c.bf16 %v2291_v62, %v2286_v1  ;;  %v2701_v14 = vrot.slane %v12735_v10, 1  ;;  %v2705_v49 = vrot.slane %v12747_v51, 1  ;;  %9467 = vmatpush3.bf16.msra.mxu0 %v10606_v55  ;;  %v2060_v41 = vpop.f32.mrf.mxu0  ;;  %v10609_v19 = vld [vmem:[%s15488_s2 + $0x708] ss:$12 sps:$4 sm:$0xff]   ;;  %v2699_v58 = vrot.slane %v12725_v13, 1  ;;  %v15584_v33 = vld [vmem:[#allocation21_spill] sm:$0xff] }
 0x1af   :  { %15580 = vst [vmem:[#allocation2_spill] sm:$0xff] %v12828_v43  ;;  %v2703_v38 = vrot.slane %v12733_v35, 1  ;;  %v12848_v47 = vrot.slane %v12460_v12, %v2181_v25  ;;  %9468 = vmatprep.subr.bf16.mxu0 %v10607_v16  ;;  %v12853_v3 = vpack.c.bf16 %v2290_v59, %v2285_v17  ;;  %v10616_v25 = vld [vmem:[%s15488_s2 + $0x6f4] ss:$12 sps:$4 sm:$0xff]   ;;  %v12884_v55 = vrot.slane %v12831_v24, 1 }
 0x1b0   :  { %15581 = vst [vmem:[#allocation3_spill] sm:$0xff] %v12833_v6  ;;  %v12858_v9 = vsel %vm1509_vm3, %v2691_v57, %v2701_v14  ;;  %v12863_v20 = vsel %vm1509_vm3, %v2695_v2, %v2705_v49  ;;  %v2062_v12 = vpop.f32.mrf.mxu0  ;;  %v12873_v27 = vsel %vm1509_vm3, %v2689_v21, %v2699_v58  ;;  %v15583_v2 = vld [vmem:[#allocation20_spill] sm:$0xff]  ;;  %v12887_v16 = vrot.slane %v12833_v6, 1  ;;  %3559 = vmatpush1.bf16.msra.mxu1 %v10609_v19  ;;  %v10617_v56 = vld [vmem:[%s15488_s2 + $0x620] ss:$12 sps:$4 sm:$0xff]  }
 0x1b1   :  { %15582 = vst [vmem:[#allocation31_spill] sm:$0xff] %v12853_v3  ;;  %3436 = vmatprep.mubr.bf16.mxu1 %v12858_v9  ;;  %3519 = vmatprep.mubr.bf16.mxu0 %v12863_v20  ;;  %v12878_v57 = vsel %vm1509_vm3, %v2693_v61, %v2703_v38  ;;  %v2110_v11 = vadd.f32 %v2060_v41, %v15583_v2  ;;  %v10613_v61 = vld [vmem:[%s15488_s2 + $0x578] ss:$12 sps:$4 sm:$0xff]   ;;  %v10614_v62 = vld [vmem:[%s15488_s2 + $0x6f0] ss:$12 sps:$4 sm:$0xff]   ;;  %v12914_v17 = vrot.slane %v12825_v28, 1 }
 0x1b2   :  { %3437 = vmatmul.mubr.bf16.gmra.mxu1 %v12873_v27  ;;  %v2063_v48 = vpop.f32.mrf.mxu0  ;;  %9469 = vmatpush3.bf16.msra.mxu0 %v10608_v34  ;;  %v12899_v22 = vsel %vm1509_vm3, %v2701_v14, %v12884_v55  ;;  %v12903_v1 = vsel %vm1509_vm3, %v2705_v49, %v12887_v16  ;;  %v10621_v42 = vld [vmem:[%s15488_s2 + $0x6dc] ss:$12 sps:$4 sm:$0xff]   ;;  %v12917_v14 = vrot.slane %v12853_v3, 1  ;;  %v10618_v34 = vld [vmem:[%s15488_s2 + $0x560] ss:$12 sps:$4 sm:$0xff]   ;;  %v5127_v40 = vrot.slane %v12584_v29, 2 }
 0x1b3   :  { %3520 = vmatmul.mubr.bf16.gmra.mxu0 %v12878_v57  ;;  %v2192_v21 = vadd.f32 %v12848_v47, %v2110_v11  ;;  %v2115_v44 = vadd.f32 %v2063_v48, %v15584_v33  ;;  %9470 = vmatprep.subr.bf16.mxu0 %v10612_v63  ;;  %v10619_v19 = vld [vmem:[%s15488_s2 + $0x6d8] ss:$12 sps:$4 sm:$0xff]   ;;  %v10622_v48 = vld [vmem:[%s15488_s2 + $0x608] ss:$12 sps:$4 sm:$0xff]   ;;  %v12932_v33 = vsel %vm1509_vm3, %v2699_v58, %v12914_v17 }
 0x1b4   :  { %v2065_v59 = vpop.f32.mrf.mxu0  ;;  %3560 = vmatprep.subr.bf16.mxu1 %v10616_v25  ;;  %3446 = vmatprep.mubr.bf16.mxu1 %v12899_v22  ;;  %v15585_v25 = vld [vmem:[#allocation22_spill] sm:$0xff] }
 0x1b5   :  { %3529 = vmatprep.mubr.bf16.mxu0 %v12903_v1  ;;  %v2197_v49 = vadd.f32 %v12848_v47, %v2115_v44  ;;  %v2247_v63 = vmax.f32 %v2192_v21, 0.0  ;;  %3561 = vmatpush1.bf16.msra.mxu1 %v10614_v62  ;;  %v12936_v44 = vsel %vm1509_vm3, %v2703_v38, %v12917_v14  ;;  %v15586_v59 = vld [vmem:[#allocation23_spill] sm:$0xff] }
 0x1b6   :  { %v2068_v41 = vpop.f32.mrf.mxu0  ;;  %9471 = vmatpush3.bf16.msra.mxu0 %v10613_v61  ;;  %3562 = vmatprep.subr.bf16.mxu1 %v10621_v42  ;;  %v10629_v61 = vld [vmem:[%s15488_s2 + $0x6c4] ss:$12 sps:$4 sm:$0xff]   ;;  %v10623_v42 = vld [vmem:[%s15488_s2 + $0x548] ss:$12 sps:$4 sm:$0xff]  }
 0x1b7   :  { %v2252_v12 = vmax.f32 %v2197_v49, 0.0  ;;  %v2120_v2 = vadd.f32 %v2068_v41, %v15585_v25  ;;  %9472 = vmatprep.subr.bf16.mxu0 %v10617_v56  ;;  %v10627_v49 = vld [vmem:[%s15488_s2 + $0x6c0] ss:$12 sps:$4 sm:$0xff]  }
 0x1b8   :  { %v2070_v11 = vpop.f32.mrf.mxu0 }
 0x1b9   :  { %v12938_v21 = vpack.c.bf16 %v2252_v12, %v2247_v63  ;;  %v2202_v58 = vadd.f32 %v12848_v47, %v2120_v2  ;;  %3563 = vmatpush1.bf16.msra.mxu1 %v10619_v19  ;;  %v10626_v63 = vld [vmem:[%s15488_s2 + $0xac] ss:$12 sps:$4 sm:$0xff]   ;;  %v15587_v2 = vld [vmem:[#allocation24_spill] sm:$0xff] }
 0x1ba   :  { %3447 = vmatmul.mubr.bf16.gmra.mxu1 %v12932_v33  ;;  %v2071_v62 = vpop.f32.mrf.mxu0  ;;  %9473 = vmatpush3.bf16.msra.mxu0 %v10618_v34  ;;  %v10633_v34 = vld [vmem:[%s15488_s2 + $0x530] ss:$12 sps:$4 sm:$0xff]  }
 0x1bb   :  { %3530 = vmatmul.mubr.bf16.gmra.mxu0 %v12936_v44  ;;  %3456 = vmatprep.mubr.bf16.mxu1 %v12884_v55  ;;  %v2125_v38 = vadd.f32 %v2071_v62, %v15586_v59  ;;  %v2257_v12 = vmax.f32 %v2202_v58, 0.0  ;;  %v15588_v58 = vld [vmem:[#allocation25_spill] sm:$0xff] }
 0x1bc   :  { %3539 = vmatprep.mubr.bf16.mxu0 %v12887_v16  ;;  %v2073_v56 = vpop.f32.mrf.mxu0  ;;  %9474 = vmatprep.subr.bf16.mxu0 %v10622_v48 }
 0x1bd   :  { %v2207_v41 = vadd.f32 %v12848_v47, %v2125_v38  ;;  %3564 = vmatprep.subr.bf16.mxu1 %v10629_v61  ;;  %v15589_v56 = vmov 0  }
 0x1be   :  { %v2076_v19 = vpop.f32.mrf.mxu0  ;;  %9475 = vmatpush3.bf16.msra.mxu0 %v10623_v42  ;;  %3565 = vmatpush1.bf16.msra.mxu1 %v10627_v49 }
 0x1bf   :  { %v2262_v25 = vmax.f32 %v2207_v41, 0.0  ;;  %v2130_v11 = vadd.f32 %v2076_v19, %v15587_v2  ;;  %4492 = vmatprep.subr.bf16.mxu0 %v10626_v63  ;;  %9414 = vmatprep.subr.bf16.mxu1 %v10633_v34  ;;  %v10624_v41 = vld [vmem:[%s15488_s2 + $0xa8] ss:$12 sps:$4 sm:$0xff]   ;;  %v2686_v34 = vrot.slane %v12938_v21, 1 }
 0x1c0   :  { %v2078_v62 = vpop.f32.mrf.mxu0 }
 0x1c1   :  { %v12963_v59 = vpack.c.bf16 %v2262_v25, %v2257_v12  ;;  %v2212_v61 = vadd.f32 %v12848_v47, %v2130_v11  ;;  %v10634_v12 = vld [vmem:[%s15488_s2 + $0x470] ss:$12 sps:$4 sm:$0xff]   ;;  %v15590_v11 = vld [vmem:[#allocation26_spill] sm:$0xff] }
 0x1c2   :  { %3457 = vmatmul.mubr.bf16.gmra.mxu1 %v12914_v17  ;;  %v2079_v48 = vpop.f32.mrf.mxu0 }
 0x1c3   :  { %3540 = vmatmul.mubr.bf16.gmra.mxu0 %v12917_v14  ;;  %v2135_v38 = vadd.f32 %v2079_v48, %v15588_v58  ;;  %3582 = vmatprep.mubr.bf16.mxu1 %v15589_v56  ;;  %v2687_v42 = vrot.slane %v12963_v59, 1  ;;  %v2267_v25 = vmax.f32 %v2212_v61, 0.0  ;;  %v10638_v58 = vld [vmem:[%s15488_s2 + $0x518] ss:$12 sps:$4 sm:$0xff]   ;;  %v10630_v61 = vld [vmem:[%s15488_s2 + $0x90] ss:$12 sps:$4 sm:$0xff]  }
 0x1c4   :  { %3738 = vmatprep.mubr.bf16.mxu0 %v12645_v54  ;;  %v2081_v49 = vpop.f32.mrf.mxu0  ;;  %v10632_v54 = vld [vmem:[%s15488_s2 + $0x94] ss:$12 sps:$4 sm:$0xff]  }
 0x1c5   :  { %v2217_v63 = vadd.f32 %v12848_v47, %v2135_v38  ;;  %v12985_v48 = vsel %vm1509_vm3, %v2686_v34, %v2687_v42  ;;  %v15591_v34 = vld [vmem:[#allocation27_spill] sm:$0xff] }
 0x1c6   :  { %v2084_v19 = vpop.f32.mrf.mxu0 }
 0x1c7   :  { %v2272_v2 = vmax.f32 %v2217_v63, 0.0  ;;  %v2140_v62 = vadd.f32 %v2084_v19, %v15590_v11 }
 0x1c8   :  { %v2086_v38 = vpop.f32.mrf.mxu0 }
 0x1c9   :  { %v12990_v49 = vpack.c.bf16 %v2272_v2, %v2267_v25  ;;  %v2222_v63 = vadd.f32 %v12848_v47, %v2140_v62  ;;  %v10635_v2 = vld [vmem:[%s15488_s2 + $0x78] ss:$12 sps:$4 sm:$0xff]   ;;  %v15592_v38 = vld [vmem:[#allocation28_spill] sm:$0xff] }
 0x1ca   :  { %3583 = vmatmul.mubr.bf16.vlgmr.msra.gmra.mxu1 %v12985_v48  ;;  %v2087_v52 = vpop.f32.mrf.mxu0 }
 0x1cb   :  { %3739 = vmatmul.mubr.bf16.vlgmr.msra.gmra.mxu0 %v12699_v60  ;;  %v2145_v19 = vadd.f32 %v2087_v52, %v15591_v34  ;;  %v2697_v11 = vrot.slane %v12990_v49, 1  ;;  %9415 = vmatpush3.bf16.msra.mxu1 %v10634_v12  ;;  %v10637_v60 = vld [vmem:[%s15488_s2 + $0x7c] ss:$12 sps:$4 sm:$0xff]   ;;  %v10643_v52 = vld [vmem:[%s15488_s2 + $0x500] ss:$12 sps:$4 sm:$0xff]   ;;  %v2277_v12 = vmax.f32 %v2222_v63, 0.0 }
 0x1cc   :  { %4493 = vmatpush1.bf16.msra.mxu0 %v10624_v41  ;;  %3746 = vmatprep.mubr.bf16.mxu0 %v12761_v5  ;;  %v2089_v25 = vpop.f32.mrf.mxu0  ;;  %v10639_v5 = vld [vmem:[%s15488_s2 + $0x458] ss:$12 sps:$4 sm:$0xff]  }
 0x1cd   :  { %4494 = vmatprep.subr.bf16.mxu0 %v10632_v54  ;;  %v2227_v41 = vadd.f32 %v12848_v47, %v2145_v19  ;;  %9416 = vmatprep.subr.bf16.mxu1 %v10638_v58  ;;  %v13017_v25 = vsel %vm1509_vm3, %v2687_v42, %v2697_v11  ;;  %v10642_v58 = vld [vmem:[%s15488_s2 + $0x64] ss:$12 sps:$4 sm:$0xff]  }
 0x1ce   :  { %3592 = vmatprep.mubr.bf16.mxu1 %v15589_v56  ;;  %v2092_v54 = vpop.f32.mrf.mxu0 }
 0x1cf   :  { %v2282_v62 = vmax.f32 %v2227_v41, 0.0  ;;  %v2150_v34 = vadd.f32 %v2092_v54, %v15592_v38  ;;  %9417 = vmatpush3.bf16.msra.mxu1 %v10639_v5  ;;  %v10651_v41 = vld [vmem:[%s15488_s2 + $0x4e8] ss:$12 sps:$4 sm:$0xff]   ;;  %v15593_v54 = vld [vmem:[#allocation29_spill] sm:$0xff] }
 0x1d0   :  { %4495 = vmatpush1.bf16.msra.mxu0 %v10630_v61  ;;  %v2094_v19 = vpop.f32.mrf.mxu0  ;;  %v10647_v61 = vld [vmem:[%s15488_s2 + $0x440] ss:$12 sps:$4 sm:$0xff]   ;;  %9418 = vmatprep.subr.bf16.mxu1 %v10643_v52  ;;  %v10656_v38 = vld [vmem:[%s15488_s2 + $0x4d0] ss:$12 sps:$4 sm:$0xff]  }
 0x1d1   :  { %4496 = vmatprep.subr.bf16.mxu0 %v10637_v60  ;;  %v13025_v63 = vpack.c.bf16 %v2282_v62, %v2277_v12  ;;  %v10640_v60 = vld [vmem:[%s15488_s2 + $0x60] ss:$12 sps:$4 sm:$0xff]   ;;  %v2232_v5 = vadd.f32 %v12848_v47, %v2150_v34  ;;  %v10644_v19 = vld [vmem:[%s15488_s2 + $0x48] ss:$12 sps:$4 sm:$0xff]  }
 0x1d2   :  { %3593 = vmatmul.mubr.bf16.gmra.mxu1 %v13017_v25  ;;  %v2095_v42 = vpop.f32.mrf.mxu0 }
 0x1d3   :  { %3747 = vmatmul.mubr.bf16.gmra.mxu0 %v12792_v26  ;;  %v2155_v52 = vadd.f32 %v2095_v42, %v15593_v54  ;;  %v2707_v12 = vrot.slane %v13025_v63, 1  ;;  %v10646_v26 = vld [vmem:[%s15488_s2 + $0x4c] ss:$12 sps:$4 sm:$0xff]   ;;  %9419 = vmatpush3.bf16.msra.mxu1 %v10647_v61 }
 0x1d4   :  { %4497 = vmatpush1.bf16.msra.mxu0 %v10635_v2  ;;  %3754 = vmatprep.mubr.bf16.mxu0 %v12863_v20  ;;  %v2097_v62 = vpop.f32.mrf.mxu0  ;;  %v10652_v20 = vld [vmem:[%s15488_s2 + $0x428] ss:$12 sps:$4 sm:$0xff]   ;;  %v15594_v42 = vld [vmem:[#allocation33_spill] sm:$0xff] }
 0x1d5   :  { %4498 = vmatprep.subr.bf16.mxu0 %v10642_v58  ;;  %v2237_v2 = vadd.f32 %v12848_v47, %v2155_v52  ;;  %3602 = vmatprep.mubr.bf16.mxu1 %v15589_v56  ;;  %v2287_v58 = vmax.f32 %v2232_v5, 0.0  ;;  %v13055_v62 = vsel %vm1509_vm3, %v2697_v11, %v2707_v12  ;;  %v10661_v11 = vld [vmem:[%s15488_s2 + $0x4b8] ss:$12 sps:$4 sm:$0xff]  }
 0x1d6   :  { %9420 = vmatprep.subr.bf16.mxu1 %v10651_v41  ;;  %v2100_v34 = vpop.f32.mrf.mxu0  ;;  %v10650_v41 = vld [vmem:[%s15488_s2 + $0x34] ss:$12 sps:$4 sm:$0xff]  }
 0x1d7   :  { %v2292_v61 = vmax.f32 %v2237_v2, 0.0  ;;  %v2160_v54 = vadd.f32 %v2100_v34, %v15594_v42  ;;  %9421 = vmatpush3.bf16.msra.mxu1 %v10652_v20  ;;  %v10648_v20 = vld [vmem:[%s15488_s2 + $0x30] ss:$12 sps:$4 sm:$0xff]   ;;  %v10670_v42 = vld [vmem:[%s15488_s2 + $0x3e0] ss:$12 sps:$4 sm:$0xff]  }
 0x1d8   :  { %4499 = vmatpush1.bf16.msra.mxu0 %v10640_v60  ;;  %v10657_v60 = vld [vmem:[%s15488_s2 + $0x410] ss:$12 sps:$4 sm:$0xff]   ;;  %v2102_v5 = vpop.f32.mrf.mxu0  ;;  %9422 = vmatprep.subr.bf16.mxu1 %v10656_v38 }
 0x1d9   :  { %4500 = vmatprep.subr.bf16.mxu0 %v10646_v26  ;;  %v13063_v52 = vpack.c.bf16 %v2292_v61, %v2287_v58  ;;  %v13066_v2 = vadd.f32 %v12848_v47, %v2160_v54  ;;  %v10655_v38 = vld [vmem:[%s15488_s2 + $0x1c] ss:$12 sps:$4 sm:$0xff]   ;;  %v10653_v58 = vld [vmem:[%s15488_s2 + $0x18] ss:$12 sps:$4 sm:$0xff]   ;;  %v10658_v54 = vld [vmem:[%s15488_s2] ss:$12 sps:$4 sm:$0xff]  }
 0x1da   :  { %3603 = vmatmul.mubr.bf16.gmra.mxu1 %v13055_v62  ;;  %v2103_v26 = vpop.f32.mrf.mxu0  ;;  %v10660_v61 = vld [vmem:[%s15488_s2 + $0x4] ss:$12 sps:$4 sm:$0xff]  }
 0x1db   :  { %3755 = vmatmul.mubr.bf16.gmra.mxu0 %v12878_v57  ;;  %v13078_v47 = vrot.slane %v13063_v52, 1  ;;  %9423 = vmatpush3.bf16.msra.mxu1 %v10657_v60  ;;  %v10662_v57 = vld [vmem:[%s15488_s2 + $0x3f8] ss:$12 sps:$4 sm:$0xff]   ;;  %v10669_v60 = vld [vmem:[%s15488_s2 + $0x154] ss:$12 sps:$4 sm:$0xff]   ;;  %v15509_v26 = vmov 0.0  }
 0x1dc   :  { %4501 = vmatpush1.bf16.msra.mxu0 %v10644_v19  ;;  %3762 = vmatprep.mubr.bf16.mxu0 %v12903_v1  ;;  %v2104_v34 = vpop.f32.mrf.mxu0  ;;  %v10666_v1 = vld [vmem:[%s15488_s2 + $0x4a0] ss:$12 sps:$4 sm:$0xff]   ;;  %v10667_v5 = vld [vmem:[%s15488_s2 + $0x150] ss:$12 sps:$4 sm:$0xff]  }
 0x1dd   :  { %4502 = vmatprep.subr.bf16.mxu0 %v10650_v41  ;;  %3612 = vmatprep.mubr.bf16.mxu1 %v15589_v56  ;;  %v13095_v19 = vsel %vm1509_vm3, %v2707_v12, %v13078_v47  ;;  %v10674_v12 = vld [vmem:[%s15488_s2 + $0x488] ss:$12 sps:$4 sm:$0xff]   ;;  %v10665_v41 = vld [vmem:[%s15488_s2 + $0x16c] ss:$12 sps:$4 sm:$0xff]  }
 0x1de   :  { %9424 = vmatprep.subr.bf16.mxu1 %v10661_v11  ;;  %v10673_v11 = vld [vmem:[%s15488_s2 + $0x13c] ss:$12 sps:$4 sm:$0xff]   ;;  %v10683_v34 = vld [vmem:[%s15488_s2 + $0x758] ss:$12 sps:$4 sm:$0xff]  }
 0x1df   :  { %9425 = vmatpush3.bf16.msra.mxu1 %v10662_v57  ;;  %v10682_v57 = vld [vmem:[%s15488_s2 + $0x10c] ss:$12 sps:$4 sm:$0xff]  }
 0x1e0   :  { %4503 = vmatpush1.bf16.msra.mxu0 %v10648_v20  ;;  %9426 = vmatprep.subr.bf16.mxu1 %v10666_v1  ;;  %v10678_v20 = vld [vmem:[%s15488_s2 + $0x124] ss:$12 sps:$4 sm:$0xff]   ;;  %v10690_v1 = vld [vmem:[%s15488_s2 + $0x740] ss:$12 sps:$4 sm:$0xff]  }
 0x1e1   :  { %4504 = vmatprep.subr.bf16.mxu0 %v10655_v38  ;;  %v10676_v38 = vld [vmem:[%s15488_s2 + $0x120] ss:$12 sps:$4 sm:$0xff]  }
 0x1e2   :  { %3613 = vmatmul.mubr.bf16.gmra.mxu1 %v13095_v19 }
 0x1e3   :  { %3763 = vmatmul.mubr.bf16.gmra.mxu0 %v12936_v44  ;;  %3622 = vmatprep.mubr.bf16.mxu1 %v15589_v56  ;;  %v10675_v44 = vld [vmem:[%s15488_s2 + $0x3c8] ss:$12 sps:$4 sm:$0xff]  }
 0x1e4   :  { %4505 = vmatpush1.bf16.msra.mxu0 %v10653_v58  ;;  %3770 = vmatprep.mubr.bf16.mxu0 %v12887_v16  ;;  %v10663_v16 = vld [vmem:[%s15488_s2 + $0x168] ss:$12 sps:$4 sm:$0xff]   ;;  %v10684_v58 = vld [vmem:[%s15488_s2 + $0xf0] ss:$12 sps:$4 sm:$0xff]  }
 0x1e5   :  { %4506 = vmatprep.subr.bf16.mxu0 %v10660_v61  ;;  %9427 = vmatpush3.bf16.msra.mxu1 %v10670_v42  ;;  %v10689_v61 = vld [vmem:[%s15488_s2 + $0xdc] ss:$12 sps:$4 sm:$0xff]  }
 0x1e6   :  { %9428 = vmatprep.subr.bf16.mxu1 %v10674_v12  ;;  %v10694_v42 = vld [vmem:[%s15488_s2 + $0x728] ss:$12 sps:$4 sm:$0xff]   ;;  %v10695_v12 = vld [vmem:[%s15488_s2 + $0x710] ss:$12 sps:$4 sm:$0xff]  }
 0x1e8   :  { %4507 = vmatpush1.bf16.msra.mxu0 %v10658_v54  ;;  %v10691_v54 = vld [vmem:[%s15488_s2 + $0xc0] ss:$12 sps:$4 sm:$0xff]  }
 0x1e9   :  { %4508 = vmatprep.subr.bf16.mxu0 %v10665_v41  ;;  %9429 = vmatpush3.bf16.msra.mxu1 %v10675_v44  ;;  %v10696_v41 = vld [vmem:[%s15488_s2 + $0x6f8] ss:$12 sps:$4 sm:$0xff]  }
 0x1ea   :  { %3623 = vmatmul.mubr.bf16.gmra.mxu1 %v13078_v47  ;;  %9943 = vmatprep.subr.bf16.mxu1 %v15509_v26  ;;  %v10699_v44 = vld [vmem:[%s15488_s2 + $0x3ac] ss:$12 sps:$4 sm:$0xff]  }
 0x1eb   :  { %3771 = vmatmul.mubr.bf16.gmra.mxu0 %v12917_v14  ;;  %3665 = vmatprep.mubr.bf16.mxu1 %v12640_v50  ;;  %v10671_v14 = vld [vmem:[%s15488_s2 + $0x138] ss:$12 sps:$4 sm:$0xff]   ;;  %v10679_v50 = vld [vmem:[%s15488_s2 + $0x770] ss:$12 sps:$4 sm:$0xff]  }
 0x1ec   :  { %4509 = vmatpush2.bf16.msra.mxu0 %v10663_v16  ;;  %4524 = vmatprep.mubr.bf16.mxu0 %v12593_v4  ;;  %v10702_v16 = vld [vmem:[%s15488_s2 + $0x394] ss:$12 sps:$4 sm:$0xff]  }
 0x1ed   :  { %4510 = vmatprep.subr.bf16.mxu0 %v10669_v60  ;;  %v10700_v60 = vld [vmem:[%s15488_s2 + $0x390] ss:$12 sps:$4 sm:$0xff]  }
 0x1f0   :  { %4511 = vmatpush2.bf16.msra.mxu0 %v10667_v5  ;;  %v10707_v5 = vld [vmem:[%s15488_s2 + $0x6c8] ss:$12 sps:$4 sm:$0xff]  }
 0x1f1   :  { %4512 = vmatprep.subr.bf16.mxu0 %v10673_v11  ;;  %v10706_v11 = vld [vmem:[%s15488_s2 + $0x37c] ss:$12 sps:$4 sm:$0xff]  }
 0x1f2   :  { %3666 = vmatmul.mubr.bf16.vlgmr.msra.gmra.mxu1 %v12694_v53  ;;  %v10680_v53 = vld [vmem:[%s15488_s2 + $0x108] ss:$12 sps:$4 sm:$0xff]  }
 0x1f3   :  { %3673 = vmatprep.mubr.bf16.mxu1 %v12754_v32  ;;  %9944 = vmatpush3.bf16.msra.mxu1 %v10679_v50  ;;  %v10686_v32 = vld [vmem:[%s15488_s2 + $0xf4] ss:$12 sps:$4 sm:$0xff]   ;;  %v10716_v50 = vld [vmem:[%s15488_s2 + $0x34c] ss:$12 sps:$4 sm:$0xff]  }
 0x1f4   :  { %4513 = vmatpush2.bf16.msra.mxu0 %v10671_v14  ;;  %9945 = vmatprep.subr.bf16.mxu1 %v15509_v26  ;;  %v10710_v14 = vld [vmem:[%s15488_s2 + $0x364] ss:$12 sps:$4 sm:$0xff]  }
 0x1f5   :  { %4514 = vmatprep.subr.bf16.mxu0 %v10678_v20  ;;  %v10708_v20 = vld [vmem:[%s15488_s2 + $0x360] ss:$12 sps:$4 sm:$0xff]  }
 0x1f7   :  { %9946 = vmatpush3.bf16.msra.mxu1 %v10683_v34  ;;  %v10722_v34 = vld [vmem:[%s15488_s2 + $0x334] ss:$12 sps:$4 sm:$0xff]  }
 0x1f8   :  { %4515 = vmatpush2.bf16.msra.mxu0 %v10676_v38  ;;  %9947 = vmatprep.subr.bf16.mxu1 %v15509_v26  ;;  %v10714_v38 = vld [vmem:[%s15488_s2 + $0x348] ss:$12 sps:$4 sm:$0xff]  }
 0x1f9   :  { %4516 = vmatprep.subr.bf16.mxu0 %v10682_v57  ;;  %v10719_v57 = vld [vmem:[%s15488_s2 + $0x214] ss:$12 sps:$4 sm:$0xff]  }
 0x1fa   :  { %3674 = vmatmul.mubr.bf16.gmra.mxu1 %v12781_v37  ;;  %v10687_v37 = vld [vmem:[%s15488_s2 + $0xd8] ss:$12 sps:$4 sm:$0xff]  }
 0x1fb   :  { %3681 = vmatprep.mubr.bf16.mxu1 %v12858_v9  ;;  %9948 = vmatpush3.bf16.msra.mxu1 %v10690_v1  ;;  %v10693_v9 = vld [vmem:[%s15488_s2 + $0xc4] ss:$12 sps:$4 sm:$0xff]   ;;  %v10725_v1 = vld [vmem:[%s15488_s2 + $0x1fc] ss:$12 sps:$4 sm:$0xff]  }
 0x1fc   :  { %4517 = vmatpush2.bf16.msra.mxu0 %v10680_v53  ;;  %9949 = vmatprep.subr.bf16.mxu1 %v15509_v26  ;;  %v10717_v53 = vld [vmem:[%s15488_s2 + $0x210] ss:$12 sps:$4 sm:$0xff]  }
 0x1fd   :  { %4518 = vmatprep.subr.bf16.mxu0 %v10686_v32  ;;  %v10720_v32 = vld [vmem:[%s15488_s2 + $0x330] ss:$12 sps:$4 sm:$0xff]  }
 0x1ff   :  { %9950 = vmatpush3.bf16.msra.mxu1 %v10694_v42  ;;  %v10731_v42 = vld [vmem:[%s15488_s2 + $0x1e4] ss:$12 sps:$4 sm:$0xff]  }
 0x200   :  { %4519 = vmatpush2.bf16.msra.mxu0 %v10684_v58  ;;  %9951 = vmatprep.subr.bf16.mxu1 %v15509_v26  ;;  %v10723_v58 = vld [vmem:[%s15488_s2 + $0x1f8] ss:$12 sps:$4 sm:$0xff]  }
 0x201   :  { %4520 = vmatprep.subr.bf16.mxu0 %v10689_v61  ;;  %v10726_v61 = vld [vmem:[%s15488_s2 + $0x318] ss:$12 sps:$4 sm:$0xff]  }
 0x202   :  { %3682 = vmatmul.mubr.bf16.gmra.mxu1 %v12873_v27  ;;  %v10697_v27 = vld [vmem:[%s15488_s2 + $0x3a8] ss:$12 sps:$4 sm:$0xff]  }
 0x203   :  { %3689 = vmatprep.mubr.bf16.mxu1 %v12899_v22  ;;  %9952 = vmatpush3.bf16.msra.mxu1 %v10695_v12  ;;  %v10703_v22 = vld [vmem:[%s15488_s2 + $0x6e0] ss:$12 sps:$4 sm:$0xff]  }
 0x204   :  { %4521 = vmatpush2.bf16.msra.mxu0 %v10687_v37  ;;  %9953 = vmatprep.subr.bf16.mxu1 %v15509_v26  ;;  %v10734_v37 = vld [vmem:[%s15488_s2 + $0x304] ss:$12 sps:$4 sm:$0xff]   ;;  %v10732_v12 = vld [vmem:[%s15488_s2 + $0x300] ss:$12 sps:$4 sm:$0xff]  }
 0x205   :  { %4522 = vmatprep.subr.bf16.mxu0 %v10693_v9  ;;  %v10729_v9 = vld [vmem:[%s15488_s2 + $0x1e0] ss:$12 sps:$4 sm:$0xff]  }
 0x207   :  { %9954 = vmatpush3.bf16.msra.mxu1 %v10696_v41  ;;  %v10735_v41 = vld [vmem:[%s15488_s2 + $0x1c8] ss:$12 sps:$4 sm:$0xff]  }
 0x208   :  { %4523 = vmatpush2.bf16.msra.mxu0 %v10691_v54  ;;  %9955 = vmatprep.subr.bf16.mxu1 %v15509_v26  ;;  %v10737_v54 = vld [vmem:[%s15488_s2 + $0x1cc] ss:$12 sps:$4 sm:$0xff]  }
 0x209   :  { %4658 = vmatprep.subr.bf16.mxu0 %v10699_v44  ;;  %v10740_v44 = vld [vmem:[%s15488_s2 + $0x1b4] ss:$12 sps:$4 sm:$0xff]  }
 0x20a   :  { %3690 = vmatmul.mubr.bf16.gmra.mxu1 %v12932_v33  ;;  %v10704_v33 = vld [vmem:[%s15488_s2 + $0x378] ss:$12 sps:$4 sm:$0xff]  }
 0x20b   :  { %4525 = vmatmul.mubr.bf16.vlgmr.msra.gmra.mxu0 %v12584_v29  ;;  %3697 = vmatprep.mubr.bf16.mxu1 %v12884_v55  ;;  %v10713_v55 = vld [vmem:[%s15488_s2 + $0x22c] ss:$12 sps:$4 sm:$0xff]  }
 0x20c   :  { %4534 = vmatprep.mubr.bf16.mxu0 %v12619_v45  ;;  %4659 = vmatpush1.bf16.msra.mxu0 %v10697_v27  ;;  %v10738_v27 = vld [vmem:[%s15488_s2 + $0x1b0] ss:$12 sps:$4 sm:$0xff]  }
 0x20d   :  { %9956 = vmatpush3.bf16.msra.mxu1 %v10703_v22  ;;  %4660 = vmatprep.subr.bf16.mxu0 %v10702_v16  ;;  %v10743_v22 = vld [vmem:[%s15488_s2 + $0x19c] ss:$12 sps:$4 sm:$0xff]  }
 0x20e   :  { %9957 = vmatprep.subr.bf16.mxu1 %v15509_v26  ;;  %v10745_v16 = vld [vmem:[%s15488_s2 + $0x230] ss:$12 sps:$4 sm:$0xff]  }
 0x210   :  { %4661 = vmatpush1.bf16.msra.mxu0 %v10700_v60  ;;  %v10748_v60 = vld [vmem:[%s15488_s2 + $0x184] ss:$12 sps:$4 sm:$0xff]  }
 0x211   :  { %9958 = vmatpush3.bf16.msra.mxu1 %v10707_v5  ;;  %4662 = vmatprep.subr.bf16.mxu0 %v10706_v11  ;;  %v10749_v5 = vld [vmem:[%s15488_s2 + $0x2d8] ss:$12 sps:$4 sm:$0xff]   ;;  %v10746_v11 = vld [vmem:[%s15488_s2 + $0x180] ss:$12 sps:$4 sm:$0xff]  }
 0x212   :  { %4575 = vmatprep.subr.bf16.mxu1 %v10713_v55  ;;  %3698 = vmatmul.mubr.bf16.gmra.mxu1 %v12914_v17  ;;  %v10711_v17 = vld [vmem:[%s15488_s2 + $0x228] ss:$12 sps:$4 sm:$0xff]   ;;  %v10750_v55 = vld [vmem:[%s15488_s2 + $0x218] ss:$12 sps:$4 sm:$0xff]  }
 0x213   :  { %4535 = vmatmul.mubr.bf16.gmra.mxu0 %v12612_v0  ;;  %9959 = vmatprep.mubr.msk.bf16.mxu1 %vm11067_vm4, %v15509_v26 }
 0x214   :  { %4544 = vmatprep.mubr.bf16.mxu0 %v12662_v23  ;;  %4663 = vmatpush1.bf16.msra.mxu0 %v10704_v33  ;;  %v10753_v33 = vld [vmem:[%s15488_s2 + $0x2ec] ss:$12 sps:$4 sm:$0xff]  }
 0x215   :  { %4664 = vmatprep.subr.bf16.mxu0 %v10710_v14  ;;  %v10751_v14 = vld [vmem:[%s15488_s2 + $0x2e8] ss:$12 sps:$4 sm:$0xff]  }
 0x218   :  { %4665 = vmatpush1.bf16.msra.mxu0 %v10708_v20  ;;  %v10755_v20 = vld [vmem:[%s15488_s2 + $0x200] ss:$12 sps:$4 sm:$0xff]  }
 0x219   :  { %4666 = vmatprep.subr.bf16.mxu0 %v10716_v50  ;;  %v10758_v50 = vld [vmem:[%s15488_s2 + $0x2d4] ss:$12 sps:$4 sm:$0xff]  }
 0x21a   :  { %9960 = vmatmul.mubr.bf16.vlgmr.msra.gmra.mxu1 %v12985_v48  ;;  %v10728_v48 = vld [vmem:[%s15488_s2 + $0x31c] ss:$12 sps:$4 sm:$0xff]  }
 0x21b   :  { %4545 = vmatmul.mubr.bf16.gmra.mxu0 %v12656_v30  ;;  %4576 = vmatpush1.bf16.msra.mxu1 %v10711_v17  ;;  %v10759_v17 = vld [vmem:[%s15488_s2 + $0x2a8] ss:$12 sps:$4 sm:$0xff]  }
 0x21c   :  { %4554 = vmatprep.mubr.bf16.mxu0 %v12735_v10  ;;  %4577 = vmatprep.subr.bf16.mxu1 %v10719_v57  ;;  %v10760_v57 = vld [vmem:[%s15488_s2 + $0x1e8] ss:$12 sps:$4 sm:$0xff]  }
 0x21d   :  { %4667 = vmatpush1.bf16.msra.mxu0 %v10714_v38  ;;  %9963 = vmatprep.mubr.msk.bf16.mxu1 %vm11067_vm4, %v15509_v26  ;;  %v10756_v38 = vld [vmem:[%s15488_s2 + $0x2d0] ss:$12 sps:$4 sm:$0xff]  }
 0x21e   :  { %4668 = vmatprep.subr.bf16.mxu0 %v10722_v34  ;;  %v10763_v34 = vld [vmem:[%s15488_s2 + $0x2bc] ss:$12 sps:$4 sm:$0xff]  }
 0x21f   :  { %4578 = vmatpush1.bf16.msra.mxu1 %v10717_v53  ;;  %v10761_v53 = vld [vmem:[%s15488_s2 + $0x2b8] ss:$12 sps:$4 sm:$0xff]  }
 0x220   :  { %4579 = vmatprep.subr.bf16.mxu1 %v10725_v1  ;;  %v10768_v1 = vld [vmem:[%s15488_s2 + $0x2a4] ss:$12 sps:$4 sm:$0xff]  }
 0x221   :  { %4669 = vmatpush1.bf16.msra.mxu0 %v10720_v32  ;;  %v10765_v32 = vld [vmem:[%s15488_s2 + $0x1d0] ss:$12 sps:$4 sm:$0xff]  }
 0x222   :  { %4670 = vmatprep.subr.bf16.mxu0 %v10728_v48  ;;  %9964 = vmatmul.mubr.bf16.gmra.mxu1 %v13017_v25  ;;  %v10744_v25 = vld [vmem:[%s15488_s2 + $0x2f0] ss:$12 sps:$4 sm:$0xff]   ;;  %v10769_v48 = vld [vmem:[%s15488_s2 + $0x278] ss:$12 sps:$4 sm:$0xff]  }
 0x223   :  { %4555 = vmatmul.mubr.bf16.gmra.mxu0 %v12725_v13  ;;  %4580 = vmatpush1.bf16.msra.mxu1 %v10723_v58  ;;  %v10766_v58 = vld [vmem:[%s15488_s2 + $0x2a0] ss:$12 sps:$4 sm:$0xff]  }
 0x224   :  { %4564 = vmatprep.mubr.bf16.mxu0 %v12831_v24  ;;  %4581 = vmatprep.subr.bf16.mxu1 %v10731_v42  ;;  %v10773_v42 = vld [vmem:[%s15488_s2 + $0x28c] ss:$12 sps:$4 sm:$0xff]  }
 0x225   :  { %4671 = vmatpush1.bf16.msra.mxu0 %v10726_v61  ;;  %9967 = vmatprep.mubr.msk.bf16.mxu1 %vm11067_vm4, %v15509_v26  ;;  %v10770_v61 = vld [vmem:[%s15488_s2 + $0x1b8] ss:$12 sps:$4 sm:$0xff]  }
 0x226   :  { %4672 = vmatprep.subr.bf16.mxu0 %v10734_v37  ;;  %v10774_v37 = vld [vmem:[%s15488_s2 + $0x260] ss:$12 sps:$4 sm:$0xff]  }
 0x227   :  { %4582 = vmatpush1.bf16.msra.mxu1 %v10729_v9  ;;  %v10771_v9 = vld [vmem:[%s15488_s2 + $0x288] ss:$12 sps:$4 sm:$0xff]  }
 0x228   :  { %4583 = vmatprep.subr.bf16.mxu1 %v10737_v54  ;;  %v10778_v54 = vld [vmem:[%s15488_s2 + $0x274] ss:$12 sps:$4 sm:$0xff]  }
 0x229   :  { %4673 = vmatpush1.bf16.msra.mxu0 %v10732_v12  ;;  %v10775_v12 = vld [vmem:[%s15488_s2 + $0x1a0] ss:$12 sps:$4 sm:$0xff]  }
 0x22a   :  { %9565 = vmatprep.subr.bf16.mxu0 %v10744_v25  ;;  %9968 = vmatmul.mubr.bf16.gmra.mxu1 %v13055_v62  ;;  %v10741_v62 = vld [vmem:[%s15488_s2 + $0x198] ss:$12 sps:$4 sm:$0xff]   ;;  %v10779_v25 = vld [vmem:[%s15488_s2 + $0x248] ss:$12 sps:$4 sm:$0xff]  }
 0x22b   :  { %4565 = vmatmul.mubr.bf16.gmra.mxu0 %v12825_v28  ;;  %4584 = vmatpush1.bf16.msra.mxu1 %v10735_v41  ;;  %v10776_v41 = vld [vmem:[%s15488_s2 + $0x270] ss:$12 sps:$4 sm:$0xff]  }
 0x22c   :  { %4690 = vmatprep.mubr.bf16.mxu0 %v15589_v56  ;;  %4585 = vmatprep.subr.bf16.mxu1 %v10740_v44  ;;  %v10780_v44 = vld [vmem:[%s15488_s2 + $0x188] ss:$12 sps:$4 sm:$0xff]  }
 0x22d   :  { %9971 = vmatprep.mubr.msk.bf16.mxu1 %vm11067_vm4, %v15509_v26 }
 0x22f   :  { %4586 = vmatpush1.bf16.msra.mxu1 %v10738_v27  ;;  %v10783_v27 = vld [vmem:[%s15488_s2 + $0x25c] ss:$12 sps:$4 sm:$0xff]  }
 0x230   :  { %4587 = vmatprep.subr.bf16.mxu1 %v10743_v22  ;;  %v10786_v22 = vld [vmem:[%s15488_s2 + $0x82c] ss:$12 sps:$4 sm:$0xff]  }
 0x232   :  { %9972 = vmatmul.mubr.bf16.gmra.mxu1 %v13095_v19  ;;  %v10754_v19 = vld [vmem:[%s15488_s2 + $0x2c0] ss:$12 sps:$4 sm:$0xff]  }
 0x233   :  { %4691 = vmatmul.mubr.bf16.vlgmr.msra.gmra.mxu0 %v12938_v21  ;;  %4588 = vmatpush1.bf16.msra.mxu1 %v10741_v62  ;;  %v10781_v62 = vld [vmem:[%s15488_s2 + $0x258] ss:$12 sps:$4 sm:$0xff]  }
 0x234   :  { %4700 = vmatprep.mubr.bf16.mxu0 %v15589_v56  ;;  %9566 = vmatpush3.bf16.msra.mxu0 %v10745_v16  ;;  %v10789_v16 = vld [vmem:[%s15488_s2 + $0x244] ss:$12 sps:$4 sm:$0xff]  }
 0x235   :  { %4589 = vmatprep.subr.bf16.mxu1 %v10748_v60  ;;  %9567 = vmatprep.subr.bf16.mxu0 %v10749_v5  ;;  %v10787_v60 = vld [vmem:[%s15488_s2 + $0x240] ss:$12 sps:$4 sm:$0xff]   ;;  %v10793_v5 = vld [vmem:[%s15488_s2 + $0x170] ss:$12 sps:$4 sm:$0xff]  }
 0x236   :  { %9975 = vmatprep.mubr.msk.bf16.mxu1 %vm11067_vm4, %v15509_v26 }
 0x237   :  { %4590 = vmatpush1.bf16.msra.mxu1 %v10746_v11  ;;  %v10784_v11 = vld [vmem:[%s15488_s2 + $0x828] ss:$12 sps:$4 sm:$0xff]  }
 0x238   :  { %9568 = vmatpush3.bf16.msra.mxu0 %v10750_v55  ;;  %4591 = vmatprep.subr.bf16.mxu1 %v10753_v33  ;;  %v10792_v55 = vld [vmem:[%s15488_s2 + $0x814] ss:$12 sps:$4 sm:$0xff]   ;;  %v10794_v33 = vld [vmem:[%s15488_s2 + $0xb0] ss:$12 sps:$4 sm:$0xff]  }
 0x239   :  { %9569 = vmatprep.subr.bf16.mxu0 %v10754_v19  ;;  %v10798_v19 = vld [vmem:[%s15488_s2 + $0x158] ss:$12 sps:$4 sm:$0xff]  }
 0x23a   :  { %9976 = vmatmul.mubr.bf16.gmra.mxu1 %v13078_v47  ;;  %v10764_v47 = vld [vmem:[%s15488_s2 + $0x290] ss:$12 sps:$4 sm:$0xff]  }
 0x23b   :  { %4701 = vmatmul.mubr.bf16.gmra.mxu0 %v12963_v59  ;;  %4592 = vmatpush2.bf16.msra.mxu1 %v10751_v14  ;;  %v10790_v14 = vld [vmem:[%s15488_s2 + $0x810] ss:$12 sps:$4 sm:$0xff]  }
 0x23c   :  { %4607 = vmatprep.mubr.bf16.mxu1 %v12595_v15  ;;  %4710 = vmatprep.mubr.bf16.mxu0 %v15589_v56 }
 0x23d   :  { %9570 = vmatpush3.bf16.msra.mxu0 %v10755_v20  ;;  %4593 = vmatprep.subr.bf16.mxu1 %v10758_v50  ;;  %v10797_v20 = vld [vmem:[%s15488_s2 + $0x7fc] ss:$12 sps:$4 sm:$0xff]   ;;  %v10799_v50 = vld [vmem:[%s15488_s2 + $0x98] ss:$12 sps:$4 sm:$0xff]  }
 0x23e   :  { %9571 = vmatprep.subr.bf16.mxu0 %v10759_v17  ;;  %v10795_v17 = vld [vmem:[%s15488_s2 + $0x7f8] ss:$12 sps:$4 sm:$0xff]  }
 0x23f   :  { %4594 = vmatpush2.bf16.msra.mxu1 %v10756_v38 }
 0x240   :  { %4595 = vmatprep.subr.bf16.mxu1 %v10763_v34 }
 0x241   :  { %9572 = vmatpush3.bf16.msra.mxu0 %v10760_v57 }
 0x242   :  { %9573 = vmatprep.subr.bf16.mxu0 %v10764_v47  ;;  %v10802_v47 = vld [vmem:[%s15488_s2 + $0x7e4] ss:$12 sps:$4 sm:$0xff]  }
 0x243   :  { %4711 = vmatmul.mubr.bf16.gmra.mxu0 %v12990_v49  ;;  %4596 = vmatpush2.bf16.msra.mxu1 %v10761_v53 }
 0x244   :  { %4720 = vmatprep.mubr.bf16.mxu0 %v15589_v56  ;;  %4597 = vmatprep.subr.bf16.mxu1 %v10768_v1  ;;  %v10803_v1 = vld [vmem:[%s15488_s2 + $0x140] ss:$12 sps:$4 sm:$0xff]  }
 0x245   :  { %9574 = vmatpush3.bf16.msra.mxu0 %v10765_v32 }
 0x246   :  { %9575 = vmatprep.subr.bf16.mxu0 %v10769_v48 }
 0x247   :  { %4598 = vmatpush2.bf16.msra.mxu1 %v10766_v58  ;;  %v10807_v58 = vld [vmem:[%s15488_s2 + $0x80] ss:$12 sps:$4 sm:$0xff]  }
 0x248   :  { %4599 = vmatprep.subr.bf16.mxu1 %v10773_v42 }
 0x249   :  { %9576 = vmatpush3.bf16.msra.mxu0 %v10770_v61  ;;  %v10800_v61 = vld [vmem:[%s15488_s2 + $0x7e0] ss:$12 sps:$4 sm:$0xff]  }
 0x24a   :  { %9577 = vmatprep.subr.bf16.mxu0 %v10774_v37 }
 0x24b   :  { %4721 = vmatmul.mubr.bf16.gmra.mxu0 %v13025_v63  ;;  %4600 = vmatpush2.bf16.msra.mxu1 %v10771_v9  ;;  %v10811_v9 = vld [vmem:[%s15488_s2 + $0x128] ss:$12 sps:$4 sm:$0xff]  }
 0x24c   :  { %4730 = vmatprep.mubr.bf16.mxu0 %v15589_v56  ;;  %4601 = vmatprep.subr.bf16.mxu1 %v10778_v54  ;;  %v10806_v54 = vld [vmem:[%s15488_s2 + $0x7cc] ss:$12 sps:$4 sm:$0xff]  }
 0x24d   :  { %9578 = vmatpush3.bf16.msra.mxu0 %v10775_v12 }
 0x24e   :  { %9579 = vmatprep.subr.bf16.mxu0 %v10779_v25 }
 0x24f   :  { %4602 = vmatpush2.bf16.msra.mxu1 %v10776_v41 }
 0x250   :  { %4603 = vmatprep.subr.bf16.mxu1 %v10783_v27 }
 0x251   :  { %9580 = vmatpush3.bf16.msra.mxu0 %v10780_v44  ;;  %v10804_v44 = vld [vmem:[%s15488_s2 + $0x7c8] ss:$12 sps:$4 sm:$0xff]  }
 0x252   :  { %5847 = vmatprep.subr.bf16.mxu0 %v10786_v22  ;;  %v10810_v22 = vld [vmem:[%s15488_s2 + $0x7b4] ss:$12 sps:$4 sm:$0xff]  }
 0x253   :  { %4731 = vmatmul.mubr.bf16.gmra.mxu0 %v13063_v52  ;;  %4604 = vmatpush2.bf16.msra.mxu1 %v10781_v62  ;;  %v10812_v62 = vld [vmem:[%s15488_s2 + $0x68] ss:$12 sps:$4 sm:$0xff]  }
 0x254   :  { %4846 = vmatprep.mubr.bf16.mxu0 %v12595_v15  ;;  %4605 = vmatprep.subr.bf16.mxu1 %v10789_v16 }
 0x257   :  { %4606 = vmatpush2.bf16.msra.mxu1 %v10787_v60  ;;  %v10816_v60 = vld [vmem:[%s15488_s2 + $0x110] ss:$12 sps:$4 sm:$0xff]  }
 0x258   :  { %9519 = vmatprep.subr.bf16.mxu1 %v10793_v5 }
 0x25a   :  { %4608 = vmatmul.mubr.bf16.vlgmr.msra.gmra.mxu1 %v12591_v18 }
 0x25b   :  { %4847 = vmatmul.mubr.bf16.vlgmr.msra.gmra.mxu0 %v12591_v18  ;;  %4617 = vmatprep.mubr.bf16.mxu1 %v12621_v39 }
 0x25c   :  { %5848 = vmatpush1.bf16.msra.mxu0 %v10784_v11  ;;  %4854 = vmatprep.mubr.bf16.mxu0 %v12621_v39 }
 0x25d   :  { %5849 = vmatprep.subr.bf16.mxu0 %v10792_v55  ;;  %9520 = vmatpush3.bf16.msra.mxu1 %v10794_v33  ;;  %v10808_v33 = vld [vmem:[%s15488_s2 + $0x7b0] ss:$12 sps:$4 sm:$0xff]  }
 0x25e   :  { %9521 = vmatprep.subr.bf16.mxu1 %v10798_v19 }
 0x25f   :  { %v3418_v38 = vpop.f32.mrf.mxu1  ;;  %v3501_v57 = vpop.f32.mrf.mxu0 }
 0x260   :  { %5850 = vmatpush1.bf16.msra.mxu0 %v10790_v14  ;;  %v13471_v34 = vadd.f32 %v3501_v57, %v3418_v38  ;;  %v10821_v38 = vld [vmem:[%s15488_s2 + $0xf8] ss:$12 sps:$4 sm:$0xff]  }
 0x261   :  { %5851 = vmatprep.subr.bf16.mxu0 %v10797_v20  ;;  %v3420_v53 = vpop.f32.mrf.mxu1  ;;  %v3503_v32 = vpop.f32.mrf.mxu0  ;;  %9522 = vmatpush3.bf16.msra.mxu1 %v10799_v50  ;;  %v10815_v20 = vld [vmem:[%s15488_s2 + $0x79c] ss:$12 sps:$4 sm:$0xff]  }
 0x262   :  { %v13480_v48 = vadd.f32 %v3503_v32, %v3420_v53  ;;  %4618 = vmatmul.mubr.bf16.gmra.mxu1 %v12617_v46  ;;  %9523 = vmatprep.subr.bf16.mxu1 %v10803_v1  ;;  %v10817_v50 = vld [vmem:[%s15488_s2 + $0x50] ss:$12 sps:$4 sm:$0xff]   ;;  %v10813_v32 = vld [vmem:[%s15488_s2 + $0x798] ss:$12 sps:$4 sm:$0xff]  }
 0x263   :  { %4855 = vmatmul.mubr.bf16.gmra.mxu0 %v12617_v46  ;;  %v3422_v42 = vpop.f32.mrf.mxu1  ;;  %v3505_v37 = vpop.f32.mrf.mxu0  ;;  %4627 = vmatprep.mubr.bf16.mxu1 %v12672_v8  ;;  %v10820_v1 = vld [vmem:[%s15488_s2 + $0x784] ss:$12 sps:$4 sm:$0xff]  }
 0x264   :  { %5852 = vmatpush1.bf16.msra.mxu0 %v10795_v17  ;;  %4862 = vmatprep.mubr.bf16.mxu0 %v12672_v8  ;;  %v13493_v12 = vadd.f32 %v3505_v37, %v3422_v42  ;;  %v10826_v37 = vld [vmem:[%s15488_s2 + $0xe0] ss:$12 sps:$4 sm:$0xff]  }
 0x265   :  { %5853 = vmatprep.subr.bf16.mxu0 %v10802_v47  ;;  %v13499_v25 = vpop.f32.mrf.mxu1  ;;  %v13501_v41 = vpop.f32.mrf.mxu0  ;;  %9524 = vmatpush3.bf16.msra.mxu1 %v10807_v58  ;;  %v10822_v58 = vld [vmem:[%s15488_s2 + $0x38] ss:$12 sps:$4 sm:$0xff]  }
 0x266   :  { %9525 = vmatprep.subr.bf16.mxu1 %v10811_v9 }
 0x268   :  { %5854 = vmatpush1.bf16.msra.mxu0 %v10800_v61 }
 0x269   :  { %5855 = vmatprep.subr.bf16.mxu0 %v10806_v54  ;;  %v3428_v27 = vpop.f32.mrf.mxu1  ;;  %9526 = vmatpush3.bf16.msra.mxu1 %v10812_v62  ;;  %v10818_v54 = vld [vmem:[%s15488_s2 + $0x780] ss:$12 sps:$4 sm:$0xff]  }
 0x26a   :  { %4628 = vmatmul.mubr.bf16.gmra.mxu1 %v12660_v31  ;;  %9527 = vmatprep.subr.bf16.mxu1 %v10816_v60 }
 0x26b   :  { %v3511_v16 = vpop.f32.mrf.mxu0  ;;  %4863 = vmatmul.mubr.bf16.gmra.mxu0 %v12660_v31  ;;  %v3430_v11 = vpop.f32.mrf.mxu1  ;;  %4637 = vmatprep.mubr.bf16.mxu1 %v12747_v51 }
 0x26c   :  { %v13516_v5 = vadd.f32 %v3511_v16, %v3428_v27  ;;  %5856 = vmatpush1.bf16.msra.mxu0 %v10804_v44  ;;  %4870 = vmatprep.mubr.bf16.mxu0 %v12747_v51  ;;  %v10830_v16 = vld [vmem:[%s15488_s2 + $0x20] ss:$12 sps:$4 sm:$0xff]  }
 0x26d   :  { %v3513_v55 = vpop.f32.mrf.mxu0  ;;  %5857 = vmatprep.subr.bf16.mxu0 %v10810_v22  ;;  %v3432_v14 = vpop.f32.mrf.mxu1  ;;  %9528 = vmatpush3.bf16.msra.mxu1 %v10817_v50  ;;  %v10825_v22 = vld [vmem:[%s15488_s2 + $0x8ec] ss:$12 sps:$4 sm:$0xff]  }
 0x26e   :  { %v13523_v19 = vadd.f32 %v3513_v55, %v3430_v11  ;;  %9529 = vmatprep.subr.bf16.mxu1 %v10821_v38  ;;  %v15508_v55 = vrot.slane %v12619_v45, 2  ;;  %v10829_v38 = vld [vmem:[%s15488_s2 + $0x8d4] ss:$12 sps:$4 sm:$0xff]  }
 0x26f   :  { %v3515_v17 = vpop.f32.mrf.mxu0  ;;  %v13537_v47 = vpop.f32.mrf.mxu1 }
 0x270   :  { %v13535_v57 = vadd.f32 %v3515_v17, %v3432_v14  ;;  %5858 = vmatpush1.bf16.msra.mxu0 %v10808_v33  ;;  %v10823_v14 = vld [vmem:[%s15488_s2 + $0x8e8] ss:$12 sps:$4 sm:$0xff]   ;;  %v5130_v17 = vrot.slane %v12593_v4, 2 }
 0x271   :  { %v13539_v53 = vpop.f32.mrf.mxu0  ;;  %5859 = vmatprep.subr.bf16.mxu0 %v10815_v20  ;;  %9530 = vmatpush3.bf16.msra.mxu1 %v10822_v58 }
 0x272   :  { %v3438_v61 = vpop.f32.mrf.mxu1  ;;  %4638 = vmatmul.mubr.bf16.gmra.mxu1 %v12733_v35  ;;  %9531 = vmatprep.subr.bf16.mxu1 %v10826_v37 }
 0x273   :  { %4871 = vmatmul.mubr.bf16.gmra.mxu0 %v12733_v35  ;;  %v3521_v42 = vpop.f32.mrf.mxu0  ;;  %4647 = vmatprep.mubr.bf16.mxu1 %v12833_v6 }
 0x274   :  { %5860 = vmatpush1.bf16.msra.mxu0 %v10813_v32  ;;  %v13555_v9 = vadd.f32 %v3521_v42, %v3438_v61  ;;  %4878 = vmatprep.mubr.bf16.mxu0 %v12833_v6  ;;  %v3440_v44 = vpop.f32.mrf.mxu1  ;;  %v10834_v32 = vld [vmem:[%s15488_s2 + $0xc8] ss:$12 sps:$4 sm:$0xff]   ;;  %v13591_v61 = vsel %vm5126_vm5, %v5130_v17, %v15508_v55  ;;  %v10831_v17 = vld [vmem:[%s15488_s2 + $0x8b8] ss:$12 sps:$4 sm:$0xff]  }
 0x275   :  { %v3523_v27 = vpop.f32.mrf.mxu0  ;;  %5861 = vmatprep.subr.bf16.mxu0 %v10820_v1  ;;  %9532 = vmatpush3.bf16.msra.mxu1 %v10830_v16  ;;  %15597 = vst [vmem:[#allocation32_spill] sm:$0xff] %v13591_v61  ;;  %v10835_v42 = vld [vmem:[%s15488_s2 + $0x8] ss:$12 sps:$4 sm:$0xff]  }
 0x276   :  { %v13565_v62 = vadd.f32 %v3523_v27, %v3440_v44  ;;  %v3442_v60 = vpop.f32.mrf.mxu1  ;;  %9533 = vmatprep.subr.bf16.mxu1 %v10834_v32  ;;  %v10838_v32 = vld [vmem:[%s15488_s2 + $0x8a4] ss:$12 sps:$4 sm:$0xff]  }
 0x277   :  { %v3525_v11 = vpop.f32.mrf.mxu0 }
 0x278   :  { %5862 = vmatpush1.bf16.msra.mxu0 %v10818_v54  ;;  %v13571_v33 = vadd.f32 %v3525_v11, %v3442_v60  ;;  %v13576_v20 = vpop.f32.mrf.mxu1  ;;  %v10827_v54 = vld [vmem:[%s15488_s2 + $0x8d0] ss:$12 sps:$4 sm:$0xff]  }
 0x279   :  { %15595 = vst [vmem:[#allocation7_spill] sm:$0xff] %v13576_v20  ;;  %v13578_v50 = vpop.f32.mrf.mxu0  ;;  %5863 = vmatprep.subr.bf16.mxu0 %v10825_v22  ;;  %v10833_v22 = vld [vmem:[%s15488_s2 + $0x8bc] ss:$12 sps:$4 sm:$0xff]   ;;  %9534 = vmatpush3.bf16.msra.mxu1 %v10835_v42 }
 0x27a   :  { %15596 = vst [vmem:[#allocation4_spill] sm:$0xff] %v13578_v50  ;;  %v3448_v1 = vpop.f32.mrf.mxu1  ;;  %4648 = vmatmul.mubr.bf16.gmra.mxu1 %v12853_v3  ;;  %9979 = vmatprep.subr.bf16.mxu1 %v15509_v26  ;;  %v3508_v50 = vadd.f32 %v13501_v41, %v13499_v25  ;;  %v10855_v25 = vld [vmem:[%s15488_s2 + $0x350] ss:$12 sps:$4 sm:$0xff]  }
 0x27b   :  { %4879 = vmatmul.mubr.bf16.gmra.mxu0 %v12853_v3  ;;  %v3531_v58 = vpop.f32.mrf.mxu0  ;;  %4773 = vmatprep.mubr.bf16.mxu1 %v12593_v4  ;;  %v3518_v3 = vadd.f32 %v13539_v53, %v13537_v47  ;;  %v15604_v53 = vrot.slane %v12619_v45, 2 }
 0x27c   :  { %5864 = vmatpush2.bf16.msra.mxu0 %v10823_v14  ;;  %v13597_v37 = vadd.f32 %v3531_v58, %v3448_v1  ;;  %5879 = vmatprep.mubr.bf16.mxu0 %v13591_v61  ;;  %v3450_v44 = vpop.f32.mrf.mxu1  ;;  %v10839_v1 = vld [vmem:[%s15488_s2 + $0x3b0] ss:$12 sps:$4 sm:$0xff]   ;;  %v5128_v61 = vrot.slane %v12612_v0, 2 }
 0x27d   :  { %v3533_v27 = vpop.f32.mrf.mxu0  ;;  %5865 = vmatprep.subr.bf16.mxu0 %v10829_v38 }
 0x27e   :  { %v13607_v16 = vadd.f32 %v3533_v27, %v3450_v44  ;;  %v3452_v60 = vpop.f32.mrf.mxu1  ;;  %v10836_v44 = vld [vmem:[%s15488_s2 + $0x8a0] ss:$12 sps:$4 sm:$0xff]   ;;  %v13737_v47 = vsel %vm5126_vm5, %v5127_v40, %v5128_v61 }
 0x27f   :  { %v3535_v11 = vpop.f32.mrf.mxu0  ;;  %15603 = vst [vmem:[#allocation12_spill] sm:$0xff] %v13737_v47 }
 0x280   :  { %5866 = vmatpush2.bf16.msra.mxu0 %v10827_v54  ;;  %v13609_v14 = vadd.f32 %v3535_v11, %v3452_v60  ;;  %v13615_v4 = vpop.f32.mrf.mxu1  ;;  %v10842_v60 = vld [vmem:[%s15488_s2 + $0x88c] ss:$12 sps:$4 sm:$0xff]  }
 0x281   :  { %15598 = vst [vmem:[#allocation8_spill] sm:$0xff] %v13615_v4  ;;  %v13617_v38 = vpop.f32.mrf.mxu0  ;;  %5867 = vmatprep.subr.bf16.mxu0 %v10833_v22  ;;  %v10843_v11 = vld [vmem:[%s15488_s2 + $0x398] ss:$12 sps:$4 sm:$0xff]  }
 0x282   :  { %15599 = vst [vmem:[#allocation9_spill] sm:$0xff] %v13617_v38  ;;  %v3458_v58 = vpop.f32.mrf.mxu1  ;;  %4774 = vmatmul.mubr.bf16.vlgmr.msra.gmra.mxu1 %v12584_v29 }
 0x283   :  { %v3541_v42 = vpop.f32.mrf.mxu0  ;;  %4781 = vmatprep.mubr.bf16.mxu1 %v12619_v45  ;;  %9980 = vmatpush3.bf16.msra.mxu1 %v10839_v1  ;;  %v10860_v45 = vld [vmem:[%s15488_s2 + $0xb10] ss:$12 sps:$4 sm:$0xff]  }
 0x284   :  { %5868 = vmatpush2.bf16.msra.mxu0 %v10831_v17  ;;  %v13626_v54 = vadd.f32 %v3541_v42, %v3458_v58  ;;  %v3460_v27 = vpop.f32.mrf.mxu1  ;;  %9981 = vmatprep.subr.bf16.mxu1 %v15509_v26 }
 0x285   :  { %v3543_v22 = vpop.f32.mrf.mxu0  ;;  %5869 = vmatprep.subr.bf16.mxu0 %v10838_v32  ;;  %v10840_v32 = vld [vmem:[%s15488_s2 + $0x888] ss:$12 sps:$4 sm:$0xff]  }
 0x286   :  { %v13638_v17 = vadd.f32 %v3543_v22, %v3460_v27  ;;  %v3462_v58 = vpop.f32.mrf.mxu1  ;;  %v10846_v27 = vld [vmem:[%s15488_s2 + $0x874] ss:$12 sps:$4 sm:$0xff]  }
 0x287   :  { %v3545_v42 = vpop.f32.mrf.mxu0  ;;  %9982 = vmatpush3.bf16.msra.mxu1 %v10843_v11 }
 0x288   :  { %5870 = vmatpush2.bf16.msra.mxu0 %v10836_v44  ;;  %v13641_v55 = vadd.f32 %v3545_v42, %v3462_v58  ;;  %v13646_v1 = vpop.f32.mrf.mxu1  ;;  %v10850_v44 = vld [vmem:[%s15488_s2 + $0x380] ss:$12 sps:$4 sm:$0xff]   ;;  %9983 = vmatprep.subr.bf16.mxu1 %v15509_v26  ;;  %v10849_v26 = vld [vmem:[%s15488_s2 + $0x85c] ss:$12 sps:$4 sm:$0xff]  }
 0x289   :  { %15600 = vst [vmem:[#allocation10_spill] sm:$0xff] %v13646_v1  ;;  %v13648_v38 = vpop.f32.mrf.mxu0  ;;  %5871 = vmatprep.subr.bf16.mxu0 %v10842_v60  ;;  %v10844_v60 = vld [vmem:[%s15488_s2 + $0x870] ss:$12 sps:$4 sm:$0xff]  }
 0x28a   :  { %15601 = vst [vmem:[#allocation11_spill] sm:$0xff] %v13648_v38  ;;  %4782 = vmatmul.mubr.bf16.gmra.mxu1 %v12612_v0  ;;  %v3584_v58 = vpop.f32.mrf.mxu1 }
 0x28b   :  { %v9476_v22 = vpop.f32.mrf.mxu0  ;;  %v13662_v11 = vadd.f32 %v3584_v58, %v13471_v34  ;;  %4789 = vmatprep.mubr.bf16.mxu1 %v12662_v23  ;;  %9984 = vmatpush3.bf16.msra.mxu1 %v10850_v44  ;;  %v15602_v34 = vmov 0.0   ;;  %v10847_v44 = vld [vmem:[%s15488_s2 + $0x858] ss:$12 sps:$4 sm:$0xff]  }
 0x28c   :  { %5872 = vmatpush2.bf16.msra.mxu0 %v10840_v32  ;;  %v3586_v38 = vpop.f32.mrf.mxu1  ;;  %v10854_v32 = vld [vmem:[%s15488_s2 + $0x368] ss:$12 sps:$4 sm:$0xff]   ;;  %9985 = vmatprep.subr.bf16.mxu1 %v15602_v34 }
 0x28d   :  { %v9477_v42 = vpop.f32.mrf.mxu0  ;;  %5873 = vmatprep.subr.bf16.mxu0 %v10846_v27  ;;  %v13674_v4 = vadd.f32 %v3586_v38, %v13480_v48  ;;  %v10853_v48 = vld [vmem:[%s15488_s2 + $0x844] ss:$12 sps:$4 sm:$0xff]  }
 0x28e   :  { %v13671_v1 = vadd.f32 %v9477_v42, %v9476_v22  ;;  %v3588_v27 = vpop.f32.mrf.mxu1 }
 0x28f   :  { %v13677_v58 = vpop.f32.mrf.mxu0  ;;  %v13685_v20 = vadd.f32 %v3588_v27, %v13493_v12  ;;  %9986 = vmatpush3.bf16.msra.mxu1 %v10854_v32  ;;  %v10856_v27 = vld [vmem:[%s15488_s2 + $0x338] ss:$12 sps:$4 sm:$0xff]  }
 0x290   :  { %5874 = vmatpush2.bf16.msra.mxu0 %v10844_v60  ;;  %v3590_v38 = vpop.f32.mrf.mxu1  ;;  %9987 = vmatprep.subr.bf16.mxu1 %v15602_v34 }
 0x291   :  { %v13687_v22 = vpop.f32.mrf.mxu0  ;;  %5875 = vmatprep.subr.bf16.mxu0 %v10849_v26  ;;  %v13695_v41 = vadd.f32 %v3590_v38, %v3508_v50  ;;  %v10851_v26 = vld [vmem:[%s15488_s2 + $0x840] ss:$12 sps:$4 sm:$0xff]  }
 0x292   :  { %4790 = vmatmul.mubr.bf16.gmra.mxu1 %v12656_v30  ;;  %v3594_v12 = vpop.f32.mrf.mxu1 }
 0x293   :  { %v9482_v60 = vpop.f32.mrf.mxu0  ;;  %v13703_v42 = vadd.f32 %v3594_v12, %v13516_v5  ;;  %4797 = vmatprep.mubr.bf16.mxu1 %v12735_v10  ;;  %9988 = vmatpush3.bf16.msra.mxu1 %v10855_v25  ;;  %v5144_v25 = vrot.slane %v12662_v23, 2  ;;  %v10863_v23 = vld [vmem:[%s15488_s2 + $0x320] ss:$12 sps:$4 sm:$0xff]  }
 0x294   :  { %5876 = vmatpush2.bf16.msra.mxu0 %v10847_v44  ;;  %v3596_v50 = vpop.f32.mrf.mxu1  ;;  %v10859_v44 = vld [vmem:[%s15488_s2 + $0xb2c] ss:$12 sps:$4 sm:$0xff]   ;;  %9989 = vmatprep.subr.bf16.mxu1 %v15602_v34 }
 0x295   :  { %v9483_v32 = vpop.f32.mrf.mxu0  ;;  %5877 = vmatprep.subr.bf16.mxu0 %v10853_v48  ;;  %v13716_v5 = vadd.f32 %v3596_v50, %v13523_v19 }
 0x296   :  { %v13712_v38 = vadd.f32 %v9483_v32, %v9482_v60  ;;  %v3598_v12 = vpop.f32.mrf.mxu1  ;;  %v10857_v32 = vld [vmem:[%s15488_s2 + $0xb28] ss:$12 sps:$4 sm:$0xff]  }
 0x297   :  { %v13719_v48 = vpop.f32.mrf.mxu0  ;;  %v13726_v60 = vadd.f32 %v3598_v12, %v13535_v57  ;;  %9990 = vmatpush3.bf16.msra.mxu1 %v10856_v27  ;;  %v10862_v57 = vld [vmem:[%s15488_s2 + $0xb14] ss:$12 sps:$4 sm:$0xff]  }
 0x298   :  { %5878 = vmatpush2.bf16.msra.mxu0 %v10851_v26  ;;  %v3600_v19 = vpop.f32.mrf.mxu1  ;;  %9991 = vmatprep.subr.bf16.mxu1 %v15602_v34  ;;  %v13749_v26 = vsel %vm5126_vm5, %v15604_v53, %v5144_v25  ;;  %v10867_v12 = vld [vmem:[%s15488_s2 + $0x308] ss:$12 sps:$4 sm:$0xff]   ;;  %v5142_v53 = vrot.slane %v12656_v30, 2 }
 0x299   :  { %v13728_v0 = vpop.f32.mrf.mxu0  ;;  %6013 = vmatprep.subr.bf16.mxu0 %v10859_v44  ;;  %v13739_v29 = vadd.f32 %v3600_v19, %v3518_v3  ;;  %15605 = vst [vmem:[#allocation5_spill] sm:$0xff] %v13749_v26 }
 0x29a   :  { %4798 = vmatmul.mubr.bf16.gmra.mxu1 %v12725_v13  ;;  %v3604_v40 = vpop.f32.mrf.mxu1 }
 0x29b   :  { %5880 = vmatmul.mubr.bf16.vlgmr.msra.gmra.mxu0 %v13737_v47  ;;  %v9488_v50 = vpop.f32.mrf.mxu0  ;;  %v13754_v3 = vadd.f32 %v3604_v40, %v13555_v9  ;;  %4805 = vmatprep.mubr.bf16.mxu1 %v12831_v24 }
 0x29c   :  { %5889 = vmatprep.mubr.bf16.mxu0 %v13749_v26  ;;  %v3606_v44 = vpop.f32.mrf.mxu1  ;;  %6014 = vmatpush1.bf16.msra.mxu0 %v10857_v32  ;;  %v10866_v32 = vld [vmem:[%s15488_s2 + $0xafc] ss:$12 sps:$4 sm:$0xff]   ;;  %v13790_v26 = vsel %vm5126_vm5, %v5128_v61, %v5142_v53 }
 0x29d   :  { %v9489_v27 = vpop.f32.mrf.mxu0  ;;  %9992 = vmatpush3.bf16.msra.mxu1 %v10863_v23  ;;  %v13767_v9 = vadd.f32 %v3606_v44, %v13565_v62  ;;  %6015 = vmatprep.subr.bf16.mxu0 %v10862_v57  ;;  %v10873_v23 = vld [vmem:[%s15488_s2 + $0x9ac] ss:$12 sps:$4 sm:$0xff]   ;;  %15607 = vst [vmem:[#allocation14_spill] sm:$0xff] %v13790_v26 }
 0x29e   :  { %v13763_v19 = vadd.f32 %v9489_v27, %v9488_v50  ;;  %9993 = vmatprep.subr.bf16.mxu1 %v15602_v34  ;;  %v5154_v50 = vrot.slane %v12735_v10, 2  ;;  %v3608_v27 = vpop.f32.mrf.mxu1  ;;  %v10864_v44 = vld [vmem:[%s15488_s2 + $0xaf8] ss:$12 sps:$4 sm:$0xff]  }
 0x29f   :  { %v13776_v40 = vpop.f32.mrf.mxu0  ;;  %v13780_v30 = vadd.f32 %v3608_v27, %v13571_v33  ;;  %v10870_v10 = vld [vmem:[%s15488_s2 + $0xae4] ss:$12 sps:$4 sm:$0xff]  }
 0x2a0   :  { %v13784_v57 = vpop.f32.mrf.mxu1  ;;  %6016 = vmatpush1.bf16.msra.mxu0 %v10860_v45  ;;  %v13797_v33 = vsel %vm5126_vm5, %v5144_v25, %v5154_v50  ;;  %v10868_v25 = vld [vmem:[%s15488_s2 + $0xae0] ss:$12 sps:$4 sm:$0xff]  }
 0x2a1   :  { %v13782_v62 = vpop.f32.mrf.mxu0  ;;  %15606 = vst [vmem:[#allocation13_spill] sm:$0xff] %v13784_v57  ;;  %9994 = vmatpush3.bf16.msra.mxu1 %v10867_v12  ;;  %6017 = vmatprep.subr.bf16.mxu0 %v10866_v32  ;;  %15608 = vst [vmem:[#allocation15_spill] sm:$0xff] %v13797_v33  ;;  %v5152_v57 = vrot.slane %v12725_v13, 2  ;;  %v10871_v13 = vld [vmem:[%s15488_s2 + $0x9a8] ss:$12 sps:$4 sm:$0xff]  }
 0x2a2   :  { %5930 = vmatprep.subr.bf16.mxu1 %v10873_v23  ;;  %4806 = vmatmul.mubr.bf16.gmra.mxu1 %v12825_v28  ;;  %v3614_v27 = vpop.f32.mrf.mxu1 }
 0x2a3   :  { %5890 = vmatmul.mubr.bf16.gmra.mxu0 %v13790_v26  ;;  %v9494_v45 = vpop.f32.mrf.mxu0  ;;  %v13802_v61 = vadd.f32 %v3614_v27, %v13597_v37  ;;  %9995 = vmatprep.mubr.msk.bf16.mxu1 %vm11067_vm4, %v15602_v34  ;;  %v10876_v37 = vld [vmem:[%s15488_s2 + $0xacc] ss:$12 sps:$4 sm:$0xff]   ;;  %v2294_v27 = vmax.f32 %v12820_v36, 0.0  ;;  %v10874_v36 = vld [vmem:[%s15488_s2 + $0xac8] ss:$12 sps:$4 sm:$0xff]  }
 0x2a4   :  { %5899 = vmatprep.mubr.bf16.mxu0 %v13797_v33  ;;  %v3616_v32 = vpop.f32.mrf.mxu1  ;;  %6018 = vmatpush1.bf16.msra.mxu0 %v10864_v44  ;;  %v5164_v44 = vrot.slane %v12831_v24, 2  ;;  %v10879_v24 = vld [vmem:[%s15488_s2 + $0x994] ss:$12 sps:$4 sm:$0xff]  }
 0x2a5   :  { %v9495_v12 = vpop.f32.mrf.mxu0  ;;  %v13813_v26 = vadd.f32 %v3616_v32, %v13607_v16  ;;  %6019 = vmatprep.subr.bf16.mxu0 %v10870_v10 }
 0x2a6   :  { %v13809_v23 = vadd.f32 %v9495_v12, %v9494_v45  ;;  %v3618_v47 = vpop.f32.mrf.mxu1  ;;  %v2324_v12 = vpack.c.bf16 %v2294_v27, %v2294_v27  ;;  %v13846_v32 = vsel %vm5126_vm5, %v5154_v50, %v5164_v44  ;;  %v10880_v50 = vld [vmem:[%s15488_s2 + $0xab0] ss:$12 sps:$4 sm:$0xff]  }
 0x2a7   :  { %v13819_v33 = vpop.f32.mrf.mxu0  ;;  %v13823_v45 = vadd.f32 %v3618_v47, %v13609_v14  ;;  %v13839_v14 = vsel %vm5126_vm5, %v5142_v53, %v5152_v57  ;;  %v10882_v47 = vld [vmem:[%s15488_s2 + $0xab4] ss:$12 sps:$4 sm:$0xff]   ;;  %15611 = vst [vmem:[#allocation18_spill] sm:$0xff] %v13846_v32 }
 0x2a8   :  { %v13830_v10 = vpop.f32.mrf.mxu1  ;;  %6020 = vmatpush1.bf16.msra.mxu0 %v10868_v25  ;;  %15610 = vst [vmem:[#allocation17_spill] sm:$0xff] %v13839_v14 }
 0x2a9   :  { %v13828_v16 = vpop.f32.mrf.mxu0  ;;  %15609 = vst [vmem:[#allocation16_spill] sm:$0xff] %v13830_v10  ;;  %6021 = vmatprep.subr.bf16.mxu0 %v10876_v37  ;;  %v10877_v37 = vld [vmem:[%s15488_s2 + $0x990] ss:$12 sps:$4 sm:$0xff]  }
 0x2aa   :  { %9996 = vmatmul.mubr.bf16.vlgmr.msra.gmra.mxu1 %v12938_v21  ;;  %v3624_v10 = vpop.f32.mrf.mxu1 }
 0x2ab   :  { %5900 = vmatmul.mubr.bf16.gmra.mxu0 %v13839_v14  ;;  %v9500_v25 = vpop.f32.mrf.mxu0  ;;  %5931 = vmatpush1.bf16.msra.mxu1 %v10871_v13  ;;  %v13851_v53 = vadd.f32 %v3624_v10, %v13626_v54  ;;  %v2293_v13 = vmax.f32 %v12804_v7, 0.0  ;;  %v5162_v10 = vrot.slane %v12825_v28, 2  ;;  %v10883_v28 = vld [vmem:[%s15488_s2 + $0x978] ss:$12 sps:$4 sm:$0xff]  }
 0x2ac   :  { %5909 = vmatprep.mubr.bf16.mxu0 %v13846_v32  ;;  %v3626_v6 = vpop.f32.mrf.mxu1  ;;  %5932 = vmatprep.subr.bf16.mxu1 %v10879_v24  ;;  %v10885_v32 = vld [vmem:[%s15488_s2 + $0x97c] ss:$12 sps:$4 sm:$0xff]   ;;  %v5174_v24 = vrot.slane %v2324_v12, 2 }
 0x2ad   :  { %v9501_v27 = vpop.f32.mrf.mxu0  ;;  %6022 = vmatpush1.bf16.msra.mxu0 %v10874_v36  ;;  %v13867_v14 = vadd.f32 %v3626_v6, %v13638_v17  ;;  %9999 = vmatprep.mubr.msk.bf16.mxu1 %vm11067_vm4, %v15602_v34  ;;  %v10888_v36 = vld [vmem:[%s15488_s2 + $0xa9c] ss:$12 sps:$4 sm:$0xff]   ;;  %v10886_v17 = vld [vmem:[%s15488_s2 + $0xa98] ss:$12 sps:$4 sm:$0xff]   ;;  %v2323_v12 = vpack.c.bf16 %v2293_v13, %v2293_v13 }
 0x2ae   :  { %v13863_v54 = vadd.f32 %v9501_v27, %v9500_v25  ;;  %6023 = vmatprep.subr.bf16.mxu0 %v10882_v47  ;;  %v3628_v43 = vpop.f32.mrf.mxu1  ;;  %v10891_v47 = vld [vmem:[%s15488_s2 + $0x964] ss:$12 sps:$4 sm:$0xff]   ;;  %v10892_v27 = vld [vmem:[%s15488_s2 + $0xa80] ss:$12 sps:$4 sm:$0xff]  }
 0x2af   :  { %5933 = vmatpush1.bf16.msra.mxu1 %v10877_v37  ;;  %v13875_v7 = vadd.f32 %v3628_v43, %v13641_v55  ;;  %v13889_v43 = vsel %vm5126_vm5, %v5152_v57, %v5162_v10  ;;  %v10894_v55 = vld [vmem:[%s15488_s2 + $0xa84] ss:$12 sps:$4 sm:$0xff]   ;;  %v10889_v57 = vld [vmem:[%s15488_s2 + $0x960] ss:$12 sps:$4 sm:$0xff]  }
 0x2b0   :  { %v13880_v6 = vpop.f32.mrf.mxu1  ;;  %5934 = vmatprep.subr.bf16.mxu1 %v10885_v32  ;;  %v13896_v32 = vsel %vm5126_vm5, %v5164_v44, %v5174_v24  ;;  %v10897_v44 = vld [vmem:[%s15488_s2 + $0x94c] ss:$12 sps:$4 sm:$0xff]  }
 0x2b1   :  { %15612 = vst [vmem:[#allocation19_spill] sm:$0xff] %v13880_v6  ;;  %6024 = vmatpush1.bf16.msra.mxu0 %v10880_v50  ;;  %v5172_v50 = vrot.slane %v2323_v12, 2  ;;  %v10900_v12 = vld [vmem:[%s15488_s2 + $0x934] ss:$12 sps:$4 sm:$0xff]  }
 0x2b2   :  { %6025 = vmatprep.subr.bf16.mxu0 %v10888_v36  ;;  %10000 = vmatmul.mubr.bf16.gmra.mxu1 %v12963_v59  ;;  %v9430_v25 = vpop.f32.mrf.mxu1  ;;  %v10904_v36 = vld [vmem:[%s15488_s2 + $0xa70] ss:$12 sps:$4 sm:$0xff]  }
 0x2b3   :  { %5910 = vmatmul.mubr.bf16.gmra.mxu0 %v13889_v43  ;;  %5935 = vmatpush1.bf16.msra.mxu1 %v10883_v28  ;;  %v10895_v28 = vld [vmem:[%s15488_s2 + $0x948] ss:$12 sps:$4 sm:$0xff]  }
 0x2b4   :  { %5919 = vmatprep.mubr.bf16.mxu0 %v13896_v32  ;;  %v9431_v37 = vpop.f32.mrf.mxu1  ;;  %5936 = vmatprep.subr.bf16.mxu1 %v10891_v47 }
 0x2b5   :  { %6026 = vmatpush1.bf16.msra.mxu0 %v10886_v17  ;;  %v9432_v13 = vadd.f32 %v9431_v37, %v9430_v25  ;;  %10003 = vmatprep.mubr.msk.bf16.mxu1 %vm11067_vm4, %v15602_v34  ;;  %v13926_v25 = vsel %vm5126_vm5, %v5162_v10, %v5172_v50  ;;  %v10898_v37 = vld [vmem:[%s15488_s2 + $0x930] ss:$12 sps:$4 sm:$0xff]   ;;  %v5140_v10 = vrot.slane %v12963_v59, 2 }
 0x2b6   :  { %6027 = vmatprep.subr.bf16.mxu0 %v10894_v55  ;;  %v9433_v24 = vpop.f32.mrf.mxu1  ;;  %v9481_v55 = vadd.f32 %v13687_v22, %v13677_v58  ;;  %v10903_v22 = vld [vmem:[%s15488_s2 + $0x91c] ss:$12 sps:$4 sm:$0xff]  }
 0x2b7   :  { %5937 = vmatpush1.bf16.msra.mxu1 %v10889_v57  ;;  %v13918_v17 = vadd.f32 %v13671_v1, %v9432_v13  ;;  %v5139_v13 = vrot.slane %v12938_v21, 2  ;;  %v10908_v59 = vld [vmem:[%s15488_s2 + $0x9b0] ss:$12 sps:$4 sm:$0xff]   ;;  %v9487_v21 = vadd.f32 %v13728_v0, %v13719_v48  ;;  %v10905_v48 = vld [vmem:[%s15488_s2 + $0x900] ss:$12 sps:$4 sm:$0xff]  }
 0x2b8   :  { %v9434_v47 = vpop.f32.mrf.mxu1  ;;  %5938 = vmatprep.subr.bf16.mxu1 %v10897_v44 }
 0x2b9   :  { %6028 = vmatpush1.bf16.msra.mxu0 %v10892_v27  ;;  %v9435_v57 = vadd.f32 %v9434_v47, %v9433_v24  ;;  %v10907_v47 = vld [vmem:[%s15488_s2 + $0x904] ss:$12 sps:$4 sm:$0xff]  }
 0x2ba   :  { %9670 = vmatprep.subr.bf16.mxu0 %v10904_v36  ;;  %10004 = vmatmul.mubr.bf16.gmra.mxu1 %v12990_v49  ;;  %v9436_v1 = vpop.f32.mrf.mxu1  ;;  %v10901_v36 = vld [vmem:[%s15488_s2 + $0x918] ss:$12 sps:$4 sm:$0xff]  }
 0x2bb   :  { %5920 = vmatmul.mubr.bf16.gmra.mxu0 %v13926_v25  ;;  %5939 = vmatpush1.bf16.msra.mxu1 %v10895_v28  ;;  %v13934_v27 = vadd.f32 %v9481_v55, %v9435_v57 }
 0x2bc   :  { %6045 = vmatprep.mubr.bf16.mxu0 %v15589_v56  ;;  %v9437_v58 = vpop.f32.mrf.mxu1  ;;  %5940 = vmatprep.subr.bf16.mxu1 %v10900_v12  ;;  %v13958_v12 = vsel %vm5126_vm5, %v5139_v13, %v5140_v10  ;;  %v10914_v13 = vld [vmem:[%s15488_s2 + $0xa40] ss:$12 sps:$4 sm:$0xff]  }
 0x2bd   :  { %10007 = vmatprep.mubr.msk.bf16.mxu1 %vm11067_vm4, %v15602_v34  ;;  %v9438_v44 = vadd.f32 %v9437_v58, %v9436_v1  ;;  %v13971_v1 = vpop.f32.mrf.mxu0  ;;  %v10912_v58 = vld [vmem:[%s15488_s2 + $0xa6c] ss:$12 sps:$4 sm:$0xff]  }
 0x2be   :  { %v9439_v50 = vpop.f32.mrf.mxu1 }
 0x2bf   :  { %5941 = vmatpush1.bf16.msra.mxu1 %v10898_v37  ;;  %v13947_v24 = vadd.f32 %v13712_v38, %v9438_v44  ;;  %v10909_v38 = vld [vmem:[%s15488_s2 + $0xa58] ss:$12 sps:$4 sm:$0xff]   ;;  %v5150_v44 = vrot.slane %v12990_v49, 2  ;;  %v13992_v49 = vpop.f32.mrf.mxu0 }
 0x2c0   :  { %v9440_v28 = vpop.f32.mrf.mxu1  ;;  %5942 = vmatprep.subr.bf16.mxu1 %v10903_v22  ;;  %v10913_v22 = vld [vmem:[%s15488_s2 + $0x998] ss:$12 sps:$4 sm:$0xff]  }
 0x2c1   :  { %v9441_v55 = vadd.f32 %v9440_v28, %v9439_v50  ;;  %v15520_v28 = vrot.slane %v12621_v39, 2 }
 0x2c2   :  { %10008 = vmatmul.mubr.bf16.gmra.mxu1 %v13025_v63  ;;  %v9442_v57 = vpop.f32.mrf.mxu1 }
 0x2c3   :  { %6046 = vmatmul.mubr.bf16.vlgmr.msra.gmra.mxu0 %v13958_v12  ;;  %5943 = vmatpush1.bf16.msra.mxu1 %v10901_v36  ;;  %v13969_v0 = vadd.f32 %v9487_v21, %v9441_v55  ;;  %v5136_v55 = vrot.slane %v12595_v15, 2 }
 0x2c4   :  { %6055 = vmatprep.mubr.bf16.mxu0 %v15589_v56  ;;  %v9443_v37 = vpop.f32.mrf.mxu1  ;;  %5944 = vmatprep.subr.bf16.mxu1 %v10907_v47  ;;  %v10910_v47 = vld [vmem:[%s15488_s2 + $0xa68] ss:$12 sps:$4 sm:$0xff]  }
 0x2c5   :  { %9671 = vmatpush3.bf16.msra.mxu0 %v10908_v59  ;;  %v9444_v50 = vadd.f32 %v9443_v37, %v9442_v57  ;;  %10011 = vmatprep.mubr.msk.bf16.mxu1 %vm11067_vm4, %v15602_v34  ;;  %v9493_v57 = vadd.f32 %v13782_v62, %v13776_v40  ;;  %v10919_v40 = vld [vmem:[%s15488_s2 + $0xa28] ss:$12 sps:$4 sm:$0xff]  }
 0x2c6   :  { %9672 = vmatprep.subr.bf16.mxu0 %v10909_v38  ;;  %v9445_v36 = vpop.f32.mrf.mxu1  ;;  %v10917_v38 = vld [vmem:[%s15488_s2 + $0xa54] ss:$12 sps:$4 sm:$0xff]  }
 0x2c7   :  { %5945 = vmatpush1.bf16.msra.mxu1 %v10905_v48  ;;  %v13990_v59 = vadd.f32 %v13763_v19, %v9444_v50  ;;  %v14001_v48 = vsel %vm5126_vm5, %v5140_v10, %v5150_v44  ;;  %v10918_v19 = vld [vmem:[%s15488_s2 + $0x980] ss:$12 sps:$4 sm:$0xff]   ;;  %v10915_v10 = vld [vmem:[%s15488_s2 + $0xa50] ss:$12 sps:$4 sm:$0xff]  }
 0x2c8   :  { %v9446_v21 = vpop.f32.mrf.mxu1  ;;  %5946 = vmatprep.subr.bf16.mxu1 %v10912_v58 }
 0x2c9   :  { %9673 = vmatpush3.bf16.msra.mxu0 %v10913_v22  ;;  %v9447_v37 = vadd.f32 %v9446_v21, %v9445_v36  ;;  %v14011_v22 = vsel %vm5126_vm5, %v5136_v55, %v15520_v28  ;;  %v10922_v21 = vld [vmem:[%s15488_s2 + $0xa3c] ss:$12 sps:$4 sm:$0xff]  }
 0x2ca   :  { %9674 = vmatprep.subr.bf16.mxu0 %v10914_v13  ;;  %10012 = vmatmul.mubr.bf16.gmra.mxu1 %v13063_v52  ;;  %v9448_v15 = vpop.f32.mrf.mxu1 }
 0x2cb   :  { %6056 = vmatmul.mubr.bf16.gmra.mxu0 %v14001_v48  ;;  %v4526_v58 = vpop.f32.mrf.mxu0  ;;  %5947 = vmatpush2.bf16.msra.mxu1 %v10910_v47  ;;  %v14023_v50 = vadd.f32 %v9493_v57, %v9447_v37  ;;  %v5160_v47 = vrot.slane %v13025_v63, 2  ;;  %v10923_v57 = vld [vmem:[%s15488_s2 + $0x968] ss:$12 sps:$4 sm:$0xff]   ;;  %v10920_v63 = vld [vmem:[%s15488_s2 + $0xa38] ss:$12 sps:$4 sm:$0xff]  }
 0x2cc   :  { %v14017_v62 = vadd.f32 %v4526_v58, %v13662_v11  ;;  %5962 = vmatprep.mubr.bf16.mxu1 %v14011_v22  ;;  %6065 = vmatprep.mubr.bf16.mxu0 %v15589_v56  ;;  %v9449_v36 = vpop.f32.mrf.mxu1 }
 0x2cd   :  { %v4528_v13 = vpop.f32.mrf.mxu0  ;;  %5948 = vmatprep.subr.bf16.mxu1 %v10917_v38  ;;  %v9450_v55 = vadd.f32 %v9449_v36, %v9448_v15  ;;  %9675 = vmatpush3.bf16.msra.mxu0 %v10918_v19  ;;  %v10924_v38 = vld [vmem:[%s15488_s2 + $0xa10] ss:$12 sps:$4 sm:$0xff]  }
 0x2ce   :  { %v14030_v11 = vadd.f32 %v4528_v13, %v13674_v4  ;;  %v9451_v58 = vpop.f32.mrf.mxu1  ;;  %9676 = vmatprep.subr.bf16.mxu0 %v10919_v40  ;;  %v10927_v40 = vld [vmem:[%s15488_s2 + $0xa24] ss:$12 sps:$4 sm:$0xff]   ;;  %v9499_v13 = vadd.f32 %v13828_v16, %v13819_v33  ;;  %v10925_v16 = vld [vmem:[%s15488_s2 + $0xa20] ss:$12 sps:$4 sm:$0xff]  }
 0x2cf   :  { %v4530_v37 = vpop.f32.mrf.mxu0  ;;  %5949 = vmatpush2.bf16.msra.mxu1 %v10915_v10  ;;  %v14046_v4 = vadd.f32 %v13809_v23, %v9450_v55  ;;  %v14057_v10 = vsel %vm5126_vm5, %v5150_v44, %v5160_v47  ;;  %v10928_v23 = vld [vmem:[%s15488_s2 + $0x950] ss:$12 sps:$4 sm:$0xff]   ;;  %v10929_v33 = vld [vmem:[%s15488_s2 + $0x9f8] ss:$12 sps:$4 sm:$0xff]  }
 0x2d0   :  { %v14040_v28 = vadd.f32 %v4530_v37, %v13685_v20  ;;  %v9452_v15 = vpop.f32.mrf.mxu1  ;;  %5950 = vmatprep.subr.bf16.mxu1 %v10922_v21 }
 0x2d1   :  { %v4532_v19 = vpop.f32.mrf.mxu0  ;;  %v9453_v36 = vadd.f32 %v9452_v15, %v9451_v58  ;;  %9677 = vmatpush3.bf16.msra.mxu0 %v10923_v57  ;;  %v2297_v57 = vmax.f32 %v13066_v2, 0.0  ;;  %v10933_v15 = vld [vmem:[%s15488_s2 + $0x938] ss:$12 sps:$4 sm:$0xff]  }
 0x2d2   :  { %v14054_v20 = vadd.f32 %v4532_v19, %v13695_v41  ;;  %v9454_v55 = vpop.f32.mrf.mxu1  ;;  %9678 = vmatprep.subr.bf16.mxu0 %v10924_v38  ;;  %v10932_v38 = vld [vmem:[%s15488_s2 + $0xa0c] ss:$12 sps:$4 sm:$0xff]  }
 0x2d3   :  { %6066 = vmatmul.mubr.bf16.gmra.mxu0 %v14057_v10  ;;  %v4536_v21 = vpop.f32.mrf.mxu0  ;;  %5951 = vmatpush2.bf16.msra.mxu1 %v10920_v63  ;;  %v14073_v44 = vadd.f32 %v9499_v13, %v9453_v36  ;;  %v5170_v63 = vrot.slane %v13063_v52, 2  ;;  %v10930_v52 = vld [vmem:[%s15488_s2 + $0xa08] ss:$12 sps:$4 sm:$0xff]  }
 0x2d4   :  { %v14067_v41 = vadd.f32 %v4536_v21, %v13703_v42  ;;  %6075 = vmatprep.mubr.bf16.mxu0 %v15589_v56  ;;  %v9455_v58 = vpop.f32.mrf.mxu1  ;;  %5952 = vmatprep.subr.bf16.mxu1 %v10927_v40  ;;  %v10934_v40 = vld [vmem:[%s15488_s2 + $0x9e0] ss:$12 sps:$4 sm:$0xff]  }
 0x2d5   :  { %v4538_v37 = vpop.f32.mrf.mxu0  ;;  %v9456_v19 = vadd.f32 %v9455_v58, %v9454_v55  ;;  %9679 = vmatpush3.bf16.msra.mxu0 %v10928_v23  ;;  %v2327_v23 = vpack.c.bf16 %v2297_v57, %v2297_v57 }
 0x2d6   :  { %v14080_v42 = vadd.f32 %v4538_v37, %v13716_v5  ;;  %v9457_v2 = vpop.f32.mrf.mxu1  ;;  %9680 = vmatprep.subr.bf16.mxu0 %v10929_v33  ;;  %v10937_v33 = vld [vmem:[%s15488_s2 + $0x9f4] ss:$12 sps:$4 sm:$0xff]   ;;  %v14107_v37 = vsel %vm5126_vm5, %v5160_v47, %v5170_v63  ;;  %v10935_v47 = vld [vmem:[%s15488_s2 + $0x9f0] ss:$12 sps:$4 sm:$0xff]  }
 0x2d7   :  { %v4540_v13 = vpop.f32.mrf.mxu0  ;;  %5953 = vmatpush2.bf16.msra.mxu1 %v10925_v16  ;;  %v14096_v5 = vadd.f32 %v13863_v54, %v9456_v19  ;;  %v10938_v54 = vld [vmem:[%s15488_s2 + $0x920] ss:$12 sps:$4 sm:$0xff]  }
 0x2d8   :  { %v14090_v36 = vadd.f32 %v4540_v13, %v13726_v60  ;;  %v9458_v55 = vpop.f32.mrf.mxu1  ;;  %5954 = vmatprep.subr.bf16.mxu1 %v10932_v38  ;;  %v9505_v60 = vadd.f32 %v13992_v49, %v13971_v1  ;;  %v10939_v1 = vld [vmem:[%s15488_s2 + $0x9c8] ss:$12 sps:$4 sm:$0xff]  }
 0x2d9   :  { %v4542_v21 = vpop.f32.mrf.mxu0  ;;  %v9459_v58 = vadd.f32 %v9458_v55, %v9457_v2  ;;  %9681 = vmatpush3.bf16.msra.mxu0 %v10933_v15  ;;  %v5180_v2 = vrot.slane %v2327_v23, 2 }
 0x2da   :  { %v14104_v16 = vadd.f32 %v4542_v21, %v13739_v29  ;;  %v3813_v38 = vpop.f32.mrf.mxu1  ;;  %9682 = vmatprep.subr.bf16.mxu0 %v10934_v40 }
 0x2db   :  { %6076 = vmatmul.mubr.bf16.gmra.mxu0 %v14107_v37  ;;  %v4546_v57 = vpop.f32.mrf.mxu0  ;;  %5955 = vmatpush2.bf16.msra.mxu1 %v10930_v52  ;;  %v14120_v49 = vadd.f32 %v3813_v38, %v13918_v17  ;;  %v14126_v19 = vadd.f32 %v9505_v60, %v9459_v58  ;;  %v10946_v60 = vld [vmem:[%s15488_s2 + $0x9c4] ss:$12 sps:$4 sm:$0xff]   ;;  %v14152_v58 = vsel %vm5126_vm5, %v5170_v63, %v5180_v2  ;;  %v10944_v38 = vld [vmem:[%s15488_s2 + $0x9c0] ss:$12 sps:$4 sm:$0xff]   ;;  %v5133_v2 = vrot.slane %v12591_v18, 2 }
 0x2dc   :  { %v14117_v29 = vadd.f32 %v4546_v57, %v13754_v3  ;;  %6085 = vmatprep.mubr.bf16.mxu0 %v15589_v56  ;;  %v9961_v13 = vpop.f32.mrf.mxu1  ;;  %5956 = vmatprep.subr.bf16.mxu1 %v10937_v33  ;;  %v10942_v3 = vld [vmem:[%s15488_s2 + $0x9dc] ss:$12 sps:$4 sm:$0xff]  }
 0x2dd   :  { %v4548_v15 = vpop.f32.mrf.mxu0  ;;  %9683 = vmatpush3.bf16.msra.mxu0 %v10938_v54  ;;  %v10943_v56 = vld [vmem:[%s15488_s2 + $0x908] ss:$12 sps:$4 sm:$0xff]  }
 0x2de   :  { %v14132_v40 = vadd.f32 %v4548_v15, %v13767_v9  ;;  %v3816_v52 = vpop.f32.mrf.mxu1  ;;  %9684 = vmatprep.subr.bf16.mxu0 %v10939_v1  ;;  %v10940_v9 = vld [vmem:[%s15488_s2 + $0x9d8] ss:$12 sps:$4 sm:$0xff]  }
 0x2df   :  { %v4550_v17 = vpop.f32.mrf.mxu0  ;;  %5957 = vmatpush2.bf16.msra.mxu1 %v10935_v47  ;;  %v14141_v55 = vadd.f32 %v3816_v52, %v13934_v27  ;;  %v10947_v47 = vld [vmem:[%s15488_s2 + $0x8f0] ss:$12 sps:$4 sm:$0xff]  }
 0x2e0   :  { %v14138_v21 = vadd.f32 %v4550_v17, %v13780_v30  ;;  %v9962_v33 = vpop.f32.mrf.mxu1  ;;  %5958 = vmatprep.subr.bf16.mxu1 %v10942_v3 }
 0x2e1   :  { %v14146_v23 = vpop.f32.mrf.mxu0  ;;  %9685 = vmatpush3.bf16.msra.mxu0 %v10943_v56 }
 0x2e2   :  { %15613 = vst [vmem:[#allocation20_spill] sm:$0xff] %v14146_v23  ;;  %v3821_v27 = vpop.f32.mrf.mxu1 }
 0x2e3   :  { %6086 = vmatmul.mubr.bf16.gmra.mxu0 %v14152_v58  ;;  %v4556_v30 = vpop.f32.mrf.mxu0  ;;  %5959 = vmatpush2.bf16.msra.mxu1 %v10940_v9  ;;  %v14160_v57 = vadd.f32 %v3821_v27, %v13947_v24  ;;  %v5148_v24 = vrot.slane %v12672_v8, 2 }
 0x2e4   :  { %v14156_v54 = vadd.f32 %v4556_v30, %v13802_v61  ;;  %6201 = vmatprep.mubr.bf16.mxu0 %v14011_v22  ;;  %v9965_v1 = vpop.f32.mrf.mxu1  ;;  %5960 = vmatprep.subr.bf16.mxu1 %v10946_v60  ;;  %v5134_v22 = vrot.slane %v12617_v46, 2  ;;  %v10948_v46 = vld [vmem:[%s15488_s2 + $0x830] ss:$12 sps:$4 sm:$0xff]  }
 0x2e5   :  { %v4558_v63 = vpop.f32.mrf.mxu0 }
 0x2e6   :  { %v14169_v61 = vadd.f32 %v4558_v63, %v13813_v26  ;;  %v3824_v13 = vpop.f32.mrf.mxu1  ;;  %v5135_v8 = vsel %vm5126_vm5, %v5133_v2, %v5134_v22  ;;  %v10949_v26 = vld [vmem:[%s15488_s2 + $0x8d8] ss:$12 sps:$4 sm:$0xff]   ;;  %v5146_v63 = vrot.slane %v12660_v31, 2  ;;  %v10952_v31 = vld [vmem:[%s15488_s2 + $0x800] ss:$12 sps:$4 sm:$0xff]  }
 0x2e7   :  { %v4560_v15 = vpop.f32.mrf.mxu0  ;;  %5961 = vmatpush2.bf16.msra.mxu1 %v10944_v38  ;;  %v14178_v56 = vadd.f32 %v3824_v13, %v13969_v0  ;;  %v10950_v38 = vld [vmem:[%s15488_s2 + $0x818] ss:$12 sps:$4 sm:$0xff]  }
 0x2e8   :  { %v14174_v3 = vadd.f32 %v4560_v15, %v13823_v45  ;;  %v9966_v52 = vpop.f32.mrf.mxu1  ;;  %9624 = vmatprep.subr.bf16.mxu1 %v10947_v47  ;;  %v15615_v45 = vrot.slane %v12621_v39, 2 }
 0x2e9   :  { %v14180_v17 = vpop.f32.mrf.mxu0  ;;  %v5147_v52 = vsel %vm5126_vm5, %v5134_v22, %v5146_v63 }
 0x2ea   :  { %15614 = vst [vmem:[#allocation21_spill] sm:$0xff] %v14180_v17  ;;  %v5149_v0 = vsel %vm5126_vm5, %v15615_v45, %v5148_v24  ;;  %5963 = vmatmul.mubr.bf16.vlgmr.msra.gmra.mxu1 %v5135_v8  ;;  %v3829_v9 = vpop.f32.mrf.mxu1  ;;  %v5156_v45 = vrot.slane %v12733_v35, 2  ;;  %v10956_v35 = vld [vmem:[%s15488_s2 + $0x7d0] ss:$12 sps:$4 sm:$0xff]  }
 0x2eb   :  { %6202 = vmatmul.mubr.bf16.vlgmr.msra.gmra.mxu0 %v5135_v8  ;;  %v4566_v18 = vpop.f32.mrf.mxu0  ;;  %5972 = vmatprep.mubr.bf16.mxu1 %v5149_v0  ;;  %v14196_v60 = vadd.f32 %v3829_v9, %v13990_v59  ;;  %v5158_v59 = vrot.slane %v12747_v51, 2  ;;  %v10953_v51 = vld [vmem:[%s15488_s2 + $0x8a8] ss:$12 sps:$4 sm:$0xff]  }
 0x2ec   :  { %v14193_v33 = vadd.f32 %v4566_v18, %v13851_v53  ;;  %6209 = vmatprep.mubr.bf16.mxu0 %v5149_v0  ;;  %9625 = vmatpush3.bf16.msra.mxu1 %v10948_v46  ;;  %v9969_v27 = vpop.f32.mrf.mxu1  ;;  %v10951_v53 = vld [vmem:[%s15488_s2 + $0x8c0] ss:$12 sps:$4 sm:$0xff]   ;;  %v10954_v18 = vld [vmem:[%s15488_s2 + $0x7e8] ss:$12 sps:$4 sm:$0xff]  }
 0x2ed   :  { %v4568_v30 = vpop.f32.mrf.mxu0  ;;  %9626 = vmatprep.subr.bf16.mxu1 %v10949_v26  ;;  %v15617_v0 = vld [vmem:[#allocation2_spill] sm:$0xff] }
 0x2ee   :  { %v14202_v39 = vadd.f32 %v4568_v30, %v13867_v14  ;;  %v3832_v47 = vpop.f32.mrf.mxu1  ;;  %v2296_v9 = vmax.f32 %v15617_v0, 0.0 }
 0x2ef   :  { %v4570_v1 = vpop.f32.mrf.mxu0  ;;  %v14213_v13 = vadd.f32 %v3832_v47, %v14023_v50  ;;  %v5159_v50 = vsel %vm5126_vm5, %v5148_v24, %v5158_v59  ;;  %v10955_v24 = vld [vmem:[%s15488_s2 + $0x890] ss:$12 sps:$4 sm:$0xff]  }
 0x2f0   :  { %v14210_v15 = vadd.f32 %v4570_v1, %v13875_v7  ;;  %9627 = vmatpush3.bf16.msra.mxu1 %v10950_v38  ;;  %v9970_v14 = vpop.f32.mrf.mxu1 }
 0x2f1   :  { %v14215_v2 = vpop.f32.mrf.mxu0  ;;  %9628 = vmatprep.subr.bf16.mxu1 %v10951_v53  ;;  %v5157_v14 = vsel %vm5126_vm5, %v5146_v63, %v5156_v45 }
 0x2f2   :  { %15616 = vst [vmem:[#allocation22_spill] sm:$0xff] %v14215_v2  ;;  %5973 = vmatmul.mubr.bf16.gmra.mxu1 %v5147_v52  ;;  %v3837_v46 = vpop.f32.mrf.mxu1  ;;  %v15630_v2 = vld [vmem:[#allocation15_spill] sm:$0xff] }
 0x2f3   :  { %6210 = vmatmul.mubr.bf16.gmra.mxu0 %v5147_v52  ;;  %v14224_v7 = vpop.f32.mrf.mxu0  ;;  %5982 = vmatprep.mubr.bf16.mxu1 %v5159_v50  ;;  %v14228_v8 = vadd.f32 %v3837_v46, %v14046_v4  ;;  %v15618_v4 = vld [vmem:[#allocation3_spill] sm:$0xff]  ;;  %v2326_v52 = vpack.c.bf16 %v2296_v9, %v2296_v9 }
 0x2f4   :  { %6217 = vmatprep.mubr.bf16.mxu0 %v5159_v50  ;;  %9629 = vmatpush3.bf16.msra.mxu1 %v10952_v31  ;;  %v9973_v22 = vpop.f32.mrf.mxu1  ;;  %v5168_v27 = vrot.slane %v15618_v4, 2  ;;  %v10957_v31 = vld [vmem:[%s15488_s2 + $0x878] ss:$12 sps:$4 sm:$0xff]   ;;  %v15621_v9 = vld [vmem:[#allocation31_spill] sm:$0xff] }
 0x2f5   :  { %v14230_v26 = vpop.f32.mrf.mxu0  ;;  %9630 = vmatprep.subr.bf16.mxu1 %v10953_v51  ;;  %v5166_v4 = vrot.slane %v15621_v9, 2 }
 0x2f6   :  { %v3840_v38 = vpop.f32.mrf.mxu1 }
 0x2f7   :  { %v14240_v30 = vpop.f32.mrf.mxu0  ;;  %v14244_v53 = vadd.f32 %v3840_v38, %v14073_v44  ;;  %v5169_v44 = vsel %vm5126_vm5, %v5158_v59, %v5168_v27  ;;  %v10959_v59 = vld [vmem:[%s15488_s2 + $0x860] ss:$12 sps:$4 sm:$0xff]   ;;  %v5178_v38 = vrot.slane %v2326_v52, 2  ;;  %v10961_v52 = vld [vmem:[%s15488_s2 + $0x848] ss:$12 sps:$4 sm:$0xff]  }
 0x2f8   :  { %v9974_v47 = vpop.f32.mrf.mxu1  ;;  %9631 = vmatpush3.bf16.msra.mxu1 %v10954_v18  ;;  %v10958_v18 = vld [vmem:[%s15488_s2 + $0x7b8] ss:$12 sps:$4 sm:$0xff]  }
 0x2f9   :  { %v14246_v1 = vpop.f32.mrf.mxu0  ;;  %9632 = vmatprep.subr.bf16.mxu1 %v10955_v24  ;;  %v15620_v24 = vld [vmem:[#allocation6_spill] sm:$0xff] }
 0x2fa   :  { %15619 = vst [vmem:[#allocation23_spill] sm:$0xff] %v14246_v1  ;;  %5983 = vmatmul.mubr.bf16.gmra.mxu1 %v5157_v14  ;;  %v3845_v50 = vpop.f32.mrf.mxu1  ;;  %v2295_v0 = vmax.f32 %v15620_v24, 0.0 }
 0x2fb   :  { %6218 = vmatmul.mubr.bf16.gmra.mxu0 %v5157_v14  ;;  %v14255_v51 = vpop.f32.mrf.mxu0  ;;  %5992 = vmatprep.mubr.bf16.mxu1 %v5169_v44  ;;  %v14259_v46 = vadd.f32 %v3845_v50, %v14096_v5  ;;  %v10960_v50 = vld [vmem:[%s15488_s2 + $0x7a0] ss:$12 sps:$4 sm:$0xff]  }
 0x2fc   :  { %6225 = vmatprep.mubr.bf16.mxu0 %v5169_v44  ;;  %v9977_v63 = vpop.f32.mrf.mxu1  ;;  %9633 = vmatpush3.bf16.msra.mxu1 %v10956_v35 }
 0x2fd   :  { %v14261_v22 = vpop.f32.mrf.mxu0  ;;  %9634 = vmatprep.subr.bf16.mxu1 %v10957_v31  ;;  %v2325_v31 = vpack.c.bf16 %v2295_v0, %v2295_v0  ;;  %v5167_v63 = vsel %vm5126_vm5, %v5156_v45, %v5166_v4  ;;  %v10962_v45 = vld [vmem:[%s15488_s2 + $0x788] ss:$12 sps:$4 sm:$0xff]  }
 0x2fe   :  { %v3848_v47 = vpop.f32.mrf.mxu1 }
 0x2ff   :  { %v14271_v5 = vpop.f32.mrf.mxu0  ;;  %v14274_v14 = vadd.f32 %v3848_v47, %v14126_v19  ;;  %v5179_v19 = vsel %vm5126_vm5, %v5168_v27, %v5178_v38  ;;  %v5176_v0 = vrot.slane %v2325_v31, 2  ;;  %v15624_v38 = vld [vmem:[#allocation32_spill] sm:$0xff] }
 0x300   :  { %v9978_v44 = vpop.f32.mrf.mxu1  ;;  %9635 = vmatpush3.bf16.msra.mxu1 %v10958_v18  ;;  %v10963_v31 = vld [vmem:[%s15488_s2 + $0xb30] ss:$12 sps:$4 sm:$0xff]  }
 0x301   :  { %v14276_v35 = vpop.f32.mrf.mxu0  ;;  %9636 = vmatprep.subr.bf16.mxu1 %v10959_v59  ;;  %v5177_v47 = vsel %vm5126_vm5, %v5166_v4, %v5176_v0  ;;  %v15626_v4 = vld [vmem:[#allocation12_spill] sm:$0xff] }
 0x302   :  { %15622 = vst [vmem:[#allocation24_spill] sm:$0xff] %v14276_v35  ;;  %5993 = vmatmul.mubr.bf16.gmra.mxu1 %v5167_v63 }
 0x303   :  { %6226 = vmatmul.mubr.bf16.gmra.mxu0 %v5167_v63  ;;  %v14285_v24 = vpop.f32.mrf.mxu0  ;;  %6002 = vmatprep.mubr.bf16.mxu1 %v5179_v19 }
 0x304   :  { %6233 = vmatprep.mubr.bf16.mxu0 %v5179_v19  ;;  %9637 = vmatpush3.bf16.msra.mxu1 %v10960_v50  ;;  %v15627_v19 = vld [vmem:[#allocation5_spill] sm:$0xff] }
 0x305   :  { %v14288_v18 = vpop.f32.mrf.mxu0  ;;  %9638 = vmatprep.subr.bf16.mxu1 %v10961_v52 }
 0x307   :  { %v14293_v9 = vpop.f32.mrf.mxu0 }
 0x308   :  { %9639 = vmatpush3.bf16.msra.mxu1 %v10962_v45  ;;  %v10964_v45 = vld [vmem:[%s15488_s2 + $0xb18] ss:$12 sps:$4 sm:$0xff]  }
 0x309   :  { %v14295_v59 = vpop.f32.mrf.mxu0  ;;  %10015 = vmatprep.subr.bf16.mxu1 %v15602_v34 }
 0x30a   :  { %15623 = vst [vmem:[#allocation25_spill] sm:$0xff] %v14295_v59  ;;  %6003 = vmatmul.mubr.bf16.gmra.mxu1 %v5177_v47 }
 0x30b   :  { %6234 = vmatmul.mubr.bf16.gmra.mxu0 %v5177_v47  ;;  %v14299_v27 = vpop.f32.mrf.mxu0  ;;  %6128 = vmatprep.mubr.bf16.mxu1 %v15624_v38  ;;  %v10965_v38 = vld [vmem:[%s15488_s2 + $0xb00] ss:$12 sps:$4 sm:$0xff]  }
 0x30d   :  { %v14302_v44 = vpop.f32.mrf.mxu0 }
 0x30f   :  { %v14304_v50 = vpop.f32.mrf.mxu0 }
 0x311   :  { %v14309_v63 = vpop.f32.mrf.mxu0 }
 0x312   :  { %15625 = vst [vmem:[#allocation26_spill] sm:$0xff] %v14309_v63  ;;  %6129 = vmatmul.mubr.bf16.vlgmr.msra.gmra.mxu1 %v15626_v4  ;;  %v15629_v4 = vld [vmem:[#allocation14_spill] sm:$0xff] }
 0x313   :  { %v14311_v52 = vpop.f32.mrf.mxu0  ;;  %6136 = vmatprep.mubr.bf16.mxu1 %v15627_v19  ;;  %10016 = vmatpush3.bf16.msra.mxu1 %v10963_v31 }
 0x314   :  { %10017 = vmatprep.subr.bf16.mxu1 %v15602_v34 }
 0x315   :  { %v14318_v0 = vpop.f32.mrf.mxu0 }
 0x317   :  { %v14321_v47 = vpop.f32.mrf.mxu0  ;;  %10018 = vmatpush3.bf16.msra.mxu1 %v10964_v45  ;;  %v10966_v45 = vld [vmem:[%s15488_s2 + $0xae8] ss:$12 sps:$4 sm:$0xff]  }
 0x318   :  { %10019 = vmatprep.subr.bf16.mxu1 %v15602_v34 }
 0x319   :  { %v14326_v63 = vpop.f32.mrf.mxu0 }
 0x31a   :  { %15628 = vst [vmem:[#allocation27_spill] sm:$0xff] %v14326_v63  ;;  %6137 = vmatmul.mubr.bf16.gmra.mxu1 %v15629_v4  ;;  %v4609_v19 = vpop.f32.mrf.mxu1 }
 0x31b   :  { %v9581_v31 = vpop.f32.mrf.mxu0  ;;  %v4610_v59 = vadd.f32 %v4609_v19, %v14017_v62  ;;  %6144 = vmatprep.mubr.bf16.mxu1 %v15630_v2  ;;  %10020 = vmatpush3.bf16.msra.mxu1 %v10965_v38  ;;  %v10967_v19 = vld [vmem:[%s15488_s2 + $0xad0] ss:$12 sps:$4 sm:$0xff]  }
 0x31c   :  { %v4611_v35 = vpop.f32.mrf.mxu1  ;;  %10021 = vmatprep.subr.bf16.mxu1 %v15602_v34 }
 0x31d   :  { %v9582_v17 = vpop.f32.mrf.mxu0  ;;  %v14339_v6 = vadd.f32 %v14224_v7, %v4610_v59  ;;  %v4612_v4 = vadd.f32 %v4611_v35, %v14030_v11  ;;  %v15631_v35 = vld [vmem:[#allocation17_spill] sm:$0xff] }
 0x31e   :  { %v14336_v63 = vadd.f32 %v9582_v17, %v9581_v31  ;;  %v4613_v62 = vpop.f32.mrf.mxu1 }
 0x31f   :  { %v14342_v23 = vpop.f32.mrf.mxu0  ;;  %v14345_v2 = vadd.f32 %v14230_v26, %v4612_v4  ;;  %v4614_v38 = vadd.f32 %v4613_v62, %v14040_v28  ;;  %10022 = vmatpush3.bf16.msra.mxu1 %v10966_v45  ;;  %v15632_v45 = vld [vmem:[#allocation18_spill] sm:$0xff] }
 0x320   :  { %v4615_v31 = vpop.f32.mrf.mxu1  ;;  %10023 = vmatprep.subr.bf16.mxu1 %v15602_v34  ;;  %v10968_v4 = vld [vmem:[%s15488_s2 + $0xab8] ss:$12 sps:$4 sm:$0xff]  }
 0x321   :  { %v14351_v17 = vpop.f32.mrf.mxu0  ;;  %v14355_v11 = vadd.f32 %v14240_v30, %v4614_v38  ;;  %v14358_v7 = vadd.f32 %v4615_v31, %v14054_v20 }
 0x322   :  { %6145 = vmatmul.mubr.bf16.gmra.mxu1 %v15631_v35  ;;  %v4619_v28 = vpop.f32.mrf.mxu1 }
 0x323   :  { %v9587_v26 = vpop.f32.mrf.mxu0  ;;  %v4620_v59 = vadd.f32 %v4619_v28, %v14067_v41  ;;  %6152 = vmatprep.mubr.bf16.mxu1 %v15632_v45  ;;  %10024 = vmatpush3.bf16.msra.mxu1 %v10967_v19  ;;  %v10969_v28 = vld [vmem:[%s15488_s2 + $0xaa0] ss:$12 sps:$4 sm:$0xff]  }
 0x324   :  { %v4621_v1 = vpop.f32.mrf.mxu1  ;;  %10025 = vmatprep.subr.bf16.mxu1 %v15602_v34 }
 0x325   :  { %v9588_v62 = vpop.f32.mrf.mxu0  ;;  %v14370_v20 = vadd.f32 %v14255_v51, %v4620_v59  ;;  %v4622_v38 = vadd.f32 %v4621_v1, %v14080_v42  ;;  %v10970_v59 = vld [vmem:[%s15488_s2 + $0xa88] ss:$12 sps:$4 sm:$0xff]  }
 0x326   :  { %v14367_v30 = vadd.f32 %v9588_v62, %v9587_v26  ;;  %v4623_v41 = vpop.f32.mrf.mxu1 }
 0x327   :  { %v14373_v31 = vpop.f32.mrf.mxu0  ;;  %v14376_v19 = vadd.f32 %v14261_v22, %v4622_v38  ;;  %v4624_v35 = vadd.f32 %v4623_v41, %v14090_v36  ;;  %10026 = vmatpush3.bf16.msra.mxu1 %v10968_v4 }
 0x328   :  { %v4625_v45 = vpop.f32.mrf.mxu1  ;;  %10027 = vmatprep.subr.bf16.mxu1 %v15602_v34 }
 0x329   :  { %v14382_v26 = vpop.f32.mrf.mxu0  ;;  %v14386_v42 = vadd.f32 %v14271_v5, %v4624_v35  ;;  %v14389_v1 = vadd.f32 %v4625_v45, %v14104_v16  ;;  %v10971_v35 = vld [vmem:[%s15490_s3 + $0x108] sm:$0xff]  }
 0x32a   :  { %6153 = vmatmul.mubr.bf16.gmra.mxu1 %v13889_v43  ;;  %v4629_v36 = vpop.f32.mrf.mxu1  ;;  %9729 = vmatprep.subr.bf16.mxu0 %v10971_v35  ;;  %v10974_v35 = vld [vmem:[%s15490_s3 + $0xc0] sm:$0xff]  }
 0x32b   :  { %v9593_v51 = vpop.f32.mrf.mxu0  ;;  %v4630_v22 = vadd.f32 %v4629_v36, %v14117_v29  ;;  %6160 = vmatprep.mubr.bf16.mxu1 %v13896_v32  ;;  %10028 = vmatpush3.bf16.msra.mxu1 %v10969_v28 }
 0x32c   :  { %v4631_v62 = vpop.f32.mrf.mxu1  ;;  %10029 = vmatprep.subr.bf16.mxu1 %v15602_v34 }
 0x32d   :  { %v9594_v4 = vpop.f32.mrf.mxu0  ;;  %v14401_v16 = vadd.f32 %v14285_v24, %v4630_v22  ;;  %v4632_v43 = vadd.f32 %v4631_v62, %v14132_v40 }
 0x32e   :  { %v14398_v5 = vadd.f32 %v9594_v4, %v9593_v51  ;;  %v4633_v29 = vpop.f32.mrf.mxu1  ;;  %v10972_v51 = vld [vmem:[%s15490_s3 + $0xc8] sm:$0xff]  }
 0x32f   :  { %v14404_v38 = vpop.f32.mrf.mxu0  ;;  %v14407_v32 = vadd.f32 %v14288_v18, %v4632_v43  ;;  %v4634_v41 = vadd.f32 %v4633_v29, %v14138_v21  ;;  %10030 = vmatpush3.bf16.msra.mxu1 %v10970_v59  ;;  %9730 = vmatpush3.bf16.msra.mxu0 %v10972_v51  ;;  %v10976_v51 = vld [vmem:[%s15490_s3 + $0xb8] sm:$0xff]  }
 0x330   :  { %v14415_v45 = vpop.f32.mrf.mxu1  ;;  %10051 = vmatprep.subr.bf16.mxu1 %v15602_v34 }
 0x331   :  { %v14413_v28 = vpop.f32.mrf.mxu0  ;;  %v14419_v40 = vadd.f32 %v14293_v9, %v4634_v41 }
 0x332   :  { %6161 = vmatmul.mubr.bf16.gmra.mxu1 %v13926_v25  ;;  %v4639_v18 = vpop.f32.mrf.mxu1  ;;  %v10973_v25 = vld [vmem:[%s15490_s3 + $0x100] sm:$0xff]  }
 0x333   :  { %v9599_v24 = vpop.f32.mrf.mxu0  ;;  %v4640_v21 = vadd.f32 %v4639_v18, %v14156_v54  ;;  %10031 = vmatprep.mubr.msk.bf16.mxu1 %vm11067_vm4, %v15602_v34  ;;  %9731 = vmatprep.subr.bf16.mxu0 %v10973_v25 }
 0x334   :  { %v4641_v22 = vpop.f32.mrf.mxu1  ;;  %9732 = vmatpush3.bf16.msra.mxu0 %v10974_v35 }
 0x335   :  { %v9600_v36 = vpop.f32.mrf.mxu0  ;;  %v14431_v9 = vadd.f32 %v14299_v27, %v4640_v21  ;;  %v4642_v4 = vadd.f32 %v4641_v22, %v14169_v61 }
 0x336   :  { %v14428_v59 = vadd.f32 %v9600_v36, %v9599_v24  ;;  %v4643_v62 = vpop.f32.mrf.mxu1 }
 0x337   :  { %v14437_v54 = vpop.f32.mrf.mxu0  ;;  %v14440_v43 = vadd.f32 %v14302_v44, %v4642_v4  ;;  %v4644_v29 = vadd.f32 %v4643_v62, %v14174_v3  ;;  %v10977_v4 = vld [vmem:[%s15490_s3 + $0xf0] sm:$0xff]  }
 0x338   :  { %v14445_v27 = vpop.f32.mrf.mxu1 }
 0x339   :  { %v14443_v41 = vpop.f32.mrf.mxu0  ;;  %v14448_v61 = vadd.f32 %v14304_v50, %v4644_v29  ;;  %v10975_v50 = vld [vmem:[%s15490_s3 + $0xf8] sm:$0xff]  }
 0x33a   :  { %10032 = vmatmul.mubr.bf16.vlgmr.msra.gmra.mxu1 %v13958_v12  ;;  %v4649_v18 = vpop.f32.mrf.mxu1  ;;  %9733 = vmatprep.subr.bf16.mxu0 %v10975_v50 }
 0x33b   :  { %v9605_v24 = vpop.f32.mrf.mxu0  ;;  %v4650_v44 = vadd.f32 %v4649_v18, %v14193_v33  ;;  %10035 = vmatprep.mubr.msk.bf16.mxu1 %vm11067_vm4, %v15602_v34  ;;  %9734 = vmatpush3.bf16.msra.mxu0 %v10976_v51  ;;  %v10981_v18 = vld [vmem:[%s15490_s3 + $0xe0] sm:$0xff]  }
 0x33c   :  { %v4651_v21 = vpop.f32.mrf.mxu1  ;;  %9735 = vmatprep.subr.bf16.mxu0 %v10977_v4 }
 0x33d   :  { %v9606_v3 = vpop.f32.mrf.mxu0  ;;  %v14466_v12 = vadd.f32 %v14311_v52, %v4650_v44  ;;  %v4652_v33 = vadd.f32 %v4651_v21, %v14202_v39  ;;  %v10978_v39 = vld [vmem:[%s15490_s3 + $0xb0] sm:$0xff]  }
 0x33e   :  { %v14463_v36 = vadd.f32 %v9606_v3, %v9605_v24  ;;  %v4653_v22 = vpop.f32.mrf.mxu1 }
 0x33f   :  { %v14473_v25 = vadd.f32 %v14318_v0, %v4652_v33  ;;  %v4654_v62 = vadd.f32 %v4653_v22, %v14210_v15  ;;  %9736 = vmatpush3.bf16.msra.mxu0 %v10978_v39  ;;  %v10979_v15 = vld [vmem:[%s15490_s3 + $0xe8] sm:$0xff]   ;;  %v10982_v33 = vld [vmem:[%s15490_s3 + $0xa0] sm:$0xff]   ;;  %v9586_v22 = vadd.f32 %v14351_v17, %v14342_v23 }
 0x340   :  { %v14476_v29 = vpop.f32.mrf.mxu1  ;;  %9737 = vmatprep.subr.bf16.mxu0 %v10979_v15 }
 0x341   :  { %15633 = vst [vmem:[#allocation28_spill] sm:$0xff] %v14473_v25  ;;  %v14479_v52 = vadd.f32 %v14321_v47, %v4654_v62  ;;  %v10980_v47 = vld [vmem:[%s15490_s3 + $0xa8] sm:$0xff]  }
 0x342   :  { %10036 = vmatmul.mubr.bf16.gmra.mxu1 %v14001_v48  ;;  %v9535_v35 = vpop.f32.mrf.mxu1 }
 0x343   :  { %15634 = vst [vmem:[#allocation29_spill] sm:$0xff] %v14479_v52  ;;  %10039 = vmatprep.mubr.msk.bf16.mxu1 %vm11067_vm4, %v15602_v34  ;;  %9738 = vmatpush3.bf16.msra.mxu0 %v10980_v47  ;;  %v10986_v47 = vld [vmem:[%s15490_s3 + $0x90] sm:$0xff]  }
 0x344   :  { %v9536_v0 = vpop.f32.mrf.mxu1  ;;  %9739 = vmatprep.subr.bf16.mxu0 %v10981_v18  ;;  %v9592_v18 = vadd.f32 %v14382_v26, %v14373_v31  ;;  %v9598_v26 = vadd.f32 %v14413_v28, %v14404_v38 }
 0x345   :  { %v9537_v24 = vadd.f32 %v9536_v0, %v9535_v35 }
 0x346   :  { %v9538_v48 = vpop.f32.mrf.mxu1 }
 0x347   :  { %v4776_v44 = vadd.f32 %v9537_v24, %v14120_v49  ;;  %9740 = vmatpush3.bf16.msra.mxu0 %v10982_v33 }
 0x348   :  { %v9539_v3 = vpop.f32.mrf.mxu1 }
 0x349   :  { %v9540_v21 = vadd.f32 %v9539_v3, %v9538_v48  ;;  %v14498_v50 = vadd.f32 %v14336_v63, %v4776_v44  ;;  %v10983_v63 = vld [vmem:[%s15490_s3 + $0xd8] sm:$0xff]  }
 0x34a   :  { %10040 = vmatmul.mubr.bf16.gmra.mxu1 %v14057_v10  ;;  %v9541_v51 = vpop.f32.mrf.mxu1  ;;  %v10984_v10 = vld [vmem:[%s15490_s3 + $0x98] sm:$0xff]   ;;  %9741 = vmatprep.subr.bf16.mxu0 %v10983_v63 }
 0x34b   :  { %v4779_v4 = vadd.f32 %v9540_v21, %v14141_v55  ;;  %10043 = vmatprep.mubr.msk.bf16.mxu1 %vm11067_vm4, %v15602_v34  ;;  %v10985_v55 = vld [vmem:[%s15490_s3 + $0xd0] sm:$0xff]   ;;  %9742 = vmatpush3.bf16.msra.mxu0 %v10984_v10 }
 0x34c   :  { %v9542_v49 = vpop.f32.mrf.mxu1  ;;  %9743 = vmatprep.subr.bf16.mxu0 %v10985_v55 }
 0x34d   :  { %v9543_v62 = vadd.f32 %v9542_v49, %v9541_v51  ;;  %v14515_v39 = vadd.f32 %v9586_v22, %v4779_v4 }
 0x34e   :  { %v9544_v23 = vpop.f32.mrf.mxu1 }
 0x34f   :  { %v4784_v17 = vadd.f32 %v9543_v62, %v14160_v57  ;;  %v9608_v57 = vpop.f32.mrf.mxu0  ;;  %9744 = vmatpush3.bf16.msra.mxu0 %v10986_v47  ;;  %v9604_v47 = vadd.f32 %v14443_v41, %v14437_v54 }
 0x350   :  { %v9545_v35 = vpop.f32.mrf.mxu1 }
 0x351   :  { %v9546_v0 = vadd.f32 %v9545_v35, %v9544_v23  ;;  %v14522_v15 = vadd.f32 %v14367_v30, %v4784_v17  ;;  %v9609_v33 = vpop.f32.mrf.mxu0 }
 0x352   :  { %10044 = vmatmul.mubr.bf16.gmra.mxu1 %v14107_v37  ;;  %v9547_v24 = vpop.f32.mrf.mxu1 }
 0x353   :  { %v4787_v48 = vadd.f32 %v9546_v0, %v14178_v56  ;;  %10047 = vmatprep.mubr.msk.bf16.mxu1 %vm11067_vm4, %v15602_v34 }
 0x354   :  { %v9548_v44 = vpop.f32.mrf.mxu1 }
 0x355   :  { %v9549_v30 = vadd.f32 %v9548_v44, %v9547_v24  ;;  %v14533_v3 = vadd.f32 %v9592_v18, %v4787_v48 }
 0x356   :  { %v9550_v21 = vpop.f32.mrf.mxu1 }
 0x357   :  { %v4792_v51 = vadd.f32 %v9549_v30, %v14196_v60 }
 0x358   :  { %v9551_v37 = vpop.f32.mrf.mxu1 }
 0x359   :  { %v9552_v22 = vadd.f32 %v9551_v37, %v9550_v21  ;;  %v14537_v4 = vadd.f32 %v14398_v5, %v4792_v51  ;;  %v10987_v5 = vld [vmem:[%s15490_s3 + $0x78] sm:$0xff]  }
 0x35a   :  { %10048 = vmatmul.mubr.bf16.gmra.mxu1 %v14152_v58  ;;  %v9553_v56 = vpop.f32.mrf.mxu1  ;;  %9782 = vmatprep.subr.bf16.mxu0 %v10987_v5 }
 0x35b   :  { %v14539_v31 = vpop.f32.mrf.mxu0  ;;  %v4795_v49 = vadd.f32 %v9552_v22, %v14213_v13  ;;  %10055 = vmatprep.mubr.msk.bf16.mxu1 %vm11067_vm4, %v15602_v34 }
 0x35c   :  { %v9554_v63 = vpop.f32.mrf.mxu1 }
 0x35d   :  { %v14547_v60 = vpop.f32.mrf.mxu0  ;;  %v9555_v10 = vadd.f32 %v9554_v63, %v9553_v56  ;;  %v4868_v62 = vadd.f32 %v9598_v26, %v4795_v49 }
 0x35e   :  { %v9556_v58 = vpop.f32.mrf.mxu1 }
 0x35f   :  { %v14552_v55 = vpop.f32.mrf.mxu0  ;;  %v4800_v38 = vadd.f32 %v9555_v10, %v14228_v8 }
 0x360   :  { %v9557_v13 = vpop.f32.mrf.mxu1 }
 0x361   :  { %v14555_v28 = vpop.f32.mrf.mxu0  ;;  %v9558_v23 = vadd.f32 %v9557_v13, %v9556_v58  ;;  %v4873_v17 = vadd.f32 %v14428_v59, %v4800_v38 }
 0x362   :  { %v9559_v0 = vpop.f32.mrf.mxu1 }
 0x363   :  { %v14558_v35 = vpop.f32.mrf.mxu0  ;;  %v4803_v24 = vadd.f32 %v9558_v23, %v14244_v53  ;;  %v9610_v53 = vadd.f32 %v9609_v33, %v9608_v57 }
 0x364   :  { %v9560_v48 = vpop.f32.mrf.mxu1 }
 0x365   :  { %v14563_v18 = vpop.f32.mrf.mxu0  ;;  %v9561_v44 = vadd.f32 %v9560_v48, %v9559_v0  ;;  %v4876_v30 = vadd.f32 %v9604_v47, %v4803_v24 }
 0x366   :  { %v9562_v21 = vpop.f32.mrf.mxu1 }
 0x367   :  { %v14565_v8 = vpop.f32.mrf.mxu0  ;;  %v4808_v51 = vadd.f32 %v9561_v44, %v14259_v46  ;;  %v11001_v46 = vld [vmem:[%s15490_s3 + $0x118] sm:$0xff]  }
 0x368   :  { %v9563_v59 = vpop.f32.mrf.mxu1  ;;  %10052 = vmatpush3.bf16.msra.mxu1 %v11001_v46 }
 0x369   :  { %v14568_v37 = vpop.f32.mrf.mxu0  ;;  %v9564_v22 = vadd.f32 %v9563_v59, %v9562_v21  ;;  %v4881_v56 = vadd.f32 %v14463_v36, %v4808_v51  ;;  %10053 = vmatprep.subr.bf16.mxu1 %v15602_v34 }
 0x36a   :  { %v4921_v54 = vpop.f32.mrf.mxu1 }
 0x36b   :  { %v14571_v26 = vpop.f32.mrf.mxu0  ;;  %v4811_v41 = vadd.f32 %v9564_v22, %v14274_v14  ;;  %v14575_v49 = vadd.f32 %v4921_v54, %v14498_v50 }
 0x36c   :  { %v9997_v5 = vpop.f32.mrf.mxu1 }
 0x36d   :  { %15635 = vst [vmem:[#allocation33_spill] sm:$0xff] %v14575_v49  ;;  %v14577_v63 = vpop.f32.mrf.mxu0  ;;  %v4884_v10 = vadd.f32 %v9610_v53, %v4811_v41 }
 0x36e   :  { %v4924_v36 = vpop.f32.mrf.mxu1 }
 0x36f   :  { %v14582_v58 = vpop.f32.mrf.mxu0  ;;  %v14585_v38 = vadd.f32 %v4924_v36, %v14515_v39 }
 0x370   :  { %v9998_v14 = vpop.f32.mrf.mxu1 }
 0x371   :  { %15636 = vst [vmem:[#allocation2_spill] sm:$0xff] %v14585_v38  ;;  %v14587_v57 = vpop.f32.mrf.mxu0  ;;  %v15648_v38 = vld [vmem:[#allocation30_spill] sm:$0xff] }
 0x372   :  { %v4929_v33 = vpop.f32.mrf.mxu1  ;;  %v15649_v49 = vsub.s32 0, %v15648_v38 }
 0x373   :  { %v14590_v50 = vpop.f32.mrf.mxu0  ;;  %v14593_v13 = vadd.f32 %v4929_v33, %v14522_v15 }
 0x374   :  { %v10001_v0 = vpop.f32.mrf.mxu1 }
 0x375   :  { %15637 = vst [vmem:[#allocation3_spill] sm:$0xff] %v14593_v13  ;;  %v14595_v23 = vpop.f32.mrf.mxu0 }
 0x376   :  { %v4932_v24 = vpop.f32.mrf.mxu1 }
 0x377   :  { %v14597_v47 = vpop.f32.mrf.mxu0  ;;  %v14600_v39 = vadd.f32 %v4932_v24, %v14533_v3 }
 0x378   :  { %v10002_v44 = vpop.f32.mrf.mxu1 }
 0x379   :  { %15638 = vst [vmem:[#allocation6_spill] sm:$0xff] %v14600_v39  ;;  %v14602_v48 = vpop.f32.mrf.mxu0 }
 0x37a   :  { %v4937_v51 = vpop.f32.mrf.mxu1 }
 0x37b   :  { %v14604_v21 = vpop.f32.mrf.mxu0  ;;  %v14607_v59 = vadd.f32 %v4937_v51, %v14537_v4 }
 0x37c   :  { %v10005_v22 = vpop.f32.mrf.mxu1 }
 0x37d   :  { %15639 = vst [vmem:[#allocation31_spill] sm:$0xff] %v14607_v59  ;;  %v14609_v15 = vpop.f32.mrf.mxu0 }
 0x37e   :  { %v4940_v53 = vpop.f32.mrf.mxu1 }
 0x37f   :  { %v14611_v54 = vpop.f32.mrf.mxu0  ;;  %v14613_v41 = vadd.f32 %v4940_v53, %v4868_v62  ;;  %v11008_v62 = vld [vmem:[%s15490_s3 + $0x110] sm:$0xff]  }
 0x380   :  { %15640 = vst [vmem:[#allocation32_spill] sm:$0xff] %v14611_v54  ;;  %v10006_v3 = vpop.f32.mrf.mxu1  ;;  %10054 = vmatpush3.bf16.msra.mxu1 %v11008_v62 }
 0x381   :  { %15641 = vst [vmem:[#allocation12_spill] sm:$0xff] %v14613_v41  ;;  %v14615_v5 = vpop.f32.mrf.mxu0  ;;  %10075 = vmatprep.subr.bf16.mxu1 %v15602_v34 }
 0x382   :  { %15642 = vst [vmem:[#allocation5_spill] sm:$0xff] %v14615_v5  ;;  %v4945_v36 = vpop.f32.mrf.mxu1 }
 0x383   :  { %v6047_v46 = vpop.f32.mrf.mxu0  ;;  %v14617_v14 = vadd.f32 %v4945_v36, %v4873_v17 }
 0x384   :  { %v10009_v0 = vpop.f32.mrf.mxu1 }
 0x385   :  { %15643 = vst [vmem:[#allocation14_spill] sm:$0xff] %v14617_v14  ;;  %v6049_v33 = vpop.f32.mrf.mxu0 }
 0x386   :  { %v4948_v4 = vpop.f32.mrf.mxu1 }
 0x387   :  { %v6051_v24 = vpop.f32.mrf.mxu0  ;;  %v14619_v44 = vadd.f32 %v4948_v4, %v4876_v30 }
 0x388   :  { %v10010_v22 = vpop.f32.mrf.mxu1 }
 0x389   :  { %15644 = vst [vmem:[#allocation15_spill] sm:$0xff] %v14619_v44  ;;  %v6053_v51 = vpop.f32.mrf.mxu0 }
 0x38a   :  { %v4953_v53 = vpop.f32.mrf.mxu1 }
 0x38b   :  { %v6057_v41 = vpop.f32.mrf.mxu0  ;;  %v14624_v59 = vadd.f32 %v4953_v53, %v4881_v56 }
 0x38c   :  { %v10013_v3 = vpop.f32.mrf.mxu1 }
 0x38d   :  { %15645 = vst [vmem:[#allocation17_spill] sm:$0xff] %v14624_v59  ;;  %v6059_v36 = vpop.f32.mrf.mxu0 }
 0x38e   :  { %v4956_v17 = vpop.f32.mrf.mxu1 }
 0x38f   :  { %v14627_v0 = vadd.f32 %v4956_v17, %v4884_v10  ;;  %v6061_v4 = vpop.f32.mrf.mxu0  ;;  %v14645_v10 = vld [vmem:[%s15491_s5] sm:$0x7] }
 0x390   :  { %v10014_v30 = vpop.f32.mrf.mxu1  ;;  %15647 = vst [vmem:[#allocation34_spill] sm:$0xff] %v14645_v10  ;;  %v14654_v52 = vrot.slane %v14645_v10, %v15649_v49 }
 0x391   :  { %15646 = vst [vmem:[#allocation18_spill] sm:$0xff] %v14627_v0  ;;  %v14629_v44 = vpop.f32.mrf.mxu0 }
 0x393   :  { %v14631_v22 = vpop.f32.mrf.mxu0 }
 0x395   :  { %v14633_v14 = vpop.f32.mrf.mxu0 }
 0x397   :  { %v14635_v39 = vpop.f32.mrf.mxu0 }
 0x399   :  { %v14637_v56 = vpop.f32.mrf.mxu0 }
 0x39b   :  { %v14639_v53 = vpop.f32.mrf.mxu0 }
 0x39d   :  { %v14648_v34 = vpop.f32.mrf.mxu0 }
 0x3aa   :  { %v5964_v62 = vpop.f32.mrf.mxu1 }
 0x3ab   :  { %v5965_v3 = vadd.f32 %v5964_v62, %v14539_v31 }
 0x3ac   :  { %v5966_v17 = vpop.f32.mrf.mxu1 }
 0x3ad   :  { %v6048_v30 = vadd.f32 %v6047_v46, %v5965_v3  ;;  %v5967_v0 = vadd.f32 %v5966_v17, %v14547_v60  ;;  %v15650_v46 = vsub.s32 1, %v15648_v38 }
 0x3ae   :  { %v5968_v59 = vpop.f32.mrf.mxu1 }
 0x3af   :  { %v6315_v13 = vadd.f32 %v6048_v30, %v14339_v6  ;;  %v6050_v31 = vadd.f32 %v6049_v33, %v5967_v0  ;;  %v5969_v62 = vadd.f32 %v5968_v59, %v14552_v55  ;;  %v14661_v60 = vrot.slane %v14645_v10, %v15650_v46  ;;  %v14664_v30 = vpop.f32.mrf.mxu0  ;;  %v15651_v59 = vld [vmem:[#allocation7_spill] sm:$0xff]  ;;  %v15652_v0 = vld [vmem:[#allocation4_spill] sm:$0xff] }
 0x3b0   :  { %v5970_v5 = vpop.f32.mrf.mxu1 }
 0x3b1   :  { %v6316_v25 = vadd.f32 %v6050_v31, %v14345_v2  ;;  %v6052_v3 = vadd.f32 %v6051_v24, %v5969_v62  ;;  %v5971_v17 = vadd.f32 %v5970_v5, %v14555_v28  ;;  %v6362_v49 = vadd.f32 %v14654_v52, %v6315_v13  ;;  %v15653_v31 = vld [vmem:[#allocation23_spill] sm:$0xff]  ;;  %v15654_v62 = vld [vmem:[#allocation13_spill] sm:$0xff] }
 0x3b2   :  { %v5974_v6 = vpop.f32.mrf.mxu1  ;;  %v3528_v2 = vadd.f32 %v15652_v0, %v15651_v59  ;;  %v4699_v38 = vadd.f32 %v15653_v31, %v14358_v7  ;;  %v15657_v31 = vld [vmem:[#allocation10_spill] sm:$0xff] }
 0x3b3   :  { %v6318_v33 = vadd.f32 %v6052_v3, %v14355_v11  ;;  %v5975_v55 = vadd.f32 %v5974_v6, %v14558_v35  ;;  %v6054_v46 = vadd.f32 %v6053_v51, %v5971_v17  ;;  %v6363_v24 = vadd.f32 %v14661_v60, %v6316_v25  ;;  %v14677_v35 = vpop.f32.mrf.mxu0  ;;  %v15655_v51 = vld [vmem:[#allocation8_spill] sm:$0xff]  ;;  %v15656_v17 = vld [vmem:[#allocation9_spill] sm:$0xff] }
 0x3b4   :  { %v5976_v10 = vpop.f32.mrf.mxu1  ;;  %v3611_v54 = vadd.f32 %v15654_v62, %v3528_v2  ;;  %v6392_v6 = vmax.f32 %v6362_v49, 0.0  ;;  %v3538_v25 = vadd.f32 %v15656_v17, %v15655_v51  ;;  %v15660_v51 = vld [vmem:[#allocation16_spill] sm:$0xff] }
 0x3b5   :  { %v6365_v28 = vadd.f32 %v14654_v52, %v6318_v33  ;;  %v6058_v5 = vadd.f32 %v6057_v41, %v5975_v55  ;;  %v6319_v13 = vadd.f32 %v6054_v46, %v4699_v38  ;;  %v5977_v11 = vadd.f32 %v5976_v10, %v14563_v18  ;;  %v15658_v33 = vld [vmem:[#allocation11_spill] sm:$0xff]  ;;  %v15659_v18 = vld [vmem:[#allocation20_spill] sm:$0xff] }
 0x3b6   :  { %v5978_v3 = vpop.f32.mrf.mxu1  ;;  %v3548_v41 = vadd.f32 %v15658_v33, %v15657_v31  ;;  %v4553_v10 = vadd.f32 %v15659_v18, %v3611_v54  ;;  %v6393_v46 = vmax.f32 %v6363_v24, 0.0  ;;  %v3621_v17 = vadd.f32 %v15660_v51, %v3538_v25  ;;  %v15661_v31 = vld [vmem:[#allocation19_spill] sm:$0xff] }
 0x3b7   :  { %v6395_v59 = vmax.f32 %v6365_v28, 0.0  ;;  %v6321_v0 = vadd.f32 %v6058_v5, %v14370_v20  ;;  %v5979_v7 = vadd.f32 %v5978_v3, %v14565_v8  ;;  %v6366_v55 = vadd.f32 %v14661_v60, %v6319_v13 }
 0x3b8   :  { %v6060_v38 = vadd.f32 %v6059_v36, %v5977_v11  ;;  %v5980_v2 = vpop.f32.mrf.mxu1  ;;  %v3631_v13 = vadd.f32 %v15661_v31, %v3548_v41  ;;  %v14694_v36 = vpop.f32.mrf.mxu0  ;;  %v15664_v41 = vld [vmem:[#allocation22_spill] sm:$0xff] }
 0x3b9   :  { %v14687_v62 = vpack.c.bf16 %v6395_v59, %v6392_v6  ;;  %v6062_v49 = vadd.f32 %v6061_v4, %v5979_v7  ;;  %v6396_v28 = vmax.f32 %v6366_v55, 0.0  ;;  %v6368_v20 = vadd.f32 %v14654_v52, %v6321_v0  ;;  %v15662_v4 = vld [vmem:[#allocation24_spill] sm:$0xff]  ;;  %v15663_v0 = vld [vmem:[#allocation21_spill] sm:$0xff] }
 0x3ba   :  { %v6322_v8 = vadd.f32 %v6060_v38, %v14376_v19  ;;  %v5981_v5 = vadd.f32 %v5980_v2, %v14568_v37  ;;  %v5984_v3 = vpop.f32.mrf.mxu1  ;;  %v4709_v11 = vadd.f32 %v15662_v4, %v14389_v1  ;;  %v4636_v6 = vadd.f32 %v14415_v45, %v4553_v10  ;;  %v14712_v2 = vpop.f32.mrf.mxu0 }
 0x3bb   :  { %v6324_v54 = vadd.f32 %v6062_v49, %v14386_v42  ;;  %v5985_v24 = vadd.f32 %v5984_v3, %v14571_v26  ;;  %v14701_v59 = vpack.c.bf16 %v6396_v28, %v6393_v46  ;;  %v4563_v7 = vadd.f32 %v15663_v0, %v3621_v17 }
 0x3bc   :  { %v6064_v19 = vadd.f32 %v14629_v44, %v5981_v5  ;;  %v5986_v37 = vpop.f32.mrf.mxu1  ;;  %v14709_v26 = vadd.f32 %v15664_v41, %v3631_v13  ;;  %v6398_v55 = vmax.f32 %v6368_v20, 0.0  ;;  %v6369_v1 = vadd.f32 %v14661_v60, %v6322_v8  ;;  %v14728_v13 = vpop.f32.mrf.mxu0 }
 0x3bd   :  { %v6371_v25 = vadd.f32 %v14654_v52, %v6324_v54  ;;  %v6068_v33 = vadd.f32 %v14631_v22, %v5985_v24  ;;  %v5987_v42 = vadd.f32 %v5986_v37, %v14577_v63  ;;  %v15665_v22 = vld [vmem:[#allocation25_spill] sm:$0xff]  ;;  %v4646_v63 = vadd.f32 %v14445_v27, %v4563_v7 }
 0x3be   :  { %v6325_v45 = vadd.f32 %v6064_v19, %v4709_v11  ;;  %v5988_v38 = vpop.f32.mrf.mxu1  ;;  %v4719_v49 = vadd.f32 %v15665_v22, %v4636_v6  ;;  %v6525_v8 = vrot.slane %v14687_v62, 2  ;;  %v6528_v24 = vrot.slane %v14701_v59, 2 }
 0x3bf   :  { %v6401_v44 = vmax.f32 %v6371_v25, 0.0  ;;  %v6327_v18 = vadd.f32 %v6068_v33, %v14401_v16  ;;  %v6070_v10 = vadd.f32 %v14633_v14, %v5987_v42  ;;  %v5989_v46 = vadd.f32 %v5988_v38, %v14582_v58 }
 0x3c0   :  { %v6372_v28 = vadd.f32 %v14661_v60, %v6325_v45  ;;  %v5990_v20 = vpop.f32.mrf.mxu1  ;;  %v7135_v16 = vrot.slane %v14687_v62, 4  ;;  %v6399_v14 = vmax.f32 %v6369_v1, 0.0  ;;  %v7138_v11 = vrot.slane %v14701_v59, 4 }
 0x3c1   :  { %v14721_v5 = vpack.c.bf16 %v6401_v44, %v6398_v55  ;;  %v6374_v3 = vadd.f32 %v14654_v52, %v6327_v18  ;;  %v6328_v51 = vadd.f32 %v6070_v10, %v14407_v32  ;;  %v6072_v58 = vadd.f32 %v14635_v39, %v5989_v46  ;;  %v14745_v55 = vpop.f32.mrf.mxu0 }
 0x3c2   :  { %v6402_v17 = vmax.f32 %v6372_v28, 0.0  ;;  %v5991_v31 = vadd.f32 %v5990_v20, %v14587_v57  ;;  %v5994_v27 = vpop.f32.mrf.mxu1 }
 0x3c3   :  { %v5995_v54 = vadd.f32 %v5994_v27, %v14590_v50  ;;  %v6526_v4 = vrot.slane %v14721_v5, 2  ;;  %v6330_v6 = vadd.f32 %v6072_v58, %v14419_v40  ;;  %v7136_v57 = vrot.slane %v14721_v5, 4 }
 0x3c4   :  { %v14734_v32 = vpack.c.bf16 %v6402_v17, %v6399_v14  ;;  %v6074_v19 = vadd.f32 %v14637_v56, %v5991_v31  ;;  %v5996_v39 = vpop.f32.mrf.mxu1  ;;  %v6404_v37 = vmax.f32 %v6374_v3, 0.0  ;;  %v6375_v0 = vadd.f32 %v14661_v60, %v6328_v51  ;;  %v14778_v17 = vpop.f32.mrf.mxu0 }
 0x3c5   :  { %v6078_v50 = vadd.f32 %v14639_v53, %v5995_v54  ;;  %v5997_v7 = vadd.f32 %v5996_v39, %v14595_v23  ;;  %v6377_v25 = vadd.f32 %v14654_v52, %v6330_v6  ;;  %v6527_v40 = vsel %vm5126_vm5, %v6525_v8, %v6526_v4  ;;  %v10988_v23 = vld [vmem:[%s15490_s3 + $0x38] sm:$0xff]  }
 0x3c6   :  { %v6331_v33 = vadd.f32 %v6074_v19, %v4719_v49  ;;  %v5998_v42 = vpop.f32.mrf.mxu1  ;;  %v6529_v41 = vrot.slane %v14734_v32, 2  ;;  %v7139_v53 = vrot.slane %v14734_v32, 4 }
 0x3c7   :  { %v6333_v56 = vadd.f32 %v6078_v50, %v14431_v9  ;;  %v6080_v1 = vadd.f32 %v14648_v34, %v5997_v7  ;;  %v5999_v45 = vadd.f32 %v5998_v42, %v14597_v47  ;;  %v6407_v38 = vmax.f32 %v6377_v25, 0.0  ;;  %v10989_v9 = vld [vmem:[%s15490_s3 + $0x70] sm:$0xff]  }
 0x3c8   :  { %v6378_v44 = vadd.f32 %v14661_v60, %v6331_v33  ;;  %v6000_v18 = vpop.f32.mrf.mxu1  ;;  %v6530_v10 = vsel %vm5126_vm5, %v6528_v24, %v6529_v41  ;;  %v14762_v34 = vsel %vm593_vm1, %v7135_v16, %v7136_v57  ;;  %v6405_v47 = vmax.f32 %v6375_v0, 0.0  ;;  %v15666_v16 = vld [vmem:[#allocation26_spill] sm:$0xff]  ;;  %v14799_v0 = vpop.f32.mrf.mxu0  ;;  %v15667_v25 = vld [vmem:[#allocation32_spill] sm:$0xff] }
 0x3c9   :  { %v6380_v46 = vadd.f32 %v14654_v52, %v6333_v56  ;;  %v6334_v22 = vadd.f32 %v6080_v1, %v14440_v43  ;;  %v6082_v49 = vadd.f32 %v14664_v30, %v5999_v45  ;;  %6718 = vmatprep.mubr.bf16.mxu0 %v6530_v10  ;;  %v14767_v28 = vpack.c.bf16 %v6407_v38, %v6404_v37 }
 0x3ca   :  { %v6408_v20 = vmax.f32 %v6378_v44, 0.0  ;;  %v6001_v8 = vadd.f32 %v6000_v18, %v14602_v48  ;;  %6719 = vmatmul.mubr.bf16.vlgmr.msra.gmra.mxu0 %v6527_v40  ;;  %v6004_v3 = vpop.f32.mrf.mxu1  ;;  %v14773_v51 = vsel %vm593_vm1, %v7138_v11, %v7139_v53  ;;  %v4729_v14 = vadd.f32 %v15666_v16, %v4646_v63  ;;  %v10990_v48 = vld [vmem:[%s15490_s3 + $0x30] sm:$0xff]  }
 0x3cb   :  { %v4656_v43 = vadd.f32 %v14476_v29, %v14709_v26  ;;  %v6336_v30 = vadd.f32 %v6082_v49, %v14448_v61  ;;  %v6005_v58 = vadd.f32 %v6004_v3, %v14604_v21  ;;  %9783 = vmatpush3.bf16.msra.mxu0 %v10988_v23  ;;  %v6534_v63 = vrot.slane %v14767_v28, 2  ;;  %v10991_v29 = vld [vmem:[%s15490_s3 + $0x68] sm:$0xff]   ;;  %v15668_v44 = vld [vmem:[#allocation28_spill] sm:$0xff] }
 0x3cc   :  { %v14785_v31 = vpack.c.bf16 %v6408_v20, %v6405_v47  ;;  %v6084_v27 = vadd.f32 %v14677_v35, %v6001_v8  ;;  %v6006_v54 = vpop.f32.mrf.mxu1  ;;  %9784 = vmatprep.subr.bf16.mxu0 %v10989_v9  ;;  %v7144_v61 = vrot.slane %v14767_v28, 4  ;;  %v6410_v21 = vmax.f32 %v6380_v46, 0.0  ;;  %v10994_v20 = vld [vmem:[%s15490_s3 + $0x20] sm:$0xff]   ;;  %v15671_v3 = vld [vmem:[#allocation27_spill] sm:$0xff] }
 0x3cd   :  { %v6381_v26 = vadd.f32 %v14661_v60, %v6334_v22  ;;  %v6383_v24 = vadd.f32 %v14654_v52, %v6336_v30  ;;  %v6088_v11 = vadd.f32 %v14694_v36, %v6005_v58  ;;  %v6007_v35 = vadd.f32 %v6006_v54, %v14609_v15  ;;  %v10992_v36 = vld [vmem:[%s15490_s3 + $0x28] sm:$0xff]   ;;  %v15670_v22 = vld [vmem:[#allocation29_spill] sm:$0xff] }
 0x3ce   :  { %v6337_v6 = vadd.f32 %v6084_v27, %v4729_v14  ;;  %v6008_v19 = vpop.f32.mrf.mxu1  ;;  %v6536_v39 = vrot.slane %v14785_v31, 2  ;;  %v6535_v37 = vsel %vm5126_vm5, %v6526_v4, %v6534_v63  ;;  %v7146_v42 = vrot.slane %v14785_v31, 4  ;;  %v10995_v58 = vld [vmem:[%s15490_s3 + $0x58] sm:$0xff]  }
 0x3cf   :  { %v6413_v50 = vmax.f32 %v6383_v24, 0.0  ;;  %v6339_v7 = vadd.f32 %v6088_v11, %v14466_v12  ;;  %v6009_v33 = vadd.f32 %v6008_v19, %v15667_v25  ;;  %9785 = vmatpush3.bf16.msra.mxu0 %v10990_v48  ;;  %v6090_v40 = vadd.f32 %v14712_v2, %v6007_v35  ;;  %v10993_v12 = vld [vmem:[%s15490_s3 + $0x60] sm:$0xff]   ;;  %v10997_v19 = vld [vmem:[%s15490_s3 + $0x50] sm:$0xff]  }
 0x3d0   :  { %v6384_v15 = vadd.f32 %v14661_v60, %v6337_v6  ;;  %v6010_v56 = vpop.f32.mrf.mxu1  ;;  %v6537_v4 = vsel %vm5126_vm5, %v6529_v41, %v6536_v39  ;;  %9786 = vmatprep.subr.bf16.mxu0 %v10991_v29  ;;  %v14816_v1 = vsel %vm593_vm1, %v7136_v57, %v7144_v61  ;;  %v6411_v45 = vmax.f32 %v6381_v26, 0.0  ;;  %v15669_v41 = vld [vmem:[#allocation5_spill] sm:$0xff]  ;;  %v14830_v57 = vpop.f32.mrf.mxu0 }
 0x3d1   :  { %v14818_v23 = vpack.c.bf16 %v6413_v50, %v6410_v21  ;;  %v6092_v38 = vadd.f32 %v14728_v13, %v6009_v33  ;;  %6726 = vmatprep.mubr.bf16.mxu0 %v6537_v4  ;;  %v6340_v18 = vadd.f32 %v6090_v40, %v15668_v44  ;;  %v6011_v10 = vadd.f32 %v6010_v56, %v15669_v41  ;;  %v10999_v56 = vld [vmem:[%s15490_s3 + $0x48] sm:$0xff]  }
 0x3d2   :  { %v6414_v2 = vmax.f32 %v6384_v15, 0.0  ;;  %6727 = vmatmul.mubr.bf16.gmra.mxu0 %v6535_v37  ;;  %v14823_v9 = vpop.f32.mrf.mxu1  ;;  %v14828_v47 = vsel %vm593_vm1, %v7139_v53, %v7146_v42  ;;  %v6386_v46 = vadd.f32 %v14654_v52, %v6339_v7  ;;  %v4739_v16 = vadd.f32 %v15671_v3, %v4656_v43  ;;  %v14858_v24 = vpop.f32.mrf.mxu0  ;;  %v11004_v3 = vld [vmem:[%s15490_s3 + $0x198] sm:$0xff]  }
 0x3d3   :  { %v6342_v13 = vadd.f32 %v6092_v38, %v15670_v22  ;;  %v6540_v49 = vrot.slane %v14818_v23, 2  ;;  %9787 = vmatpush3.bf16.msra.mxu0 %v10992_v36  ;;  %v7150_v8 = vrot.slane %v14818_v23, 4  ;;  %v6094_v53 = vadd.f32 %v14745_v55, %v6011_v10  ;;  %v10998_v36 = vld [vmem:[%s15490_s3 + $0x10] sm:$0xff]  }
 0x3d4   :  { %v14840_v14 = vpack.c.bf16 %v6414_v2, %v6411_v45  ;;  %v14843_v30 = vpop.f32.mrf.mxu1  ;;  %9788 = vmatprep.subr.bf16.mxu0 %v10993_v12  ;;  %v6387_v43 = vadd.f32 %v14661_v60, %v6340_v18  ;;  %v6416_v11 = vmax.f32 %v6386_v46, 0.0  ;;  %v11000_v18 = vld [vmem:[%s15490_s3 + $0x8] sm:$0xff]   ;;  %v11002_v46 = vld [vmem:[%s15490_s3 + $0x40] sm:$0xff]  }
 0x3d5   :  { %v6389_v48 = vadd.f32 %v14654_v52, %v6342_v13  ;;  %v6541_v27 = vsel %vm5126_vm5, %v6534_v63, %v6540_v49  ;;  %v14851_v54 = vsel %vm593_vm1, %v7144_v61, %v7150_v8  ;;  %v6343_v29 = vadd.f32 %v6094_v53, %v4739_v16  ;;  %v10996_v52 = vld [vmem:[%s15490_s3 + $0x18] sm:$0xff]  }
 0x3d6   :  { %v14854_v21 = vpop.f32.mrf.mxu1  ;;  %v6542_v55 = vrot.slane %v14840_v14, 2  ;;  %v7152_v26 = vrot.slane %v14840_v14, 4  ;;  %v6417_v7 = vmax.f32 %v6387_v43, 0.0 }
 0x3d7   :  { %v6419_v6 = vmax.f32 %v6389_v48, 0.0  ;;  %9789 = vmatpush3.bf16.msra.mxu0 %v10994_v20  ;;  %v6390_v63 = vadd.f32 %v14661_v60, %v6343_v29  ;;  %v14877_v60 = vpop.f32.mrf.mxu0  ;;  %v11003_v20 = vld [vmem:[%s15490_s3] sm:$0xff]  }
 0x3d8   :  { %v14864_v61 = vpop.f32.mrf.mxu1  ;;  %v6543_v35 = vsel %vm5126_vm5, %v6536_v39, %v6542_v55  ;;  %9790 = vmatprep.subr.bf16.mxu0 %v10995_v58  ;;  %v14871_v37 = vsel %vm593_vm1, %v7146_v42, %v7152_v26 }
 0x3d9   :  { %v14873_v50 = vpack.c.bf16 %v6419_v6, %v6416_v11  ;;  %6734 = vmatprep.mubr.bf16.mxu0 %v6543_v35  ;;  %v6420_v25 = vmax.f32 %v6390_v63, 0.0  ;;  %v14901_v44 = vpop.f32.mrf.mxu0  ;;  %v11006_v6 = vld [vmem:[%s15490_s3 + $0x190] sm:$0xff]  }
 0x3da   :  { %6735 = vmatmul.mubr.bf16.gmra.mxu0 %v6541_v27  ;;  %v14875_v33 = vpop.f32.mrf.mxu1  ;;  %v11007_v63 = vld [vmem:[%s15490_s3 + $0x150] sm:$0xff]  }
 0x3db   :  { %v6546_v39 = vrot.slane %v14873_v50, 2  ;;  %9791 = vmatpush3.bf16.msra.mxu0 %v10996_v52  ;;  %v7156_v42 = vrot.slane %v14873_v50, 4  ;;  %v14884_v15 = vpack.c.bf16 %v6420_v25, %v6417_v7 }
 0x3dc   :  { %v14886_v40 = vpop.f32.mrf.mxu1  ;;  %9792 = vmatprep.subr.bf16.mxu0 %v10997_v19  ;;  %v11009_v19 = vld [vmem:[%s15490_s3 + $0x188] sm:$0xff]  }
 0x3dd   :  { %v6547_v4 = vsel %vm5126_vm5, %v6540_v49, %v6546_v39  ;;  %v14895_v12 = vsel %vm593_vm1, %v7150_v8, %v7156_v42  ;;  %v6548_v38 = vrot.slane %v14884_v15, 2  ;;  %v7158_v2 = vrot.slane %v14884_v15, 4  ;;  %v14919_v49 = vpop.f32.mrf.mxu0 }
 0x3de   :  { %v14897_v45 = vpop.f32.mrf.mxu1 }
 0x3df   :  { %9793 = vmatpush3.bf16.msra.mxu0 %v10998_v36  ;;  %v6549_v10 = vsel %vm5126_vm5, %v6542_v55, %v6548_v38  ;;  %v14915_v22 = vsel %vm593_vm1, %v7152_v26, %v7158_v2  ;;  %v9696_v53 = vpop.f32.mrf.mxu0  ;;  %v11005_v26 = vld [vmem:[%s15490_s3 + $0x158] sm:$0xff]  }
 0x3e0   :  { %v14906_v41 = vpop.f32.mrf.mxu1  ;;  %9794 = vmatprep.subr.bf16.mxu0 %v10999_v56  ;;  %6742 = vmatprep.mubr.bf16.mxu0 %v6549_v10  ;;  %v11011_v56 = vld [vmem:[%s15490_s3 + $0x180] sm:$0xff]  }
 0x3e1   :  { %v14935_v27 = vpop.f32.mrf.mxu0 }
 0x3e2   :  { %6743 = vmatmul.mubr.bf16.gmra.mxu0 %v6547_v4  ;;  %v14917_v13 = vpop.f32.mrf.mxu1 }
 0x3e3   :  { %6750 = vmatprep.mubr.bf16.mxu0 %v6548_v38  ;;  %9795 = vmatpush3.bf16.msra.mxu0 %v11000_v18  ;;  %v14942_v55 = vpop.f32.mrf.mxu0  ;;  %v11012_v18 = vld [vmem:[%s15490_s3 + $0x140] sm:$0xff]  }
 0x3e4   :  { %v14924_v8 = vpop.f32.mrf.mxu1  ;;  %9796 = vmatprep.subr.bf16.mxu0 %v11002_v46 }
 0x3e6   :  { %v14929_v16 = vpop.f32.mrf.mxu1 }
 0x3e7   :  { %9797 = vmatpush3.bf16.msra.mxu0 %v11003_v20  ;;  %v15675_v20 = vld [vmem:[#allocation34_spill] sm:$0xff] }
 0x3e8   :  { %v14931_v58 = vpop.f32.mrf.mxu1  ;;  %9835 = vmatprep.subr.bf16.mxu0 %v11004_v3 }
 0x3ea   :  { %6751 = vmatmul.mubr.bf16.gmra.mxu0 %v6546_v39  ;;  %v14933_v48 = vpop.f32.mrf.mxu1  ;;  %v11010_v39 = vld [vmem:[%s15490_s3 + $0x148] sm:$0xff]  }
 0x3eb   :  { %6985 = vmatprep.mubr.bf16.mxu0 %v14701_v59  ;;  %v14955_v59 = vpop.f32.mrf.mxu0 }
 0x3ec   :  { %v14938_v43 = vpop.f32.mrf.mxu1 }
 0x3ed   :  { %v14972_v25 = vpop.f32.mrf.mxu0 }
 0x3ee   :  { %v14940_v29 = vpop.f32.mrf.mxu1 }
 0x3ef   :  { %v14987_v4 = vpop.f32.mrf.mxu0 }
 0x3f0   :  { %v14947_v11 = vpop.f32.mrf.mxu1 }
 0x3f2   :  { %6986 = vmatmul.mubr.bf16.vlgmr.msra.gmra.mxu0 %v14687_v62  ;;  %v14953_v52 = vpop.f32.mrf.mxu1  ;;  %v9642_v62 = vadd.f32 %v14843_v30, %v14823_v9  ;;  %v9645_v9 = vadd.f32 %v14864_v61, %v14854_v21  ;;  %v9648_v21 = vadd.f32 %v14886_v40, %v14875_v33  ;;  %v15673_v61 = vld [vmem:[#allocation30_spill] sm:$0xff]  ;;  %v9651_v33 = vadd.f32 %v14906_v41, %v14897_v45  ;;  %v11016_v41 = vld [vmem:[%s15490_s3 + $0x130] sm:$0xff]  }
 0x3f3   :  { %6993 = vmatprep.mubr.bf16.mxu0 %v14734_v32  ;;  %9836 = vmatpush3.bf16.msra.mxu0 %v11005_v26  ;;  %v9688_v32 = vadd.f32 %v14799_v0, %v14778_v17  ;;  %v9691_v0 = vadd.f32 %v14858_v24, %v14830_v57  ;;  %v15672_v57 = vld [vmem:[#allocation33_spill] sm:$0xff]  ;;  %v15674_v46 = vsub.s32 2, %v15673_v61 }
 0x3f4   :  { %v14961_v35 = vpop.f32.mrf.mxu1  ;;  %9837 = vmatprep.subr.bf16.mxu0 %v11006_v6  ;;  %v9694_v6 = vadd.f32 %v14901_v44, %v14877_v60 }
 0x3f5   :  { %v6204_v30 = vadd.f32 %v9688_v32, %v9642_v62  ;;  %v6207_v3 = vadd.f32 %v9691_v0, %v9645_v9  ;;  %v11014_v62 = vld [vmem:[%s15490_s3 + $0x138] sm:$0xff]   ;;  %v11015_v32 = vld [vmem:[%s15490_s3 + $0x170] sm:$0xff]   ;;  %v9697_v9 = vadd.f32 %v9696_v53, %v14919_v49  ;;  %v11017_v49 = vld [vmem:[%s15490_s3 + $0x168] sm:$0xff]  }
 0x3f6   :  { %v14968_v7 = vpop.f32.mrf.mxu1  ;;  %v6212_v44 = vadd.f32 %v9694_v6, %v9648_v21 }
 0x3f7   :  { %9838 = vmatpush3.bf16.msra.mxu0 %v11007_v63  ;;  %v9705_v63 = vpop.f32.mrf.mxu0 }
 0x3f8   :  { %v14977_v36 = vpop.f32.mrf.mxu1  ;;  %9839 = vmatprep.subr.bf16.mxu0 %v11009_v19 }
 0x3fa   :  { %6994 = vmatmul.mubr.bf16.gmra.mxu0 %v14721_v5  ;;  %v6276_v17 = vpop.f32.mrf.mxu1  ;;  %v11013_v5 = vld [vmem:[%s15490_s3 + $0x178] sm:$0xff]  }
 0x3fb   :  { %v6277_v38 = vadd.f32 %v6276_v17, %v6204_v30  ;;  %7001 = vmatprep.mubr.bf16.mxu0 %v14785_v31  ;;  %9840 = vmatpush3.bf16.msra.mxu0 %v11010_v39  ;;  %v15002_v31 = vrot.slane %v15675_v20, %v15674_v46  ;;  %v9707_v17 = vpop.f32.mrf.mxu0  ;;  %v11018_v20 = vld [vmem:[%s15490_s3 + $0x128] sm:$0xff]  }
 0x3fc   :  { %v10033_v10 = vpop.f32.mrf.mxu1  ;;  %9841 = vmatprep.subr.bf16.mxu0 %v11011_v56  ;;  %v15676_v56 = vld [vmem:[#allocation2_spill] sm:$0xff] }
 0x3fd   :  { %v6317_v24 = vadd.f32 %v6277_v38, %v15672_v57  ;;  %v9700_v57 = vadd.f32 %v14942_v55, %v14935_v27  ;;  %v15678_v55 = vld [vmem:[#allocation6_spill] sm:$0xff] }
 0x3fe   :  { %v6279_v26 = vpop.f32.mrf.mxu1 }
 0x3ff   :  { %v6280_v19 = vadd.f32 %v6279_v26, %v6207_v3  ;;  %9842 = vmatpush3.bf16.msra.mxu0 %v11012_v18  ;;  %v6364_v39 = vadd.f32 %v15002_v31, %v6317_v24  ;;  %v6215_v18 = vadd.f32 %v9697_v9, %v9651_v33  ;;  %v9708_v24 = vpop.f32.mrf.mxu0 }
 0x400   :  { %v10034_v40 = vpop.f32.mrf.mxu1  ;;  %9843 = vmatprep.subr.bf16.mxu0 %v11013_v5  ;;  %v15677_v5 = vld [vmem:[#allocation3_spill] sm:$0xff] }
 0x401   :  { %v6320_v60 = vadd.f32 %v6280_v19, %v15676_v56  ;;  %v6394_v53 = vmax.f32 %v6364_v39, 0.0  ;;  %v9710_v33 = vpop.f32.mrf.mxu0 }
 0x402   :  { %7002 = vmatmul.mubr.bf16.gmra.mxu0 %v14767_v28  ;;  %v6284_v30 = vpop.f32.mrf.mxu1  ;;  %v9654_v28 = vadd.f32 %v14924_v8, %v14917_v13  ;;  %v11020_v13 = vld [vmem:[%s15490_s3 + $0x160] sm:$0xff]   ;;  %v9657_v8 = vadd.f32 %v14931_v58, %v14929_v16  ;;  %v9660_v58 = vadd.f32 %v14938_v43, %v14933_v48 }
 0x403   :  { %v6367_v0 = vadd.f32 %v15002_v31, %v6320_v60  ;;  %v6285_v45 = vadd.f32 %v6284_v30, %v6212_v44  ;;  %7009 = vmatprep.mubr.bf16.mxu0 %v14840_v14  ;;  %9844 = vmatpush3.bf16.msra.mxu0 %v11014_v62  ;;  %v9703_v62 = vadd.f32 %v14972_v25, %v14955_v59  ;;  %v11021_v16 = vld [vmem:[%s15490_s3 + $0x120] sm:$0xff]   ;;  %v15679_v60 = vld [vmem:[#allocation31_spill] sm:$0xff]  ;;  %v9711_v30 = vpop.f32.mrf.mxu0 }
 0x404   :  { %v10037_v38 = vpop.f32.mrf.mxu1  ;;  %9845 = vmatprep.subr.bf16.mxu0 %v11015_v32  ;;  %v6220_v6 = vadd.f32 %v9700_v57, %v9654_v28  ;;  %v9706_v44 = vadd.f32 %v9705_v63, %v14987_v4 }
 0x405   :  { %v6397_v10 = vmax.f32 %v6367_v0, 0.0  ;;  %v6323_v21 = vadd.f32 %v6285_v45, %v15677_v5  ;;  %v6223_v25 = vadd.f32 %v9703_v62, %v9657_v8  ;;  %v15682_v8 = vld [vmem:[#allocation14_spill] sm:$0xff]  ;;  %v9669_v62 = vadd.f32 %v14977_v36, %v14968_v7 }
 0x406   :  { %v6287_v14 = vpop.f32.mrf.mxu1 }
 0x407   :  { %v15031_v61 = vpack.c.bf16 %v6397_v10, %v6394_v53  ;;  %v6288_v46 = vadd.f32 %v6287_v14, %v6215_v18  ;;  %9846 = vmatpush3.bf16.msra.mxu0 %v11016_v41  ;;  %v6370_v27 = vadd.f32 %v15002_v31, %v6323_v21  ;;  %v9663_v41 = vadd.f32 %v14947_v11, %v14940_v29  ;;  %v15681_v53 = vld [vmem:[#allocation12_spill] sm:$0xff]  ;;  %v11019_v29 = vld [vmem:[%s15490_s3 + $0x88] sm:$0xff]   ;;  %v9713_v21 = vpop.f32.mrf.mxu0 }
 0x408   :  { %v10038_v3 = vpop.f32.mrf.mxu1  ;;  %9847 = vmatprep.subr.bf16.mxu0 %v11017_v49  ;;  %v6228_v18 = vadd.f32 %v9706_v44, %v9660_v58  ;;  %v15680_v49 = vmov 0.0   ;;  %v9709_v11 = vadd.f32 %v9708_v24, %v9707_v17  ;;  %v15683_v58 = vld [vmem:[#allocation15_spill] sm:$0xff] }
 0x409   :  { %v6326_v26 = vadd.f32 %v6288_v46, %v15678_v55  ;;  %v6531_v48 = vrot.slane %v15031_v61, 2  ;;  %v7141_v43 = vrot.slane %v15031_v61, 4  ;;  %v9666_v3 = vadd.f32 %v14961_v35, %v14953_v52  ;;  %v9714_v52 = vpop.f32.mrf.mxu0 }
 0x40a   :  { %7010 = vmatmul.mubr.bf16.gmra.mxu0 %v14818_v23  ;;  %v6292_v19 = vpop.f32.mrf.mxu1  ;;  %v6400_v23 = vmax.f32 %v6370_v27, 0.0  ;;  %v6231_v55 = vadd.f32 %v9709_v11, %v9663_v41 }
 0x40b   :  { %v6373_v40 = vadd.f32 %v15002_v31, %v6326_v26  ;;  %v6293_v32 = vadd.f32 %v6292_v19, %v6220_v6  ;;  %7017 = vmatprep.mubr.bf16.mxu0 %v14884_v15  ;;  %9848 = vmatpush3.bf16.msra.mxu0 %v11018_v20  ;;  %v9712_v26 = vadd.f32 %v9711_v30, %v9710_v33  ;;  %v11024_v15 = vld [vmem:[%s15490_s3 + $0x1a0] sm:$0xff]  }
 0x40c   :  { %v10041_v39 = vpop.f32.mrf.mxu1  ;;  %9849 = vmatprep.subr.bf16.mxu0 %v11020_v13 }
 0x40d   :  { %v6403_v56 = vmax.f32 %v6373_v40, 0.0  ;;  %v6329_v59 = vadd.f32 %v6293_v32, %v15679_v60  ;;  %v6236_v32 = vadd.f32 %v9712_v26, %v9666_v3  ;;  %v11027_v26 = vld [vmem:[%s15492_s7 + $0xb8] sm:$0xff]  }
 0x40e   :  { %v6295_v9 = vpop.f32.mrf.mxu1 }
 0x40f   :  { %v15055_v0 = vpack.c.bf16 %v6403_v56, %v6400_v23  ;;  %v6296_v45 = vadd.f32 %v6295_v9, %v6223_v25  ;;  %9850 = vmatpush3.bf16.msra.mxu0 %v11021_v16  ;;  %v6376_v28 = vadd.f32 %v15002_v31, %v6329_v59  ;;  %v9715_v56 = vadd.f32 %v9714_v52, %v9713_v21 }
 0x410   :  { %v10042_v38 = vpop.f32.mrf.mxu1  ;;  %10123 = vmatprep.subr.bf16.mxu0 %v15680_v49 }
 0x411   :  { %v6532_v4 = vrot.slane %v15055_v0, 2  ;;  %v7142_v63 = vrot.slane %v15055_v0, 4  ;;  %v6332_v10 = vadd.f32 %v6296_v45, %v15681_v53  ;;  %v6406_v17 = vmax.f32 %v6376_v28, 0.0  ;;  %v15684_v45 = vld [vmem:[#allocation17_spill] sm:$0xff] }
 0x412   :  { %7018 = vmatmul.mubr.bf16.gmra.mxu0 %v14873_v50  ;;  %v6300_v5 = vpop.f32.mrf.mxu1 }
 0x413   :  { %v6379_v14 = vadd.f32 %v15002_v31, %v6332_v10  ;;  %v6301_v57 = vadd.f32 %v6300_v5, %v6228_v18  ;;  %7327 = vmatprep.mubr.bf16.mxu0 %v14773_v51  ;;  %v6533_v46 = vsel %vm5126_vm5, %v6531_v48, %v6532_v4  ;;  %v15074_v20 = vsel %vm593_vm1, %v7141_v43, %v7142_v63  ;;  %v11022_v51 = vld [vmem:[%s15490_s3 + $0x80] sm:$0xff]  }
 0x414   :  { %v10045_v13 = vpop.f32.mrf.mxu1  ;;  %10056 = vmatmul.mubr.msk.bf16.vlgmr.msra.gmra.mxu1 %vm6670_vm6, %v6533_v46 }
 0x415   :  { %v6409_v24 = vmax.f32 %v6379_v14, 0.0  ;;  %v6335_v27 = vadd.f32 %v6301_v57, %v15682_v8  ;;  %10076 = vmatpush3.bf16.msra.mxu1 %v11019_v29  ;;  %10059 = vmatprep.mubr.msk.bf16.mxu1 %vm11067_vm4, %v15680_v49  ;;  %v11025_v13 = vld [vmem:[%s15492_s7 + $0x78] sm:$0xff]  }
 0x416   :  { %v6303_v6 = vpop.f32.mrf.mxu1  ;;  %10077 = vmatprep.subr.bf16.mxu1 %v15680_v49 }
 0x417   :  { %v15086_v35 = vpack.c.bf16 %v6409_v24, %v6406_v17  ;;  %v6304_v19 = vadd.f32 %v6303_v6, %v6231_v55  ;;  %v6382_v16 = vadd.f32 %v15002_v31, %v6335_v27 }
 0x418   :  { %v10046_v40 = vpop.f32.mrf.mxu1 }
 0x419   :  { %v6338_v39 = vadd.f32 %v6304_v19, %v15683_v58  ;;  %v6538_v23 = vrot.slane %v15086_v35, 2  ;;  %10078 = vmatpush3.bf16.msra.mxu1 %v11022_v51  ;;  %v7148_v33 = vrot.slane %v15086_v35, 4  ;;  %v6412_v9 = vmax.f32 %v6382_v16, 0.0  ;;  %v11026_v51 = vld [vmem:[%s15492_s7 + $0x70] sm:$0xff]   ;;  %v11029_v19 = vld [vmem:[%s15492_s7 + $0x68] sm:$0xff]  }
 0x41a   :  { %7328 = vmatmul.mubr.bf16.vlgmr.msra.gmra.mxu0 %v14762_v34  ;;  %v6308_v60 = vpop.f32.mrf.mxu1  ;;  %10099 = vmatprep.subr.bf16.mxu1 %v15680_v49  ;;  %v6239_v34 = vadd.f32 %v9715_v56, %v9669_v62  ;;  %v11030_v56 = vld [vmem:[%s15492_s7 + $0xa8] sm:$0xff]  }
 0x41b   :  { %v6385_v59 = vadd.f32 %v15002_v31, %v6338_v39  ;;  %v6309_v7 = vadd.f32 %v6308_v60, %v6236_v32  ;;  %7335 = vmatprep.mubr.bf16.mxu0 %v14828_v47  ;;  %v6539_v36 = vsel %vm5126_vm5, %v6532_v4, %v6538_v23  ;;  %v7149_v25 = vsel %vm593_vm1, %v7142_v63, %v7148_v33  ;;  %v15685_v4 = vld [vmem:[#allocation18_spill] sm:$0xff] }
 0x41c   :  { %v10049_v44 = vpop.f32.mrf.mxu1  ;;  %10060 = vmatmul.mubr.msk.bf16.gmra.mxu1 %vm6670_vm6, %v6539_v36  ;;  %10124 = vmatpush3.bf16.msra.mxu0 %v11025_v13  ;;  %v11031_v60 = vld [vmem:[%s15492_s7 + $0x60] sm:$0xff]  }
 0x41d   :  { %v6415_v30 = vmax.f32 %v6385_v59, 0.0  ;;  %v6341_v41 = vadd.f32 %v6309_v7, %v15684_v45  ;;  %10063 = vmatprep.mubr.msk.bf16.mxu1 %vm11067_vm4, %v15680_v49  ;;  %10125 = vmatprep.subr.bf16.mxu0 %v15680_v49 }
 0x41e   :  { %v6311_v48 = vpop.f32.mrf.mxu1 }
 0x41f   :  { %v6433_v43 = vpack.c.bf16 %v6415_v30, %v6412_v9  ;;  %v6312_v38 = vadd.f32 %v6311_v48, %v6239_v34  ;;  %v6388_v47 = vadd.f32 %v15002_v31, %v6341_v41  ;;  %v11032_v9 = vld [vmem:[%s15492_s7 + $0xa0] sm:$0xff]   ;;  %v11033_v30 = vld [vmem:[%s15492_s7 + $0x58] sm:$0xff]  }
 0x420   :  { %v10050_v18 = vpop.f32.mrf.mxu1  ;;  %10126 = vmatpush3.bf16.msra.mxu0 %v11026_v51  ;;  %v11034_v34 = vld [vmem:[%s15492_s7 + $0x98] sm:$0xff]  }
 0x421   :  { %v6344_v28 = vadd.f32 %v6312_v38, %v15685_v4  ;;  %v6544_v63 = vrot.slane %v6433_v43, 2  ;;  %v7154_v53 = vrot.slane %v6433_v43, 4  ;;  %v6418_v5 = vmax.f32 %v6388_v47, 0.0  ;;  %10127 = vmatprep.subr.bf16.mxu0 %v15680_v49  ;;  %v11035_v47 = vld [vmem:[%s15492_s7 + $0x50] sm:$0xff]  }
 0x422   :  { %7336 = vmatmul.mubr.bf16.gmra.mxu0 %v14816_v1  ;;  %v11036_v4 = vld [vmem:[%s15492_s7 + $0x90] sm:$0xff]  }
 0x423   :  { %v6391_v10 = vadd.f32 %v15002_v31, %v6344_v28  ;;  %7343 = vmatprep.mubr.bf16.mxu0 %v14871_v37  ;;  %v6545_v29 = vsel %vm5126_vm5, %v6538_v23, %v6544_v63  ;;  %v7155_v11 = vsel %vm593_vm1, %v7148_v33, %v7154_v53 }
 0x424   :  { %10064 = vmatmul.mubr.msk.bf16.gmra.mxu1 %vm6670_vm6, %v6545_v29  ;;  %10128 = vmatpush3.bf16.msra.mxu0 %v11029_v19 }
 0x425   :  { %v6421_v21 = vmax.f32 %v6391_v10, 0.0  ;;  %10067 = vmatprep.mubr.msk.bf16.mxu1 %vm11067_vm4, %v15680_v49  ;;  %10129 = vmatprep.subr.bf16.mxu0 %v15680_v49  ;;  %v11038_v10 = vld [vmem:[%s15492_s7 + $0x48] sm:$0xff]  }
 0x427   :  { %v6436_v14 = vpack.c.bf16 %v6421_v21, %v6418_v5  ;;  %v11039_v21 = vld [vmem:[%s15492_s7 + $0x80] sm:$0xff]  }
 0x428   :  { %10130 = vmatpush3.bf16.msra.mxu0 %v11031_v60 }
 0x429   :  { %v6550_v57 = vrot.slane %v6436_v14, 2  ;;  %v7160_v46 = vrot.slane %v6436_v14, 4  ;;  %10131 = vmatprep.subr.bf16.mxu0 %v15680_v49 }
 0x42a   :  { %7344 = vmatmul.mubr.bf16.gmra.mxu0 %v14851_v54  ;;  %v11023_v54 = vld [vmem:[%s15490_s3 + $0x1a8] sm:$0xff]  }
 0x42b   :  { %7351 = vmatprep.mubr.bf16.mxu0 %v14915_v22  ;;  %v6551_v1 = vsel %vm5126_vm5, %v6544_v63, %v6550_v57  ;;  %v7161_v37 = vsel %vm593_vm1, %v7154_v53, %v7160_v46  ;;  %v11037_v53 = vld [vmem:[%s15492_s7 + $0x88] sm:$0xff]  }
 0x42c   :  { %10068 = vmatmul.mubr.msk.bf16.gmra.mxu1 %vm6670_vm6, %v6551_v1  ;;  %10132 = vmatpush3.bf16.msra.mxu0 %v11033_v30 }
 0x42d   :  { %10071 = vmatprep.mubr.msk.bf16.mxu1 %vm11067_vm4, %v15680_v49  ;;  %10133 = vmatprep.subr.bf16.mxu0 %v15680_v49 }
 0x430   :  { %10134 = vmatpush3.bf16.msra.mxu0 %v11035_v47 }
 0x431   :  { %10135 = vmatprep.subr.bf16.mxu0 %v15680_v49 }
 0x432   :  { %7352 = vmatmul.mubr.bf16.gmra.mxu0 %v14895_v12 }
 0x433   :  { %7359 = vmatprep.mubr.bf16.mxu0 %v7158_v2 }
 0x434   :  { %10072 = vmatmul.mubr.msk.bf16.gmra.mxu1 %vm6670_vm6, %v6550_v57  ;;  %10136 = vmatpush3.bf16.msra.mxu0 %v11038_v10 }
 0x435   :  { %10079 = vmatprep.mubr.msk.bf16.mxu1 %vm11067_vm4, %v15680_v49  ;;  %10137 = vmatprep.subr.bf16.mxu0 %v15680_v49 }
 0x43a   :  { %7360 = vmatmul.mubr.bf16.gmra.mxu0 %v7156_v42 }
 0x43b   :  { %10139 = vmatprep.mubr.msk.bf16.mxu0 %vm11067_vm4, %v15680_v49 }
 0x43c   :  { %10080 = vmatmul.mubr.msk.bf16.vlgmr.msra.gmra.mxu1 %vm6670_vm6, %v15031_v61 }
 0x43d   :  { %10100 = vmatpush3.bf16.msra.mxu1 %v11023_v54  ;;  %10083 = vmatprep.mubr.msk.bf16.mxu1 %vm11067_vm4, %v15680_v49 }
 0x43e   :  { %10101 = vmatprep.subr.bf16.mxu1 %v15680_v49 }
 0x441   :  { %10102 = vmatpush3.bf16.msra.mxu1 %v11024_v15 }
 0x442   :  { %10179 = vmatprep.subr.bf16.mxu1 %v15680_v49 }
 0x444   :  { %10084 = vmatmul.mubr.msk.bf16.gmra.mxu1 %vm6670_vm6, %v15055_v0 }
 0x445   :  { %10087 = vmatprep.mubr.msk.bf16.mxu1 %vm11067_vm4, %v15680_v49 }
 0x44c   :  { %10088 = vmatmul.mubr.msk.bf16.gmra.mxu1 %vm6670_vm6, %v15086_v35  ;;  %v11028_v35 = vld [vmem:[%s15492_s7 + $0xb0] sm:$0xff]  }
 0x44d   :  { %10091 = vmatprep.mubr.msk.bf16.mxu1 %vm11067_vm4, %v15680_v49 }
 0x454   :  { %10092 = vmatmul.mubr.msk.bf16.gmra.mxu1 %vm6670_vm6, %v6433_v43 }
 0x455   :  { %10095 = vmatprep.mubr.msk.bf16.mxu1 %vm11067_vm4, %v15680_v49 }
 0x45c   :  { %10096 = vmatmul.mubr.msk.bf16.gmra.mxu1 %vm6670_vm6, %v6436_v14  ;;  %v11040_v14 = vld [vmem:[%s15492_s7 + $0x40] sm:$0xff]  }
 0x45d   :  { %10103 = vmatprep.mubr.msk.bf16.mxu1 %vm11067_vm4, %v15680_v49  ;;  %10138 = vmatpush3.bf16.msra.mxu0 %v11040_v14 }
 0x45e   :  { %10151 = vmatprep.subr.bf16.mxu0 %v15680_v49 }
 0x464   :  { %10104 = vmatmul.mubr.msk.bf16.vlgmr.msra.gmra.mxu1 %vm6670_vm6, %v15074_v20 }
 0x465   :  { %10107 = vmatprep.mubr.msk.bf16.mxu1 %vm11067_vm4, %v15680_v49  ;;  %10180 = vmatpush3.bf16.msra.mxu1 %v11027_v26 }
 0x466   :  { %10181 = vmatprep.subr.bf16.mxu1 %v15680_v49 }
 0x469   :  { %10182 = vmatpush3.bf16.msra.mxu1 %v11028_v35 }
 0x46a   :  { %10183 = vmatprep.subr.bf16.mxu1 %v15680_v49 }
 0x46c   :  { %10108 = vmatmul.mubr.msk.bf16.gmra.mxu1 %vm6670_vm6, %v7149_v25 }
 0x46d   :  { %10111 = vmatprep.mubr.msk.bf16.mxu1 %vm11067_vm4, %v15680_v49  ;;  %10184 = vmatpush3.bf16.msra.mxu1 %v11030_v56 }
 0x46e   :  { %10185 = vmatprep.subr.bf16.mxu1 %v15680_v49 }
 0x471   :  { %10186 = vmatpush3.bf16.msra.mxu1 %v11032_v9 }
 0x472   :  { %10187 = vmatprep.subr.bf16.mxu1 %v15680_v49 }
 0x474   :  { %10112 = vmatmul.mubr.msk.bf16.gmra.mxu1 %vm6670_vm6, %v7155_v11 }
 0x475   :  { %10115 = vmatprep.mubr.msk.bf16.mxu1 %vm11067_vm4, %v15680_v49  ;;  %10188 = vmatpush3.bf16.msra.mxu1 %v11034_v34 }
 0x476   :  { %10189 = vmatprep.subr.bf16.mxu1 %v15680_v49 }
 0x479   :  { %10190 = vmatpush3.bf16.msra.mxu1 %v11036_v4 }
 0x47a   :  { %10191 = vmatprep.subr.bf16.mxu1 %v15680_v49 }
 0x47c   :  { %10116 = vmatmul.mubr.msk.bf16.gmra.mxu1 %vm6670_vm6, %v7161_v37 }
 0x47d   :  { %10119 = vmatprep.mubr.msk.bf16.mxu1 %vm11067_vm4, %v15680_v49  ;;  %10192 = vmatpush3.bf16.msra.mxu1 %v11037_v53 }
 0x47e   :  { %10193 = vmatprep.subr.bf16.mxu1 %v15680_v49 }
 0x481   :  { %10194 = vmatpush3.bf16.msra.mxu1 %v11039_v21 }
 0x482   :  { %10235 = vmatprep.subr.bf16.mxu1 %v15680_v49 }
 0x484   :  { %10120 = vmatmul.mubr.msk.bf16.gmra.mxu1 %vm6670_vm6, %v7160_v46 }
 0x485   :  { %10195 = vmatprep.mubr.msk.bf16.mxu1 %vm11067_vm4, %v15680_v49 }
 0x48a   :  { %v9745_v50 = vpop.f32.mrf.mxu0 }
 0x48c   :  { %v9746_v42 = vpop.f32.mrf.mxu0 }
 0x48d   :  { %v15173_v12 = vadd.f32 %v9746_v42, %v9745_v50 }
 0x48e   :  { %v9748_v2 = vpop.f32.mrf.mxu0 }
 0x490   :  { %v9749_v22 = vpop.f32.mrf.mxu0 }
 0x491   :  { %v15175_v31 = vadd.f32 %v9749_v22, %v9748_v2 }
 0x492   :  { %v9751_v61 = vpop.f32.mrf.mxu0 }
 0x494   :  { %v9752_v0 = vpop.f32.mrf.mxu0 }
 0x495   :  { %v15177_v20 = vadd.f32 %v9752_v0, %v9751_v61 }
 0x496   :  { %v9754_v3 = vpop.f32.mrf.mxu0 }
 0x498   :  { %v9755_v17 = vpop.f32.mrf.mxu0 }
 0x499   :  { %v15182_v24 = vadd.f32 %v9755_v17, %v9754_v3 }
 0x49a   :  { %v9757_v8 = vpop.f32.mrf.mxu0 }
 0x49c   :  { %v9758_v27 = vpop.f32.mrf.mxu0 }
 0x49d   :  { %v15185_v55 = vadd.f32 %v9758_v27, %v9757_v8 }
 0x49e   :  { %v9760_v6 = vpop.f32.mrf.mxu0 }
 0x4a0   :  { %v9761_v52 = vpop.f32.mrf.mxu0 }
 0x4a1   :  { %v15201_v62 = vadd.f32 %v9761_v52, %v9760_v6 }
 0x4a2   :  { %v9763_v40 = vpop.f32.mrf.mxu0 }
 0x4a4   :  { %v9764_v32 = vpop.f32.mrf.mxu0 }
 0x4a5   :  { %v15205_v16 = vadd.f32 %v9764_v32, %v9763_v40 }
 0x4a6   :  { %v9766_v58 = vpop.f32.mrf.mxu0 }
 0x4a8   :  { %v9767_v39 = vpop.f32.mrf.mxu0 }
 0x4a9   :  { %v15207_v23 = vadd.f32 %v9767_v39, %v9766_v58 }
 0x4aa   :  { %v9769_v33 = vpop.f32.mrf.mxu0 }
 0x4ac   :  { %v9770_v59 = vpop.f32.mrf.mxu0 }
 0x4ad   :  { %v15215_v7 = vadd.f32 %v9770_v59, %v9769_v33 }
 0x4ae   :  { %v9772_v36 = vpop.f32.mrf.mxu0 }
 0x4b0   :  { %v9773_v25 = vpop.f32.mrf.mxu0 }
 0x4b2   :  { %v9798_v44 = vpop.f32.mrf.mxu0 }
 0x4b4   :  { %v9799_v45 = vpop.f32.mrf.mxu0 }
 0x4b5   :  { %v9800_v41 = vadd.f32 %v9799_v45, %v9798_v44 }
 0x4b6   :  { %v9801_v48 = vpop.f32.mrf.mxu0 }
 0x4b8   :  { %v9802_v43 = vpop.f32.mrf.mxu0 }
 0x4b9   :  { %v9803_v38 = vadd.f32 %v9802_v43, %v9801_v48 }
 0x4ba   :  { %v9804_v18 = vpop.f32.mrf.mxu0 }
 0x4bc   :  { %v9805_v28 = vpop.f32.mrf.mxu0 }
 0x4bd   :  { %v9806_v63 = vadd.f32 %v9805_v28, %v9804_v18 }
 0x4be   :  { %v9807_v29 = vpop.f32.mrf.mxu0 }
 0x4c0   :  { %v9808_v11 = vpop.f32.mrf.mxu0 }
 0x4c1   :  { %v9809_v5 = vadd.f32 %v9808_v11, %v9807_v29 }
 0x4c2   :  { %v9810_v57 = vpop.f32.mrf.mxu0 }
 0x4c4   :  { %v9811_v46 = vpop.f32.mrf.mxu0 }
 0x4c5   :  { %v9812_v1 = vadd.f32 %v9811_v46, %v9810_v57 }
 0x4c6   :  { %v9813_v37 = vpop.f32.mrf.mxu0 }
 0x4c8   :  { %v9814_v54 = vpop.f32.mrf.mxu0 }
 0x4c9   :  { %v9815_v15 = vadd.f32 %v9814_v54, %v9813_v37 }
 0x4ca   :  { %v9816_v50 = vpop.f32.mrf.mxu0 }
 0x4cc   :  { %v9817_v42 = vpop.f32.mrf.mxu0 }
 0x4cd   :  { %v9818_v2 = vadd.f32 %v9817_v42, %v9816_v50 }
 0x4ce   :  { %v9819_v22 = vpop.f32.mrf.mxu0 }
 0x4d0   :  { %v9820_v61 = vpop.f32.mrf.mxu0 }
 0x4d1   :  { %v9821_v0 = vadd.f32 %v9820_v61, %v9819_v22 }
 0x4d2   :  { %v9822_v3 = vpop.f32.mrf.mxu0 }
 0x4d4   :  { %v9823_v13 = vpop.f32.mrf.mxu0  ;;  %v6792_v17 = vpop.f32.mrf.mxu1 }
 0x4d5   :  { %v9824_v8 = vadd.f32 %v9823_v13, %v9822_v3  ;;  %v6793_v27 = vadd.f32 %v15173_v12, %v6792_v17 }
 0x4d6   :  { %v9825_v51 = vpop.f32.mrf.mxu0  ;;  %v10057_v26 = vpop.f32.mrf.mxu1 }
 0x4d7   :  { %v15256_v6 = vadd.f32 %v9800_v41, %v6793_v27 }
 0x4d8   :  { %v9826_v52 = vpop.f32.mrf.mxu0  ;;  %v6795_v35 = vpop.f32.mrf.mxu1 }
 0x4d9   :  { %v6796_v19 = vadd.f32 %v15175_v31, %v6795_v35 }
 0x4da   :  { %v9851_v40 = vpop.f32.mrf.mxu0  ;;  %v10058_v32 = vpop.f32.mrf.mxu1 }
 0x4db   :  { %v15259_v58 = vadd.f32 %v9803_v38, %v6796_v19 }
 0x4dc   :  { %v9852_v39 = vpop.f32.mrf.mxu0  ;;  %v6800_v33 = vpop.f32.mrf.mxu1 }
 0x4dd   :  { %v15261_v56 = vadd.f32 %v9852_v39, %v9851_v40  ;;  %v6801_v60 = vadd.f32 %v15177_v20, %v6800_v33 }
 0x4de   :  { %v9854_v59 = vpop.f32.mrf.mxu0  ;;  %v10061_v12 = vpop.f32.mrf.mxu1 }
 0x4df   :  { %v15264_v36 = vadd.f32 %v9806_v63, %v6801_v60 }
 0x4e0   :  { %v9855_v25 = vpop.f32.mrf.mxu0  ;;  %v6803_v44 = vpop.f32.mrf.mxu1 }
 0x4e1   :  { %v15266_v9 = vadd.f32 %v9855_v25, %v9854_v59  ;;  %v6804_v31 = vadd.f32 %v15182_v24, %v6803_v44 }
 0x4e2   :  { %v9857_v30 = vpop.f32.mrf.mxu0  ;;  %v10062_v45 = vpop.f32.mrf.mxu1 }
 0x4e3   :  { %v15269_v41 = vadd.f32 %v9809_v5, %v6804_v31 }
 0x4e4   :  { %v9858_v34 = vpop.f32.mrf.mxu0  ;;  %v6808_v48 = vpop.f32.mrf.mxu1 }
 0x4e5   :  { %v15271_v43 = vadd.f32 %v9858_v34, %v9857_v30  ;;  %v6809_v20 = vadd.f32 %v15185_v55, %v6808_v48 }
 0x4e6   :  { %v9860_v38 = vpop.f32.mrf.mxu0  ;;  %v10065_v18 = vpop.f32.mrf.mxu1 }
 0x4e7   :  { %v15274_v47 = vadd.f32 %v9812_v1, %v6809_v20 }
 0x4e8   :  { %v9861_v4 = vpop.f32.mrf.mxu0  ;;  %v6811_v28 = vpop.f32.mrf.mxu1 }
 0x4e9   :  { %v15276_v63 = vadd.f32 %v9861_v4, %v9860_v38  ;;  %v6812_v24 = vadd.f32 %v15201_v62, %v6811_v28 }
 0x4ea   :  { %v9863_v53 = vpop.f32.mrf.mxu0  ;;  %v10066_v10 = vpop.f32.mrf.mxu1 }
 0x4eb   :  { %v15279_v29 = vadd.f32 %v9815_v15, %v6812_v24 }
 0x4ec   :  { %v9864_v11 = vpop.f32.mrf.mxu0  ;;  %v6816_v5 = vpop.f32.mrf.mxu1 }
 0x4ed   :  { %v15281_v21 = vadd.f32 %v9864_v11, %v9863_v53  ;;  %v6817_v55 = vadd.f32 %v15205_v16, %v6816_v5 }
 0x4ee   :  { %v9866_v14 = vpop.f32.mrf.mxu0  ;;  %v10069_v57 = vpop.f32.mrf.mxu1 }
 0x4ef   :  { %v15284_v46 = vadd.f32 %v9818_v2, %v6817_v55 }
 0x4f0   :  { %v9867_v1 = vpop.f32.mrf.mxu0  ;;  %v6819_v37 = vpop.f32.mrf.mxu1 }
 0x4f1   :  { %v15286_v54 = vadd.f32 %v9867_v1, %v9866_v14  ;;  %v6820_v62 = vadd.f32 %v15207_v23, %v6819_v37  ;;  %v15307_v14 = vld [vmem:[%s15493_s6] ss:$0 sm:$0xff] }
 0x4f2   :  { %v9869_v50 = vpop.f32.mrf.mxu0  ;;  %v10070_v42 = vpop.f32.mrf.mxu1 }
 0x4f3   :  { %v15289_v15 = vadd.f32 %v9821_v0, %v6820_v62 }
 0x4f4   :  { %v9870_v22 = vpop.f32.mrf.mxu0  ;;  %v6824_v61 = vpop.f32.mrf.mxu1 }
 0x4f5   :  { %v15291_v3 = vadd.f32 %v9870_v22, %v9869_v50  ;;  %v6825_v16 = vadd.f32 %v15215_v7, %v6824_v61 }
 0x4f6   :  { %v9872_v13 = vpop.f32.mrf.mxu0  ;;  %v10073_v17 = vpop.f32.mrf.mxu1 }
 0x4f7   :  { %v7020_v2 = vadd.f32 %v9824_v8, %v6825_v16 }
 0x4f8   :  { %v9873_v27 = vpop.f32.mrf.mxu0  ;;  %v6827_v51 = vpop.f32.mrf.mxu1 }
 0x4f9   :  { %v15294_v26 = vadd.f32 %v9873_v27, %v9872_v13 }
 0x4fa   :  { %v9875_v52 = vpop.f32.mrf.mxu0  ;;  %v10074_v35 = vpop.f32.mrf.mxu1 }
 0x4fc   :  { %v9876_v23 = vpop.f32.mrf.mxu0  ;;  %v7059_v19 = vpop.f32.mrf.mxu1 }
 0x4fd   :  { %v15296_v40 = vadd.f32 %v9876_v23, %v9875_v52  ;;  %v7060_v10 = vadd.f32 %v7059_v19, %v15256_v6 }
 0x4fe   :  { %v9878_v0 = vpop.f32.mrf.mxu0  ;;  %v10081_v32 = vpop.f32.mrf.mxu1 }
 0x500   :  { %v9879_v39 = vpop.f32.mrf.mxu0  ;;  %v7062_v33 = vpop.f32.mrf.mxu1 }
 0x501   :  { %v7063_v1 = vadd.f32 %v7062_v33, %v15259_v58 }
 0x502   :  { %v10082_v60 = vpop.f32.mrf.mxu1 }
 0x504   :  { %v7067_v59 = vpop.f32.mrf.mxu1 }
 0x505   :  { %v7068_v6 = vadd.f32 %v7067_v59, %v15264_v36 }
 0x506   :  { %v10085_v7 = vpop.f32.mrf.mxu1 }
 0x508   :  { %v7070_v12 = vpop.f32.mrf.mxu1 }
 0x509   :  { %v7071_v58 = vadd.f32 %v7070_v12, %v15269_v41 }
 0x50a   :  { %v10086_v25 = vpop.f32.mrf.mxu1 }
 0x50c   :  { %v7075_v8 = vpop.f32.mrf.mxu1 }
 0x50d   :  { %v7076_v19 = vadd.f32 %v7075_v8, %v15274_v47 }
 0x50e   :  { %v10089_v44 = vpop.f32.mrf.mxu1 }
 0x510   :  { %v7078_v31 = vpop.f32.mrf.mxu1 }
 0x511   :  { %v7079_v59 = vadd.f32 %v7078_v31, %v15279_v29 }
 0x512   :  { %v10090_v30 = vpop.f32.mrf.mxu1 }
 0x514   :  { %v7083_v45 = vpop.f32.mrf.mxu1 }
 0x515   :  { %v7084_v29 = vadd.f32 %v7083_v45, %v15284_v46 }
 0x516   :  { %v10093_v34 = vpop.f32.mrf.mxu1 }
 0x518   :  { %v15298_v48 = vpop.f32.mrf.mxu1 }
 0x51a   :  { %v10094_v20 = vpop.f32.mrf.mxu1 }
 0x51c   :  { %v7091_v38 = vpop.f32.mrf.mxu1 }
 0x51d   :  { %v15300_v18 = vadd.f32 %v7091_v38, %v7020_v2 }
 0x51e   :  { %v10097_v4 = vpop.f32.mrf.mxu1 }
 0x520   :  { %v7094_v28 = vpop.f32.mrf.mxu1 }
 0x522   :  { %v10098_v24 = vpop.f32.mrf.mxu1 }
 0x523   :  { %v11042_v24 = vld [vmem:[%s15492_s7 + $0x30] sm:$0xff]  }
 0x524   :  { %v7401_v53 = vpop.f32.mrf.mxu1 }
 0x525   :  { %v7402_v11 = vadd.f32 %v15261_v56, %v7401_v53 }
 0x526   :  { %v10105_v5 = vpop.f32.mrf.mxu1 }
 0x527   :  { %v7439_v55 = vadd.f32 %v7402_v11, %v7060_v10 }
 0x528   :  { %v7404_v57 = vpop.f32.mrf.mxu1 }
 0x529   :  { %v7405_v37 = vadd.f32 %v15266_v9, %v7404_v57  ;;  %v7455_v50 = vadd.f32 %v15307_v14, %v7439_v55  ;;  %v11043_v57 = vld [vmem:[%s15492_s7 + $0x28] sm:$0xff]  }
 0x52a   :  { %v10106_v62 = vpop.f32.mrf.mxu1 }
 0x52b   :  { %v7440_v42 = vadd.f32 %v7405_v37, %v7063_v1  ;;  %v7464_v13 = vmax.f32 %v7455_v50, 0.0 }
 0x52c   :  { %v7409_v22 = vpop.f32.mrf.mxu1 }
 0x52d   :  { %v7456_v56 = vadd.f32 %v15307_v14, %v7440_v42  ;;  %v7410_v61 = vadd.f32 %v15271_v43, %v7409_v22  ;;  %v11044_v22 = vld [vmem:[%s15492_s7 + $0x20] sm:$0xff]  }
 0x52e   :  { %v10109_v16 = vpop.f32.mrf.mxu1 }
 0x52f   :  { %v7465_v17 = vmax.f32 %v7456_v56, 0.0  ;;  %v7441_v2 = vadd.f32 %v7410_v61, %v7068_v6 }
 0x530   :  { %v7412_v27 = vpop.f32.mrf.mxu1 }
 0x531   :  { %v15316_v51 = vpack.c.bf16 %v7465_v17, %v7464_v13  ;;  %v7413_v9 = vadd.f32 %v15276_v63, %v7412_v27  ;;  %v7457_v35 = vadd.f32 %v15307_v14, %v7441_v2 }
 0x532   :  { %v10110_v52 = vpop.f32.mrf.mxu1 }
 0x533   :  { %v7442_v23 = vadd.f32 %v7413_v9, %v7071_v58  ;;  %v7466_v39 = vmax.f32 %v7457_v35, 0.0  ;;  %v7515_v25 = vrot.slane %v15316_v51, 4  ;;  %v11047_v9 = vld [vmem:[%s15492_s7 + $0x8] sm:$0xff]   ;;  %v11048_v52 = vld [vmem:[%s15492_s7] sm:$0xff]   ;;  %v11049_v35 = vld [vmem:[%s15492_s7 + $0xf8] sm:$0xff]  }
 0x534   :  { %v7417_v36 = vpop.f32.mrf.mxu1 }
 0x535   :  { %v7458_v43 = vadd.f32 %v15307_v14, %v7442_v23  ;;  %v7418_v0 = vadd.f32 %v15281_v21, %v7417_v36  ;;  %v11041_v21 = vld [vmem:[%s15492_s7 + $0x38] sm:$0xff]   ;;  %v11050_v23 = vld [vmem:[%s15492_s7 + $0xf0] sm:$0xff]   ;;  %v11051_v36 = vld [vmem:[%s15492_s7 + $0xe8] sm:$0xff]  }
 0x536   :  { %v10113_v32 = vpop.f32.mrf.mxu1 }
 0x537   :  { %v7467_v33 = vmax.f32 %v7458_v43, 0.0  ;;  %v7443_v60 = vadd.f32 %v7418_v0, %v7076_v19  ;;  %v11053_v19 = vld [vmem:[%s15492_s7 + $0xd8] sm:$0xff]   ;;  %v11054_v43 = vld [vmem:[%s15492_s7 + $0xd0] sm:$0xff]   ;;  %v11055_v0 = vld [vmem:[%s15492_s7 + $0xc8] sm:$0xff]  }
 0x538   :  { %v7420_v41 = vpop.f32.mrf.mxu1  ;;  %v11056_v32 = vld [vmem:[%s15492_s7 + $0xc0] sm:$0xff]  }
 0x539   :  { %v15324_v7 = vpack.c.bf16 %v7467_v33, %v7466_v39  ;;  %v7421_v63 = vadd.f32 %v15286_v54, %v7420_v41  ;;  %v7459_v8 = vadd.f32 %v15307_v14, %v7443_v60  ;;  %v11057_v39 = vld [vmem:[%s15494_s9 + $0x38] sm:$0xff]   ;;  %v11058_v33 = vld [vmem:[%s15494_s9 + $0x30] sm:$0xff]   ;;  %v11059_v60 = vld [vmem:[%s15494_s9 + $0x28] sm:$0xff]  }
 0x53a   :  { %v10114_v12 = vpop.f32.mrf.mxu1  ;;  %v11060_v41 = vld [vmem:[%s15494_s9 + $0x20] sm:$0xff]  }
 0x53b   :  { %v7516_v47 = vrot.slane %v15324_v7, 4  ;;  %v7444_v44 = vadd.f32 %v7421_v63, %v7079_v59  ;;  %10196 = vmatmul.mubr.bf16.vlgmr.msra.gmra.mxu1 %v15324_v7  ;;  %v7468_v38 = vmax.f32 %v7459_v8, 0.0  ;;  %v11061_v59 = vld [vmem:[%s15494_s9 + $0x18] sm:$0xff]   ;;  %v11063_v63 = vld [vmem:[%s15494_s9 + $0x8] sm:$0xff]   ;;  %v11064_v12 = vld [vmem:[%s15494_s9] sm:$0xff]  }
 0x53c   :  { %v7425_v30 = vpop.f32.mrf.mxu1  ;;  %10199 = vmatprep.mubr.msk.bf16.mxu1 %vm11067_vm4, %v15680_v49  ;;  %10236 = vmatpush3.bf16.msra.mxu1 %v11057_v39 }
 0x53d   :  { %v7460_v54 = vadd.f32 %v15307_v14, %v7444_v44  ;;  %v7426_v31 = vadd.f32 %v15291_v3, %v7425_v30  ;;  %v7517_v34 = vsel %vm593_vm1, %v7515_v25, %v7516_v47  ;;  %v7087_v3 = vadd.f32 %v15298_v48, %v15289_v15  ;;  %10237 = vmatprep.subr.bf16.mxu1 %v15680_v49 }
 0x53e   :  { %v10117_v20 = vpop.f32.mrf.mxu1  ;;  %10140 = vmatmul.mubr.bf16.vlgmr.msra.gmra.mxu0 %v7517_v34 }
 0x53f   :  { %v7469_v4 = vmax.f32 %v7460_v54, 0.0  ;;  %v7445_v28 = vadd.f32 %v7426_v31, %v7084_v29  ;;  %10152 = vmatpush3.bf16.msra.mxu0 %v11041_v21  ;;  %10143 = vmatprep.mubr.msk.bf16.mxu0 %vm11067_vm4, %v15680_v49 }
 0x540   :  { %v7428_v46 = vpop.f32.mrf.mxu1  ;;  %10153 = vmatprep.subr.bf16.mxu0 %v15680_v49  ;;  %10238 = vmatpush3.bf16.msra.mxu1 %v11058_v33 }
 0x541   :  { %v15348_v45 = vpack.c.bf16 %v7469_v4, %v7468_v38  ;;  %v7429_v53 = vadd.f32 %v15294_v26, %v7428_v46  ;;  %v7461_v11 = vadd.f32 %v15307_v14, %v7445_v28  ;;  %10239 = vmatprep.subr.bf16.mxu1 %v15680_v49 }
 0x542   :  { %v10118_v10 = vpop.f32.mrf.mxu1 }
 0x543   :  { %v7446_v5 = vadd.f32 %v7429_v53, %v7087_v3  ;;  %10154 = vmatpush3.bf16.msra.mxu0 %v11042_v24  ;;  %10200 = vmatmul.mubr.bf16.gmra.mxu1 %v15348_v45  ;;  %v7518_v55 = vrot.slane %v15348_v45, 4  ;;  %v7470_v62 = vmax.f32 %v7461_v11, 0.0 }
 0x544   :  { %v7433_v1 = vpop.f32.mrf.mxu1  ;;  %10155 = vmatprep.subr.bf16.mxu0 %v15680_v49  ;;  %10203 = vmatprep.mubr.msk.bf16.mxu1 %vm11067_vm4, %v15680_v49 }
 0x545   :  { %v7462_v15 = vadd.f32 %v15307_v14, %v7446_v5  ;;  %v7434_v26 = vadd.f32 %v15296_v40, %v7433_v1  ;;  %v15363_v48 = vsel %vm593_vm1, %v7516_v47, %v7518_v55  ;;  %10240 = vmatpush3.bf16.msra.mxu1 %v11059_v60 }
 0x546   :  { %v10121_v37 = vpop.f32.mrf.mxu1  ;;  %10144 = vmatmul.mubr.bf16.gmra.mxu0 %v15363_v48  ;;  %10241 = vmatprep.subr.bf16.mxu1 %v15680_v49 }
 0x547   :  { %v7471_v50 = vmax.f32 %v7462_v15, 0.0  ;;  %v7447_v42 = vadd.f32 %v7434_v26, %v15300_v18  ;;  %10156 = vmatpush3.bf16.msra.mxu0 %v11043_v57  ;;  %10147 = vmatprep.mubr.msk.bf16.mxu0 %vm11067_vm4, %v15680_v49  ;;  %v11045_v18 = vld [vmem:[%s15492_s7 + $0x18] sm:$0xff]  }
 0x548   :  { %v7436_v6 = vpop.f32.mrf.mxu1  ;;  %10157 = vmatprep.subr.bf16.mxu0 %v15680_v49 }
 0x549   :  { %v7476_v40 = vpack.c.bf16 %v7471_v50, %v7470_v62  ;;  %v7463_v56 = vadd.f32 %v15307_v14, %v7447_v42  ;;  %v11046_v14 = vld [vmem:[%s15492_s7 + $0x10] sm:$0xff]   ;;  %10242 = vmatpush3.bf16.msra.mxu1 %v11060_v41 }
 0x54a   :  { %v10122_v61 = vpop.f32.mrf.mxu1  ;;  %10243 = vmatprep.subr.bf16.mxu1 %v15680_v49 }
 0x54b   :  { %v7472_v16 = vmax.f32 %v7463_v56, 0.0  ;;  %10158 = vmatpush3.bf16.msra.mxu0 %v11044_v22  ;;  %10204 = vmatmul.mubr.bf16.gmra.mxu1 %v7476_v40  ;;  %v7520_v13 = vrot.slane %v7476_v40, 4 }
 0x54c   :  { %10159 = vmatprep.subr.bf16.mxu0 %v15680_v49  ;;  %10251 = vmatprep.mubr.msk.bf16.mxu1 %vm11067_vm4, %v15680_v49 }
 0x54d   :  { %v7477_v17 = vpack.c.bf16 %v7472_v16, %v7472_v16  ;;  %v7521_v2 = vsel %vm593_vm1, %v7518_v55, %v7520_v13  ;;  %10244 = vmatpush3.bf16.msra.mxu1 %v11061_v59 }
 0x54e   :  { %10148 = vmatmul.mubr.bf16.gmra.mxu0 %v7521_v2  ;;  %10245 = vmatprep.subr.bf16.mxu1 %v15680_v49 }
 0x54f   :  { %v7881_v27 = vrot.slane %v7477_v17, 4  ;;  %10160 = vmatpush3.bf16.msra.mxu0 %v11045_v18  ;;  %10167 = vmatprep.mubr.msk.bf16.mxu0 %vm11067_vm4, %v15680_v49 }
 0x550   :  { %10161 = vmatprep.subr.bf16.mxu0 %v15680_v49 }
 0x551   :  { %v7882_v58 = vsel %vm593_vm1, %v7520_v13, %v7881_v27 }
 0x553   :  { %10162 = vmatpush3.bf16.msra.mxu0 %v11046_v14 }
 0x554   :  { %10163 = vmatprep.subr.bf16.mxu0 %v15680_v49 }
 0x557   :  { %10164 = vmatpush3.bf16.msra.mxu0 %v11047_v9  ;;  %v9404_v9 = vld [vmem:[%s15495_s8] ss:$0 sm:$0xff] }
 0x558   :  { %10165 = vmatprep.subr.bf16.mxu0 %v15680_v49 }
 0x55b   :  { %10166 = vmatpush3.bf16.msra.mxu0 %v11048_v52 }
 0x55c   :  { %10207 = vmatprep.subr.bf16.mxu0 %v15680_v49 }
 0x55e   :  { %10168 = vmatmul.mubr.bf16.vlgmr.msra.gmra.mxu0 %v15316_v51  ;;  %v11052_v51 = vld [vmem:[%s15492_s7 + $0xe0] sm:$0xff]  }
 0x55f   :  { %10208 = vmatpush3.bf16.msra.mxu0 %v11049_v35  ;;  %10171 = vmatprep.mubr.msk.bf16.mxu0 %vm11067_vm4, %v15680_v49 }
 0x560   :  { %10209 = vmatprep.subr.bf16.mxu0 %v15680_v49 }
 0x563   :  { %10210 = vmatpush3.bf16.msra.mxu0 %v11050_v23 }
 0x564   :  { %10211 = vmatprep.subr.bf16.mxu0 %v15680_v49 }
 0x566   :  { %10172 = vmatmul.mubr.bf16.gmra.mxu0 %v15324_v7  ;;  %v11062_v7 = vld [vmem:[%s15494_s9 + $0x10] sm:$0xff]  }
 0x567   :  { %10212 = vmatpush3.bf16.msra.mxu0 %v11051_v36  ;;  %10175 = vmatprep.mubr.msk.bf16.mxu0 %vm11067_vm4, %v15680_v49 }
 0x568   :  { %10213 = vmatprep.subr.bf16.mxu0 %v15680_v49  ;;  %10246 = vmatpush3.bf16.msra.mxu1 %v11062_v7 }
 0x569   :  { %10247 = vmatprep.subr.bf16.mxu1 %v15680_v49 }
 0x56b   :  { %10214 = vmatpush3.bf16.msra.mxu0 %v11052_v51 }
 0x56c   :  { %10215 = vmatprep.subr.bf16.mxu0 %v15680_v49  ;;  %10248 = vmatpush3.bf16.msra.mxu1 %v11063_v63 }
 0x56d   :  { %10249 = vmatprep.subr.bf16.mxu1 %v15680_v49 }
 0x56e   :  { %10176 = vmatmul.mubr.bf16.gmra.mxu0 %v15348_v45 }
 0x56f   :  { %10216 = vmatpush3.bf16.msra.mxu0 %v11053_v19  ;;  %10223 = vmatprep.mubr.msk.bf16.mxu0 %vm11067_vm4, %v15680_v49 }
 0x570   :  { %10217 = vmatprep.subr.bf16.mxu0 %v15680_v49  ;;  %10250 = vmatpush3.bf16.msra.mxu1 %v11064_v12 }
 0x573   :  { %10218 = vmatpush3.bf16.msra.mxu0 %v11054_v43 }
 0x574   :  { %10219 = vmatprep.subr.bf16.mxu0 %v15680_v49 }
 0x577   :  { %10220 = vmatpush3.bf16.msra.mxu0 %v11055_v0 }
 0x578   :  { %10221 = vmatprep.subr.bf16.mxu0 %v15680_v49 }
 0x57b   :  { %10222 = vmatpush3.bf16.msra.mxu0 %v11056_v32 }
 0x57e   :  { %10224 = vmatmul.mubr.bf16.vlgmr.msra.gmra.mxu0 %v15363_v48 }
 0x57f   :  { %10227 = vmatprep.mubr.msk.bf16.mxu0 %vm11067_vm4, %v15680_v49 }
 0x586   :  { %10228 = vmatmul.mubr.bf16.gmra.mxu0 %v7521_v2 }
 0x587   :  { %10231 = vmatprep.mubr.msk.bf16.mxu0 %vm11067_vm4, %v15680_v49 }
 0x58e   :  { %10232 = vmatmul.mubr.bf16.gmra.mxu0 %v7882_v58 }
 0x5fb   :  { %v7834_v25 = vpop.f32.mrf.mxu1 }
 0x5fd   :  { %v10197_v47 = vpop.f32.mrf.mxu1 }
 0x5fe   :  { %v7607_v8 = vpop.f32.mrf.mxu0 }
 0x5ff   :  { %v7837_v44 = vpop.f32.mrf.mxu1 }
 0x600   :  { %v10141_v21 = vpop.f32.mrf.mxu0 }
 0x601   :  { %v10198_v30 = vpop.f32.mrf.mxu1 }
 0x602   :  { %v7610_v29 = vpop.f32.mrf.mxu0 }
 0x603   :  { %v7842_v54 = vpop.f32.mrf.mxu1 }
 0x604   :  { %v10142_v31 = vpop.f32.mrf.mxu0 }
 0x605   :  { %v10201_v34 = vpop.f32.mrf.mxu1 }
 0x606   :  { %v7615_v20 = vpop.f32.mrf.mxu0 }
 0x607   :  { %v7845_v38 = vpop.f32.mrf.mxu1 }
 0x608   :  { %v10145_v4 = vpop.f32.mrf.mxu0 }
 0x609   :  { %v10202_v28 = vpop.f32.mrf.mxu1 }
 0x60a   :  { %v7618_v24 = vpop.f32.mrf.mxu0 }
 0x60b   :  { %v7850_v46 = vpop.f32.mrf.mxu1 }
 0x60c   :  { %v10146_v3 = vpop.f32.mrf.mxu0 }
 0x60d   :  { %v10205_v45 = vpop.f32.mrf.mxu1 }
 0x60e   :  { %v7623_v53 = vpop.f32.mrf.mxu0 }
 0x60f   :  { %v7853_v10 = vpop.f32.mrf.mxu1 }
 0x610   :  { %v10149_v11 = vpop.f32.mrf.mxu0 }
 0x611   :  { %v10206_v5 = vpop.f32.mrf.mxu1 }
 0x612   :  { %v7626_v55 = vpop.f32.mrf.mxu0 }
 0x614   :  { %v10150_v57 = vpop.f32.mrf.mxu0 }
 0x61e   :  { %v7712_v1 = vpop.f32.mrf.mxu0 }
 0x61f   :  { %v7713_v15 = vadd.f32 %v7712_v1, %v7607_v8 }
 0x620   :  { %v10169_v26 = vpop.f32.mrf.mxu0 }
 0x621   :  { %v7857_v48 = vadd.f32 %v7834_v25, %v7713_v15 }
 0x622   :  { %v7715_v37 = vpop.f32.mrf.mxu0 }
 0x623   :  { %v7716_v27 = vadd.f32 %v7715_v37, %v7610_v29 }
 0x624   :  { %v10170_v62 = vpop.f32.mrf.mxu0 }
 0x625   :  { %v7858_v35 = vadd.f32 %v7837_v44, %v7716_v27  ;;  %v9405_v62 = vld [vmem:[%s15496_s10] ss:$0 sm:$0xff] }
 0x626   :  { %v7720_v50 = vpop.f32.mrf.mxu0 }
 0x627   :  { %v7721_v42 = vadd.f32 %v7720_v50, %v7615_v20 }
 0x628   :  { %v10173_v22 = vpop.f32.mrf.mxu0 }
 0x629   :  { %v7859_v6 = vadd.f32 %v7842_v54, %v7721_v42 }
 0x62a   :  { %v7723_v40 = vpop.f32.mrf.mxu0 }
 0x62b   :  { %v7724_v43 = vadd.f32 %v7723_v40, %v7618_v24 }
 0x62c   :  { %v10174_v56 = vpop.f32.mrf.mxu0 }
 0x62d   :  { %v7860_v7 = vadd.f32 %v7845_v38, %v7724_v43 }
 0x62e   :  { %v7728_v61 = vpop.f32.mrf.mxu0 }
 0x62f   :  { %v7729_v16 = vadd.f32 %v7728_v61, %v7623_v53 }
 0x630   :  { %v10177_v13 = vpop.f32.mrf.mxu0 }
 0x631   :  { %v7861_v18 = vadd.f32 %v7850_v46, %v7729_v16 }
 0x632   :  { %v7731_v17 = vpop.f32.mrf.mxu0 }
 0x633   :  { %v7732_v8 = vadd.f32 %v7731_v17, %v7626_v55 }
 0x634   :  { %v10178_v2 = vpop.f32.mrf.mxu0 }
 0x635   :  { %v7862_v20 = vadd.f32 %v7853_v10, %v7732_v8 }
 0x63e   :  { %v7966_v14 = vpop.f32.mrf.mxu0 }
 0x63f   :  { %v7989_v58 = vadd.f32 %v7966_v14, %v7857_v48 }
 0x640   :  { %v10225_v52 = vpop.f32.mrf.mxu0 }
 0x641   :  { %v8002_v36 = vadd.f32 %v9404_v9, %v7989_v58 }
 0x642   :  { %v7969_v23 = vpop.f32.mrf.mxu0 }
 0x643   :  { %v7990_v51 = vadd.f32 %v7969_v23, %v7858_v35  ;;  %v8008_v39 = vmax.f32 %v8002_v36, 0.0 }
 0x644   :  { %v10226_v19 = vpop.f32.mrf.mxu0 }
 0x645   :  { %v8003_v0 = vadd.f32 %v9404_v9, %v7990_v51 }
 0x646   :  { %v7974_v32 = vpop.f32.mrf.mxu0 }
 0x647   :  { %v8009_v33 = vmax.f32 %v8003_v0, 0.0  ;;  %v7991_v60 = vadd.f32 %v7974_v32, %v7859_v6 }
 0x648   :  { %v10229_v41 = vpop.f32.mrf.mxu0 }
 0x649   :  { %v8014_v59 = vpack.c.bf16 %v8009_v33, %v8008_v39  ;;  %v8004_v12 = vadd.f32 %v9404_v9, %v7991_v60 }
 0x64a   :  { %v7977_v63 = vpop.f32.mrf.mxu0 }
 0x64b   :  { %v7992_v25 = vadd.f32 %v7977_v63, %v7860_v7  ;;  %10252 = vmatmul.mubr.bf16.vlgmr.msra.gmra.mxu1 %v8014_v59  ;;  %v8010_v30 = vmax.f32 %v8004_v12, 0.0 }
 0x64c   :  { %v10230_v47 = vpop.f32.mrf.mxu0  ;;  %10255 = vmatprep.mubr.msk.bf16.mxu1 %vm11067_vm4, %v15680_v49 }
 0x64d   :  { %v8005_v44 = vadd.f32 %v9404_v9, %v7992_v25 }
 0x64e   :  { %v7982_v21 = vpop.f32.mrf.mxu0 }
 0x64f   :  { %v8011_v29 = vmax.f32 %v8005_v44, 0.0  ;;  %v7993_v54 = vadd.f32 %v7982_v21, %v7861_v18 }
 0x650   :  { %v10233_v31 = vpop.f32.mrf.mxu0 }
 0x651   :  { %v8015_v34 = vpack.c.bf16 %v8011_v29, %v8010_v30  ;;  %v8006_v28 = vadd.f32 %v9404_v9, %v7993_v54 }
 0x652   :  { %v7985_v4 = vpop.f32.mrf.mxu0 }
 0x653   :  { %v7994_v38 = vadd.f32 %v7985_v4, %v7862_v20  ;;  %10256 = vmatmul.mubr.bf16.gmra.mxu1 %v8015_v34  ;;  %v8012_v3 = vmax.f32 %v8006_v28, 0.0 }
 0x654   :  { %v10234_v24 = vpop.f32.mrf.mxu0  ;;  %10259 = vmatprep.mubr.msk.bf16.mxu1 %vm11067_vm4, %v15680_v49 }
 0x655   :  { %v8007_v46 = vadd.f32 %v9404_v9, %v7994_v38 }
 0x657   :  { %v8013_v45 = vmax.f32 %v8007_v46, 0.0 }
 0x659   :  { %v8016_v53 = vpack.c.bf16 %v8013_v45, %v8012_v3 }
 0x65b   :  { %10260 = vmatmul.mubr.bf16.gmra.mxu1 %v8016_v53 }
 0x70b   :  { %v8122_v11 = vpop.f32.mrf.mxu1 }
 0x70c   :  { %v8123_v22 = vadd.f32 %v9405_v62, %v8122_v11 }
 0x70d   :  { %v10253_v5 = vpop.f32.mrf.mxu1 }
 0x70f   :  { %v8125_v55 = vpop.f32.mrf.mxu1 }
 0x711   :  { %v10254_v57 = vpop.f32.mrf.mxu1 }
 0x713   :  { %v8129_v1 = vpop.f32.mrf.mxu1 }
 0x715   :  { %v10257_v15 = vpop.f32.mrf.mxu1 }
 0x717   :  { %v8131_v10 = vpop.f32.mrf.mxu1 }
 0x719   :  { %v10258_v26 = vpop.f32.mrf.mxu1 }
 0x71b   :  { %v8135_v48 = vpop.f32.mrf.mxu1 }
 0x71d   :  { %v10261_v37 = vpop.f32.mrf.mxu1 }
 0x71f   :  { %v8137_v49 = vpop.f32.mrf.mxu1 }
 0x720   :  { %v8138_v50 = vadd.f32 %v9405_v62, %v8137_v49 }
 0x721   :  { %v10262_v42 = vpop.f32.mrf.mxu1 }
 0x722   :  { %v8142_v6 = vrot.slane %v8138_v50, 1 }
 0x724   :  { %v8145_v40 = vsel %vm8144_vm7, %v8123_v22, %v8142_v6 }
 0x725   :  { %8146 = vst [vmem:[%s15497_s11] sm:$0x3] %v8145_v40 }

</bundles_post_ra>
